<compile_context>
chip_gen: v5e
topology: v5e:2x2
jax: 0.10.0
libtpu: 0.0.40
codegen_flags: <defaults>
</compile_context>

<pallas_src>
import jax
import jax.numpy as jnp
from jax.experimental import pallas as pl
from jax.experimental.pallas import tpu as pltpu


# Fixed sizes for the 16x16 test input implied by the module.
H1, H2, H3, HO = 16, 8, 4, 2          # spatial size entering block1/2/3, after pool3
C0, C1, C2, C3 = 3, 32, 64, 128       # channel counts
NCLS = 2                              # fc output classes


# ---------------------------------------------------------------------------
# Single fused kernel: conv1+bn1+relu+pool1 -> conv2+... -> conv3+... ->
# adaptive-avg-pool + fc + softmax, one grid step per image.
# ---------------------------------------------------------------------------
def _fused_forward_kernel(x_ref,
                          w1_ref, s1_ref, b1_ref,
                          w2_ref, s2_ref, b2_ref,
                          w3_ref, s3_ref, b3_ref,
                          fcw_ref, fcb_ref,
                          o_ref,
                          p1, p2, yb1, yb2, yb3, rm):
    f32 = jnp.float32
    bf16 = jnp.bfloat16

    # Zero the padded next-block input buffers: their borders implement the
    # conv's zero padding; interiors are overwritten by the pool below.
    p1[...] = jnp.zeros_like(p1)
    p2[...] = jnp.zeros_like(p2)
    # Row 0 of each conv-output buffer is the max-pool's "row -1" padding.
    # Zero is a safe pad value because post-ReLU activations are >= 0.
    yb1[0:1, :] = jnp.zeros((1, yb1.shape[1]), f32)
    yb2[0:1, :] = jnp.zeros((1, yb2.shape[1]), f32)
    yb3[0:1, :] = jnp.zeros((1, yb3.shape[1]), f32)

    def conv_bn_relu(xp, h, w_ref, s_ref, b_ref, ybuf):
        # xp: (h+2, (h+2)*Cin) packed padded input, bf16.
        # One bf16 MXU matmul per kernel row against a block-banded
        # ((h+2)*Cin, h*Cout) weight matrix; f32 accumulation + BN epilogue.
        acc = jnp.zeros((h, w_ref.shape[2]), f32)
        for ki in range(3):
            acc = acc + jnp.dot(xp[ki:ki + h, :], w_ref[ki],
                                preferred_element_type=f32)
        ybuf[1:1 + h, :] = jnp.maximum(acc * s_ref[...] + b_ref[...], 0.0)

    def maxpool_s2(ybuf, h, c, write_piece):
        # MaxPool2d(kernel=3, stride=2, padding=1) on the packed conv output
        # stored in ybuf (row 0 = zero pad, rows 1..h = conv rows; cols packed
        # as (w, c)).  Output spatial size is h//2 x h//2 (h is even).
        ho = h // 2
        # Height direction: ybuf rows {2o, 2o+1, 2o+2} == conv rows
        # {2o-1, 2o, 2o+1}; gather results into the shared `rm` scratch.
        for o in range(ho):
            r = jnp.maximum(ybuf[2 * o:2 * o + 1, :],
                            ybuf[2 * o + 1:2 * o + 2, :])
            r = jnp.maximum(r, ybuf[2 * o + 2:2 * o + 3, :])
            rm[o:o + 1, :] = r
        rowmax = rm[0:ho, :]                                  # (ho, h*c)
        # Width direction: window w in {2wo-1, 2wo, 2wo+1} (clamped at 0).
        for wo in range(ho):
            lo = max(2 * wo - 1, 0)
            piece = rowmax[:, lo * c:(lo + 1) * c]
            for w in range(lo + 1, 2 * wo + 2):
                piece = jnp.maximum(piece, rowmax[:, w * c:(w + 1) * c])
            write_piece(wo, piece)                            # (ho, c) f32

    # ---- block 1: conv 3->32, bn, relu, pool   (16x16 -> 8x8) ----
    conv_bn_relu(x_ref[0], H1, w1_ref, s1_ref, b1_ref, yb1)

    def write1(wo, piece):
        p1[1:1 + H2, (1 + wo) * C1:(2 + wo) * C1] = piece

    maxpool_s2(yb1, H1, C1, write1)

    # ---- block 2: conv 32->64, bn, relu, pool  (8x8 -> 4x4) ----
    conv_bn_relu(p1[...].astype(bf16), H2, w2_ref, s2_ref, b2_ref, yb2)

    def write2(wo, piece):
        p2[1:1 + H3, (1 + wo) * C2:(2 + wo) * C2] = piece

    maxpool_s2(yb2, H2, C2, write2)

    # ---- block 3: conv 64->128, bn, relu, pool (4x4 -> 2x2) ----
    conv_bn_relu(p2[...].astype(bf16), H3, w3_ref, s3_ref, b3_ref, yb3)

    feat_sum = [jnp.zeros((1, C3), f32)]

    def write3(wo, piece):
        s = piece[0:1, :]
        for i in range(1, piece.shape[0]):
            s = s + piece[i:i + 1, :]
        feat_sum[0] = feat_sum[0] + s

    maxpool_s2(yb3, H3, C3, write3)

    # ---- head: adaptive avg pool (1,1) + squeeze + fc + softmax ----
    feat = feat_sum[0] * (1.0 / float(HO * HO))               # (1, 128)
    logits = jnp.dot(feat, fcw_ref[...],
                     preferred_element_type=f32) + fcb_ref[...]
    m = jnp.max(logits, axis=-1, keepdims=True)
    e = jnp.exp(logits - m)
    o_ref[0] = e / jnp.sum(e, axis=-1, keepdims=True)


def fused_forward(x_packed, prep):
    n = x_packed.shape[0]
    hp1, hp2, hp3 = H1 + 2, H2 + 2, H3 + 2
    out = pl.pallas_call(
        _fused_forward_kernel,
        out_shape=jax.ShapeDtypeStruct((n, 1, NCLS), jnp.float32),
        grid=(n,),
        in_specs=[
            pl.BlockSpec((1, hp1, hp1 * C0), lambda i: (i, 0, 0)),     # x
            pl.BlockSpec((3, hp1 * C0, H1 * C1), lambda i: (0, 0, 0)), # w1
            pl.BlockSpec((1, H1 * C1), lambda i: (0, 0)),              # s1
            pl.BlockSpec((1, H1 * C1), lambda i: (0, 0)),              # b1
            pl.BlockSpec((3, hp2 * C1, H2 * C2), lambda i: (0, 0, 0)), # w2
            pl.BlockSpec((1, H2 * C2), lambda i: (0, 0)),              # s2
            pl.BlockSpec((1, H2 * C2), lambda i: (0, 0)),              # b2
            pl.BlockSpec((3, hp3 * C2, H3 * C3), lambda i: (0, 0, 0)), # w3
            pl.BlockSpec((1, H3 * C3), lambda i: (0, 0)),              # s3
            pl.BlockSpec((1, H3 * C3), lambda i: (0, 0)),              # b3
            pl.BlockSpec((C3, NCLS), lambda i: (0, 0)),                # fc_w
            pl.BlockSpec((1, NCLS), lambda i: (0, 0)),                 # fc_b
        ],
        out_specs=pl.BlockSpec((1, 1, NCLS), lambda i: (i, 0, 0)),
        scratch_shapes=[
            pltpu.VMEM((hp2, hp2 * C1), jnp.float32),    # p1: padded block2 input
            pltpu.VMEM((hp3, hp3 * C2), jnp.float32),    # p2: padded block3 input
            pltpu.VMEM((H1 + 1, H1 * C1), jnp.float32),  # yb1: conv1 output (+pad row)
            pltpu.VMEM((H2 + 1, H2 * C2), jnp.float32),  # yb2
            pltpu.VMEM((H3 + 1, H3 * C3), jnp.float32),  # yb3
            pltpu.VMEM((H1 // 2, H1 * C1), jnp.float32), # rm: shared row-max buffer
        ],
        compiler_params=pltpu.CompilerParams(
            dimension_semantics=("parallel",)),
    )(x_packed,
      prep["block1"]["w"], prep["block1"]["s"], prep["block1"]["b"],
      prep["block2"]["w"], prep["block2"]["s"], prep["block2"]["b"],
      prep["block3"]["w"], prep["block3"]["s"], prep["block3"]["b"],
      prep["fc_w"], prep["fc_b"])
    return out.reshape(n, NCLS)


# ---------------------------------------------------------------------------
# One-time parameter preparation (done outside the per-call hot path).
# ---------------------------------------------------------------------------
def _banded_conv_weights(w_oihw, w_out):
    """(Cout, Cin, 3, 3) torch conv weight -> (3, (W+2)*Cin, W*Cout) bf16.

    One block-banded matrix per kernel row ki, such that for the packed,
    zero-padded input row xp[h+ki] (cols = (padded_w, cin)) the product
    xp[h+ki] @ B[ki] is that kernel row's contribution to the packed conv
    output row h (cols = (w, cout))."""
    wk = jnp.transpose(w_oihw, (2, 3, 1, 0))              # (kh, kw, Cin, Cout)
    eye = jnp.eye(w_out + 2, dtype=jnp.float32)
    cin, cout = wk.shape[2], wk.shape[3]
    mats = []
    for ki in range(3):
        b = jnp.zeros(((w_out + 2) * cin, w_out * cout), jnp.float32)
        for kj in range(3):
            shift = eye[:, kj:kj + w_out]                 # 1 at (w+kj, w)
            b = b + jnp.kron(shift, wk[ki, kj])
        mats.append(b)
    return jnp.stack(mats).astype(jnp.bfloat16)


def prepare_params(params, eps=1e-5):
    """Fold conv bias + eval-mode BatchNorm into a scale/bias epilogue and
    pre-pack conv/fc weights into the layouts used by the fused kernel."""
    spatial = {"block1": H1, "block2": H2, "block3": H3}
    prep = {}
    for name in ("block1", "block2", "block3"):
        p = params[name]
        w_out = spatial[name]
        cout = p["w"].shape[0]
        scale = p["gamma"] / jnp.sqrt(p["var"] + eps)
        bias = p["beta"] + (p["b"] - p["mean"]) * scale
        prep[name] = dict(
            w=_banded_conv_weights(p["w"], w_out),
            s=jnp.tile(scale, w_out).reshape(1, w_out * cout).astype(jnp.float32),
            b=jnp.tile(bias, w_out).reshape(1, w_out * cout).astype(jnp.float32),
        )
    prep["fc_w"] = params["fc_w"].T.astype(jnp.float32)   # (128, 2)
    prep["fc_b"] = params["fc_b"].reshape(1, NCLS).astype(jnp.float32)
    return prep


@jax.jit
def my_model_forward(x_nchw, prep):
    n = x_nchw.shape[0]
    assert x_nchw.shape[1:] == (C0, H1, H1)
    # NCHW -> NHWC -> spatial zero-pad -> packed (rows = padded H, cols = padded W * C)
    x = jnp.transpose(x_nchw, (0, 2, 3, 1))
    x = jnp.pad(x, ((0, 0), (1, 1), (1, 1), (0, 0)))
    x = x.reshape(n, H1 + 2, (H1 + 2) * C0).astype(jnp.bfloat16)
    return fused_forward(x, prep)


# ---------------------------------------------------------------------------
# Pure-jnp (non-Pallas) reference of MyModel.forward in eval mode, and
# deterministic synthetic parameters.
# ---------------------------------------------------------------------------
def _reference_forward(x_nchw, params, eps=1e-5):
    x = jnp.transpose(x_nchw, (0, 2, 3, 1)).astype(jnp.float32)
    for name in ("block1", "block2", "block3"):
        p = params[name]
        n, h, w, cin = x.shape
        cout = p["w"].shape[0]
        xp = jnp.pad(x, ((0, 0), (1, 1), (1, 1), (0, 0)))
        cols = [xp[:, ki:ki + h, kj:kj + w, :]
                for ki in range(3) for kj in range(3)]
        patches = jnp.concatenate(cols, axis=-1).reshape(n * h * w, 9 * cin)
        wmat = jnp.transpose(p["w"], (2, 3, 1, 0)).reshape(9 * cin, cout)
        y = patches @ wmat + p["b"]
        y = (y - p["mean"]) * (p["gamma"] / jnp.sqrt(p["var"] + eps)) + p["beta"]
        y = jnp.maximum(y, 0.0).reshape(n, h, w, cout)
        yp = jnp.pad(y, ((0, 0), (1, 1), (1, 1), (0, 0)),
                     constant_values=-jnp.inf)
        ho, wo = h // 2, w // 2
        m = None
        for ki in range(3):
            for kj in range(3):
                s = yp[:, ki:ki + 2 * ho:2, kj:kj + 2 * wo:2, :]
                m = s if m is None else jnp.maximum(m, s)
        x = m
    feat = jnp.mean(x, axis=(1, 2))                        # (N, 128)
    logits = feat @ params["fc_w"].T + params["fc_b"]
    z = logits - jnp.max(logits, axis=-1, keepdims=True)
    e = jnp.exp(z)
    return e / jnp.sum(e, axis=-1, keepdims=True)


def init_params(key):
    params = {}
    chans = [(C0, C1), (C1, C2), (C2, C3)]
    for idx, (cin, cout) in enumerate(chans, start=1):
        key, kw, kb, kg, kbe, km, kv = jax.random.split(key, 7)
        params[f"block{idx}"] = dict(
            w=0.1 * jax.random.normal(kw, (cout, cin, 3, 3), jnp.float32),
            b=0.1 * jax.random.normal(kb, (cout,), jnp.float32),
            gamma=1.0 + 0.1 * jax.random.normal(kg, (cout,), jnp.float32),
            beta=0.1 * jax.random.normal(kbe, (cout,), jnp.float32),
            mean=0.1 * jax.random.normal(km, (cout,), jnp.float32),
            var=1.0 + 0.1 * jnp.abs(jax.random.normal(kv, (cout,), jnp.float32)),
        )
    key, kfw, kfb = jax.random.split(key, 3)
    params["fc_w"] = 0.1 * jax.random.normal(kfw, (NCLS, C3), jnp.float32)
    params["fc_b"] = 0.1 * jax.random.normal(kfb, (NCLS,), jnp.float32)
    return params


if __name__ == "__main__":
    key = jax.random.PRNGKey(0)
    k_x, k_p = jax.random.split(key)
    x = jax.random.normal(k_x, (2, C0, H1, H1), jnp.float32)   # NCHW input
    params = init_params(k_p)
    prep = prepare_params(params)

    out = my_model_forward(x, prep)
    out = jax.block_until_ready(out)

    assert out.shape == (2, NCLS)
    assert bool(jnp.all(jnp.isfinite(out)))
    # softmax rows sum to 1
    assert bool(jnp.all(jnp.abs(jnp.sum(out, axis=-1) - 1.0) < 1e-5))
    # numerical check vs a pure-jnp f32 reference (kernel uses bf16 operands)
    ref = _reference_forward(x, params)
    assert bool(jnp.max(jnp.abs(out - ref)) < 5e-2)
    print("KERNEL_OK")
</pallas_src>

<mosaic_0001>
module attributes {stable_mosaic.version = 11 : i64} {
  func.func @_fused_forward_kernel(%arg0: i32, %arg1: memref<1x18x54xbf16, #tpu.memory_space<vmem>>, %arg2: memref<3x54x512xbf16, #tpu.memory_space<vmem>>, %arg3: memref<1x512xf32, #tpu.memory_space<vmem>>, %arg4: memref<1x512xf32, #tpu.memory_space<vmem>>, %arg5: memref<3x320x512xbf16, #tpu.memory_space<vmem>>, %arg6: memref<1x512xf32, #tpu.memory_space<vmem>>, %arg7: memref<1x512xf32, #tpu.memory_space<vmem>>, %arg8: memref<3x384x512xbf16, #tpu.memory_space<vmem>>, %arg9: memref<1x512xf32, #tpu.memory_space<vmem>>, %arg10: memref<1x512xf32, #tpu.memory_space<vmem>>, %arg11: memref<128x2xf32, #tpu.memory_space<vmem>>, %arg12: memref<1x2xf32, #tpu.memory_space<vmem>>, %arg13: memref<1x1x2xf32, #tpu.memory_space<vmem>>, %arg14: memref<10x320xf32, #tpu.memory_space<vmem>>, %arg15: memref<6x384xf32, #tpu.memory_space<vmem>>, %arg16: memref<17x512xf32, #tpu.memory_space<vmem>>, %arg17: memref<9x512xf32, #tpu.memory_space<vmem>>, %arg18: memref<5x512xf32, #tpu.memory_space<vmem>>, %arg19: memref<8x512xf32, #tpu.memory_space<vmem>>) attributes {dimension_semantics = [#tpu.dimension_semantics<parallel>], iteration_bounds = array<i64: 2>, scalar_prefetch = 0 : i64, scratch_operands = 6 : i64, tpu.core_type = #tpu.core_type<tc>, window_params = [{transform_indices = @transform_0, window_bounds = array<i64: 1, 18, 54>}, {pipeline_mode = #tpu.pipeline_mode<synchronous>, transform_indices = @transform_1, window_bounds = array<i64: 3, 54, 512>}, {pipeline_mode = #tpu.pipeline_mode<synchronous>, transform_indices = @transform_2, window_bounds = array<i64: 1, 512>}, {pipeline_mode = #tpu.pipeline_mode<synchronous>, transform_indices = @transform_3, window_bounds = array<i64: 1, 512>}, {pipeline_mode = #tpu.pipeline_mode<synchronous>, transform_indices = @transform_4, window_bounds = array<i64: 3, 320, 512>}, {pipeline_mode = #tpu.pipeline_mode<synchronous>, transform_indices = @transform_5, window_bounds = array<i64: 1, 512>}, {pipeline_mode = #tpu.pipeline_mode<synchronous>, transform_indices = @transform_6, window_bounds = array<i64: 1, 512>}, {pipeline_mode = #tpu.pipeline_mode<synchronous>, transform_indices = @transform_7, window_bounds = array<i64: 3, 384, 512>}, {pipeline_mode = #tpu.pipeline_mode<synchronous>, transform_indices = @transform_8, window_bounds = array<i64: 1, 512>}, {pipeline_mode = #tpu.pipeline_mode<synchronous>, transform_indices = @transform_9, window_bounds = array<i64: 1, 512>}, {pipeline_mode = #tpu.pipeline_mode<synchronous>, transform_indices = @transform_10, window_bounds = array<i64: 128, 2>}, {pipeline_mode = #tpu.pipeline_mode<synchronous>, transform_indices = @transform_11, window_bounds = array<i64: 1, 2>}, {transform_indices = @transform_12, window_bounds = array<i64: 1, 1, 2>}]} {
    %cst = arith.constant 0.000000e+00 : f32
    %0 = vector.broadcast %cst : f32 to vector<10x320xf32>
    %c0 = arith.constant 0 : index
    %c0_0 = arith.constant 0 : index
    %1 = vector.load %arg14[%c0, %c0_0] : memref<10x320xf32, #tpu.memory_space<vmem>>, vector<10x320xf32>
    tpu.vector_store %arg14[%c0, %c0_0], %0 {strides = array<i32>} : memref<10x320xf32, #tpu.memory_space<vmem>>, vector<10x320xf32>,
    %cst_1 = arith.constant 0.000000e+00 : f32
    %2 = vector.broadcast %cst_1 : f32 to vector<6x384xf32>
    %c0_2 = arith.constant 0 : index
    %c0_3 = arith.constant 0 : index
    %3 = vector.load %arg15[%c0_2, %c0_3] : memref<6x384xf32, #tpu.memory_space<vmem>>, vector<6x384xf32>
    tpu.vector_store %arg15[%c0_2, %c0_3], %2 {strides = array<i32>} : memref<6x384xf32, #tpu.memory_space<vmem>>, vector<6x384xf32>,
    %cst_4 = arith.constant 0.000000e+00 : f32
    %4 = vector.broadcast %cst_4 : f32 to vector<1x512xf32>
    %c0_5 = arith.constant 0 : index
    %c0_6 = arith.constant 0 : index
    %5 = vector.load %arg16[%c0_5, %c0_6] : memref<17x512xf32, #tpu.memory_space<vmem>>, vector<1x512xf32>
    tpu.vector_store %arg16[%c0_5, %c0_6], %4 {strides = array<i32>} : memref<17x512xf32, #tpu.memory_space<vmem>>, vector<1x512xf32>,
    %cst_7 = arith.constant 0.000000e+00 : f32
    %6 = vector.broadcast %cst_7 : f32 to vector<1x512xf32>
    %c0_8 = arith.constant 0 : index
    %c0_9 = arith.constant 0 : index
    %7 = vector.load %arg17[%c0_8, %c0_9] : memref<9x512xf32, #tpu.memory_space<vmem>>, vector<1x512xf32>
    tpu.vector_store %arg17[%c0_8, %c0_9], %6 {strides = array<i32>} : memref<9x512xf32, #tpu.memory_space<vmem>>, vector<1x512xf32>,
    %cst_10 = arith.constant 0.000000e+00 : f32
    %8 = vector.broadcast %cst_10 : f32 to vector<1x512xf32>
    %c0_11 = arith.constant 0 : index
    %c0_12 = arith.constant 0 : index
    %9 = vector.load %arg18[%c0_11, %c0_12] : memref<5x512xf32, #tpu.memory_space<vmem>>, vector<1x512xf32>
    tpu.vector_store %arg18[%c0_11, %c0_12], %8 {strides = array<i32>} : memref<5x512xf32, #tpu.memory_space<vmem>>, vector<1x512xf32>,
    %c0_13 = arith.constant 0 : index
    %c0_14 = arith.constant 0 : index
    %c0_15 = arith.constant 0 : index
    %10 = vector.load %arg1[%c0_13, %c0_14, %c0_15] : memref<1x18x54xbf16, #tpu.memory_space<vmem>>, vector<1x18x54xbf16>
    %11 = vector.shape_cast %10 : vector<1x18x54xbf16> to vector<18x54xbf16>
    %cst_16 = arith.constant 0.000000e+00 : f32
    %12 = vector.broadcast %cst_16 : f32 to vector<16x512xf32>
    %13 = vector.extract_strided_slice %11 {offsets = [0, 0], sizes = [16, 54], strides = [1, 1]} : vector<18x54xbf16> to vector<16x54xbf16>
    %c0_17 = arith.constant 0 : index
    %c0_18 = arith.constant 0 : index
    %c0_19 = arith.constant 0 : index
    %14 = vector.load %arg2[%c0_17, %c0_18, %c0_19] : memref<3x54x512xbf16, #tpu.memory_space<vmem>>, vector<1x54x512xbf16>
    %15 = vector.shape_cast %14 : vector<1x54x512xbf16> to vector<54x512xbf16>
    %cst_20 = arith.constant dense<0.000000e+00> : vector<16x512xf32>
    %16 = tpu.matmul %13, %15, %cst_20 {dimension_numbers = #tpu.dot_dimension_numbers<[1], [0], [0], [1], [0, 0, 1, 1], [], []>} : vector<16x54xbf16>, vector<54x512xbf16>, vector<16x512xf32> -> vector<16x512xf32>
    %17 = arith.addf %12, %16 : vector<16x512xf32>
    %18 = vector.extract_strided_slice %11 {offsets = [1, 0], sizes = [16, 54], strides = [1, 1]} : vector<18x54xbf16> to vector<16x54xbf16>
    %c1 = arith.constant 1 : index
    %c0_21 = arith.constant 0 : index
    %c0_22 = arith.constant 0 : index
    %19 = vector.load %arg2[%c1, %c0_21, %c0_22] : memref<3x54x512xbf16, #tpu.memory_space<vmem>>, vector<1x54x512xbf16>
    %20 = vector.shape_cast %19 : vector<1x54x512xbf16> to vector<54x512xbf16>
    %cst_23 = arith.constant dense<0.000000e+00> : vector<16x512xf32>
    %21 = tpu.matmul %18, %20, %cst_23 {dimension_numbers = #tpu.dot_dimension_numbers<[1], [0], [0], [1], [0, 0, 1, 1], [], []>} : vector<16x54xbf16>, vector<54x512xbf16>, vector<16x512xf32> -> vector<16x512xf32>
    %22 = arith.addf %17, %21 : vector<16x512xf32>
    %23 = vector.extract_strided_slice %11 {offsets = [2, 0], sizes = [16, 54], strides = [1, 1]} : vector<18x54xbf16> to vector<16x54xbf16>
    %c2 = arith.constant 2 : index
    %c0_24 = arith.constant 0 : index
    %c0_25 = arith.constant 0 : index
    %24 = vector.load %arg2[%c2, %c0_24, %c0_25] : memref<3x54x512xbf16, #tpu.memory_space<vmem>>, vector<1x54x512xbf16>
    %25 = vector.shape_cast %24 : vector<1x54x512xbf16> to vector<54x512xbf16>
    %cst_26 = arith.constant dense<0.000000e+00> : vector<16x512xf32>
    %26 = tpu.matmul %23, %25, %cst_26 {dimension_numbers = #tpu.dot_dimension_numbers<[1], [0], [0], [1], [0, 0, 1, 1], [], []>} : vector<16x54xbf16>, vector<54x512xbf16>, vector<16x512xf32> -> vector<16x512xf32>
    %27 = arith.addf %22, %26 : vector<16x512xf32>
    %c0_27 = arith.constant 0 : index
    %c0_28 = arith.constant 0 : index
    %28 = vector.load %arg3[%c0_27, %c0_28] : memref<1x512xf32, #tpu.memory_space<vmem>>, vector<1x512xf32>
    %29 = vector.broadcast %28 : vector<1x512xf32> to vector<16x512xf32>
    %30 = arith.mulf %27, %29 : vector<16x512xf32>
    %c0_29 = arith.constant 0 : index
    %c0_30 = arith.constant 0 : index
    %31 = vector.load %arg4[%c0_29, %c0_30] : memref<1x512xf32, #tpu.memory_space<vmem>>, vector<1x512xf32>
    %32 = vector.broadcast %31 : vector<1x512xf32> to vector<16x512xf32>
    %33 = arith.addf %30, %32 : vector<16x512xf32>
    %cst_31 = arith.constant 0.000000e+00 : f32
    %34 = vector.broadcast %cst_31 : f32 to vector<16x512xf32>
    %35 = arith.maximumf %33, %34 : vector<16x512xf32>
    %c1_32 = arith.constant 1 : index
    %c0_33 = arith.constant 0 : index
    %36 = vector.load %arg16[%c1_32, %c0_33] : memref<17x512xf32, #tpu.memory_space<vmem>>, vector<16x512xf32>
    tpu.vector_store %arg16[%c1_32, %c0_33], %35 {strides = array<i32>} : memref<17x512xf32, #tpu.memory_space<vmem>>, vector<16x512xf32>,
    %c0_34 = arith.constant 0 : index
    %c0_35 = arith.constant 0 : index
    %37 = vector.load %arg16[%c0_34, %c0_35] : memref<17x512xf32, #tpu.memory_space<vmem>>, vector<1x512xf32>
    %c1_36 = arith.constant 1 : index
    %c0_37 = arith.constant 0 : index
    %38 = vector.load %arg16[%c1_36, %c0_37] : memref<17x512xf32, #tpu.memory_space<vmem>>, vector<1x512xf32>
    %39 = arith.maximumf %37, %38 : vector<1x512xf32>
    %c2_38 = arith.constant 2 : index
    %c0_39 = arith.constant 0 : index
    %40 = vector.load %arg16[%c2_38, %c0_39] : memref<17x512xf32, #tpu.memory_space<vmem>>, vector<1x512xf32>
    %41 = arith.maximumf %39, %40 : vector<1x512xf32>
    %c0_40 = arith.constant 0 : index
    %c0_41 = arith.constant 0 : index
    %42 = vector.load %arg19[%c0_40, %c0_41] : memref<8x512xf32, #tpu.memory_space<vmem>>, vector<1x512xf32>
    tpu.vector_store %arg19[%c0_40, %c0_41], %41 {strides = array<i32>} : memref<8x512xf32, #tpu.memory_space<vmem>>, vector<1x512xf32>,
    %c2_42 = arith.constant 2 : index
    %c0_43 = arith.constant 0 : index
    %43 = vector.load %arg16[%c2_42, %c0_43] : memref<17x512xf32, #tpu.memory_space<vmem>>, vector<1x512xf32>
    %c3 = arith.constant 3 : index
    %c0_44 = arith.constant 0 : index
    %44 = vector.load %arg16[%c3, %c0_44] : memref<17x512xf32, #tpu.memory_space<vmem>>, vector<1x512xf32>
    %45 = arith.maximumf %43, %44 : vector<1x512xf32>
    %c4 = arith.constant 4 : index
    %c0_45 = arith.constant 0 : index
    %46 = vector.load %arg16[%c4, %c0_45] : memref<17x512xf32, #tpu.memory_space<vmem>>, vector<1x512xf32>
    %47 = arith.maximumf %45, %46 : vector<1x512xf32>
    %c1_46 = arith.constant 1 : index
    %c0_47 = arith.constant 0 : index
    %48 = vector.load %arg19[%c1_46, %c0_47] : memref<8x512xf32, #tpu.memory_space<vmem>>, vector<1x512xf32>
    tpu.vector_store %arg19[%c1_46, %c0_47], %47 {strides = array<i32>} : memref<8x512xf32, #tpu.memory_space<vmem>>, vector<1x512xf32>,
    %c4_48 = arith.constant 4 : index
    %c0_49 = arith.constant 0 : index
    %49 = vector.load %arg16[%c4_48, %c0_49] : memref<17x512xf32, #tpu.memory_space<vmem>>, vector<1x512xf32>
    %c5 = arith.constant 5 : index
    %c0_50 = arith.constant 0 : index
    %50 = vector.load %arg16[%c5, %c0_50] : memref<17x512xf32, #tpu.memory_space<vmem>>, vector<1x512xf32>
    %51 = arith.maximumf %49, %50 : vector<1x512xf32>
    %c6 = arith.constant 6 : index
    %c0_51 = arith.constant 0 : index
    %52 = vector.load %arg16[%c6, %c0_51] : memref<17x512xf32, #tpu.memory_space<vmem>>, vector<1x512xf32>
    %53 = arith.maximumf %51, %52 : vector<1x512xf32>
    %c2_52 = arith.constant 2 : index
    %c0_53 = arith.constant 0 : index
    %54 = vector.load %arg19[%c2_52, %c0_53] : memref<8x512xf32, #tpu.memory_space<vmem>>, vector<1x512xf32>
    tpu.vector_store %arg19[%c2_52, %c0_53], %53 {strides = array<i32>} : memref<8x512xf32, #tpu.memory_space<vmem>>, vector<1x512xf32>,
    %c6_54 = arith.constant 6 : index
    %c0_55 = arith.constant 0 : index
    %55 = vector.load %arg16[%c6_54, %c0_55] : memref<17x512xf32, #tpu.memory_space<vmem>>, vector<1x512xf32>
    %c7 = arith.constant 7 : index
    %c0_56 = arith.constant 0 : index
    %56 = vector.load %arg16[%c7, %c0_56] : memref<17x512xf32, #tpu.memory_space<vmem>>, vector<1x512xf32>
    %57 = arith.maximumf %55, %56 : vector<1x512xf32>
    %c8 = arith.constant 8 : index
    %c0_57 = arith.constant 0 : index
    %58 = vector.load %arg16[%c8, %c0_57] : memref<17x512xf32, #tpu.memory_space<vmem>>, vector<1x512xf32>
    %59 = arith.maximumf %57, %58 : vector<1x512xf32>
    %c3_58 = arith.constant 3 : index
    %c0_59 = arith.constant 0 : index
    %60 = vector.load %arg19[%c3_58, %c0_59] : memref<8x512xf32, #tpu.memory_space<vmem>>, vector<1x512xf32>
    tpu.vector_store %arg19[%c3_58, %c0_59], %59 {strides = array<i32>} : memref<8x512xf32, #tpu.memory_space<vmem>>, vector<1x512xf32>,
    %c8_60 = arith.constant 8 : index
    %c0_61 = arith.constant 0 : index
    %61 = vector.load %arg16[%c8_60, %c0_61] : memref<17x512xf32, #tpu.memory_space<vmem>>, vector<1x512xf32>
    %c9 = arith.constant 9 : index
    %c0_62 = arith.constant 0 : index
    %62 = vector.load %arg16[%c9, %c0_62] : memref<17x512xf32, #tpu.memory_space<vmem>>, vector<1x512xf32>
    %63 = arith.maximumf %61, %62 : vector<1x512xf32>
    %c10 = arith.constant 10 : index
    %c0_63 = arith.constant 0 : index
    %64 = vector.load %arg16[%c10, %c0_63] : memref<17x512xf32, #tpu.memory_space<vmem>>, vector<1x512xf32>
    %65 = arith.maximumf %63, %64 : vector<1x512xf32>
    %c4_64 = arith.constant 4 : index
    %c0_65 = arith.constant 0 : index
    %66 = vector.load %arg19[%c4_64, %c0_65] : memref<8x512xf32, #tpu.memory_space<vmem>>, vector<1x512xf32>
    tpu.vector_store %arg19[%c4_64, %c0_65], %65 {strides = array<i32>} : memref<8x512xf32, #tpu.memory_space<vmem>>, vector<1x512xf32>,
    %c10_66 = arith.constant 10 : index
    %c0_67 = arith.constant 0 : index
    %67 = vector.load %arg16[%c10_66, %c0_67] : memref<17x512xf32, #tpu.memory_space<vmem>>, vector<1x512xf32>
    %c11 = arith.constant 11 : index
    %c0_68 = arith.constant 0 : index
    %68 = vector.load %arg16[%c11, %c0_68] : memref<17x512xf32, #tpu.memory_space<vmem>>, vector<1x512xf32>
    %69 = arith.maximumf %67, %68 : vector<1x512xf32>
    %c12 = arith.constant 12 : index
    %c0_69 = arith.constant 0 : index
    %70 = vector.load %arg16[%c12, %c0_69] : memref<17x512xf32, #tpu.memory_space<vmem>>, vector<1x512xf32>
    %71 = arith.maximumf %69, %70 : vector<1x512xf32>
    %c5_70 = arith.constant 5 : index
    %c0_71 = arith.constant 0 : index
    %72 = vector.load %arg19[%c5_70, %c0_71] : memref<8x512xf32, #tpu.memory_space<vmem>>, vector<1x512xf32>
    tpu.vector_store %arg19[%c5_70, %c0_71], %71 {strides = array<i32>} : memref<8x512xf32, #tpu.memory_space<vmem>>, vector<1x512xf32>,
    %c12_72 = arith.constant 12 : index
    %c0_73 = arith.constant 0 : index
    %73 = vector.load %arg16[%c12_72, %c0_73] : memref<17x512xf32, #tpu.memory_space<vmem>>, vector<1x512xf32>
    %c13 = arith.constant 13 : index
    %c0_74 = arith.constant 0 : index
    %74 = vector.load %arg16[%c13, %c0_74] : memref<17x512xf32, #tpu.memory_space<vmem>>, vector<1x512xf32>
    %75 = arith.maximumf %73, %74 : vector<1x512xf32>
    %c14 = arith.constant 14 : index
    %c0_75 = arith.constant 0 : index
    %76 = vector.load %arg16[%c14, %c0_75] : memref<17x512xf32, #tpu.memory_space<vmem>>, vector<1x512xf32>
    %77 = arith.maximumf %75, %76 : vector<1x512xf32>
    %c6_76 = arith.constant 6 : index
    %c0_77 = arith.constant 0 : index
    %78 = vector.load %arg19[%c6_76, %c0_77] : memref<8x512xf32, #tpu.memory_space<vmem>>, vector<1x512xf32>
    tpu.vector_store %arg19[%c6_76, %c0_77], %77 {strides = array<i32>} : memref<8x512xf32, #tpu.memory_space<vmem>>, vector<1x512xf32>,
    %c14_78 = arith.constant 14 : index
    %c0_79 = arith.constant 0 : index
    %79 = vector.load %arg16[%c14_78, %c0_79] : memref<17x512xf32, #tpu.memory_space<vmem>>, vector<1x512xf32>
    %c15 = arith.constant 15 : index
    %c0_80 = arith.constant 0 : index
    %80 = vector.load %arg16[%c15, %c0_80] : memref<17x512xf32, #tpu.memory_space<vmem>>, vector<1x512xf32>
    %81 = arith.maximumf %79, %80 : vector<1x512xf32>
    %c16 = arith.constant 16 : index
    %c0_81 = arith.constant 0 : index
    %82 = vector.load %arg16[%c16, %c0_81] : memref<17x512xf32, #tpu.memory_space<vmem>>, vector<1x512xf32>
    %83 = arith.maximumf %81, %82 : vector<1x512xf32>
    %c7_82 = arith.constant 7 : index
    %c0_83 = arith.constant 0 : index
    %84 = vector.load %arg19[%c7_82, %c0_83] : memref<8x512xf32, #tpu.memory_space<vmem>>, vector<1x512xf32>
    tpu.vector_store %arg19[%c7_82, %c0_83], %83 {strides = array<i32>} : memref<8x512xf32, #tpu.memory_space<vmem>>, vector<1x512xf32>,
    %c0_84 = arith.constant 0 : index
    %c0_85 = arith.constant 0 : index
    %85 = vector.load %arg19[%c0_84, %c0_85] : memref<8x512xf32, #tpu.memory_space<vmem>>, vector<8x512xf32>
    %86 = vector.extract_strided_slice %85 {offsets = [0, 0], sizes = [8, 32], strides = [1, 1]} : vector<8x512xf32> to vector<8x32xf32>
    %87 = vector.extract_strided_slice %85 {offsets = [0, 32], sizes = [8, 32], strides = [1, 1]} : vector<8x512xf32> to vector<8x32xf32>
    %88 = arith.maximumf %86, %87 : vector<8x32xf32>
    %c1_86 = arith.constant 1 : index
    %c32 = arith.constant 32 : index
    %89 = vector.load %arg14[%c1_86, %c32] : memref<10x320xf32, #tpu.memory_space<vmem>>, vector<8x32xf32>
    tpu.vector_store %arg14[%c1_86, %c32], %88 {strides = array<i32>} : memref<10x320xf32, #tpu.memory_space<vmem>>, vector<8x32xf32>,
    %90 = vector.extract_strided_slice %85 {offsets = [0, 32], sizes = [8, 32], strides = [1, 1]} : vector<8x512xf32> to vector<8x32xf32>
    %91 = vector.extract_strided_slice %85 {offsets = [0, 64], sizes = [8, 32], strides = [1, 1]} : vector<8x512xf32> to vector<8x32xf32>
    %92 = arith.maximumf %90, %91 : vector<8x32xf32>
    %93 = vector.extract_strided_slice %85 {offsets = [0, 96], sizes = [8, 32], strides = [1, 1]} : vector<8x512xf32> to vector<8x32xf32>
    %94 = arith.maximumf %92, %93 : vector<8x32xf32>
    %c1_87 = arith.constant 1 : index
    %c64 = arith.constant 64 : index
    %95 = vector.load %arg14[%c1_87, %c64] : memref<10x320xf32, #tpu.memory_space<vmem>>, vector<8x32xf32>
    tpu.vector_store %arg14[%c1_87, %c64], %94 {strides = array<i32>} : memref<10x320xf32, #tpu.memory_space<vmem>>, vector<8x32xf32>,
    %96 = vector.extract_strided_slice %85 {offsets = [0, 96], sizes = [8, 32], strides = [1, 1]} : vector<8x512xf32> to vector<8x32xf32>
    %97 = vector.extract_strided_slice %85 {offsets = [0, 128], sizes = [8, 32], strides = [1, 1]} : vector<8x512xf32> to vector<8x32xf32>
    %98 = arith.maximumf %96, %97 : vector<8x32xf32>
    %99 = vector.extract_strided_slice %85 {offsets = [0, 160], sizes = [8, 32], strides = [1, 1]} : vector<8x512xf32> to vector<8x32xf32>
    %100 = arith.maximumf %98, %99 : vector<8x32xf32>
    %c1_88 = arith.constant 1 : index
    %c96 = arith.constant 96 : index
    %101 = vector.load %arg14[%c1_88, %c96] : memref<10x320xf32, #tpu.memory_space<vmem>>, vector<8x32xf32>
    tpu.vector_store %arg14[%c1_88, %c96], %100 {strides = array<i32>} : memref<10x320xf32, #tpu.memory_space<vmem>>, vector<8x32xf32>,
    %102 = vector.extract_strided_slice %85 {offsets = [0, 160], sizes = [8, 32], strides = [1, 1]} : vector<8x512xf32> to vector<8x32xf32>
    %103 = vector.extract_strided_slice %85 {offsets = [0, 192], sizes = [8, 32], strides = [1, 1]} : vector<8x512xf32> to vector<8x32xf32>
    %104 = arith.maximumf %102, %103 : vector<8x32xf32>
    %105 = vector.extract_strided_slice %85 {offsets = [0, 224], sizes = [8, 32], strides = [1, 1]} : vector<8x512xf32> to vector<8x32xf32>
    %106 = arith.maximumf %104, %105 : vector<8x32xf32>
    %c1_89 = arith.constant 1 : index
    %c128 = arith.constant 128 : index
    %107 = vector.load %arg14[%c1_89, %c128] : memref<10x320xf32, #tpu.memory_space<vmem>>, vector<8x32xf32>
    tpu.vector_store %arg14[%c1_89, %c128], %106 {strides = array<i32>} : memref<10x320xf32, #tpu.memory_space<vmem>>, vector<8x32xf32>,
    %108 = vector.extract_strided_slice %85 {offsets = [0, 224], sizes = [8, 32], strides = [1, 1]} : vector<8x512xf32> to vector<8x32xf32>
    %109 = vector.extract_strided_slice %85 {offsets = [0, 256], sizes = [8, 32], strides = [1, 1]} : vector<8x512xf32> to vector<8x32xf32>
    %110 = arith.maximumf %108, %109 : vector<8x32xf32>
    %111 = vector.extract_strided_slice %85 {offsets = [0, 288], sizes = [8, 32], strides = [1, 1]} : vector<8x512xf32> to vector<8x32xf32>
    %112 = arith.maximumf %110, %111 : vector<8x32xf32>
    %c1_90 = arith.constant 1 : index
    %c160 = arith.constant 160 : index
    %113 = vector.load %arg14[%c1_90, %c160] : memref<10x320xf32, #tpu.memory_space<vmem>>, vector<8x32xf32>
    tpu.vector_store %arg14[%c1_90, %c160], %112 {strides = array<i32>} : memref<10x320xf32, #tpu.memory_space<vmem>>, vector<8x32xf32>,
    %114 = vector.extract_strided_slice %85 {offsets = [0, 288], sizes = [8, 32], strides = [1, 1]} : vector<8x512xf32> to vector<8x32xf32>
    %115 = vector.extract_strided_slice %85 {offsets = [0, 320], sizes = [8, 32], strides = [1, 1]} : vector<8x512xf32> to vector<8x32xf32>
    %116 = arith.maximumf %114, %115 : vector<8x32xf32>
    %117 = vector.extract_strided_slice %85 {offsets = [0, 352], sizes = [8, 32], strides = [1, 1]} : vector<8x512xf32> to vector<8x32xf32>
    %118 = arith.maximumf %116, %117 : vector<8x32xf32>
    %c1_91 = arith.constant 1 : index
    %c192 = arith.constant 192 : index
    %119 = vector.load %arg14[%c1_91, %c192] : memref<10x320xf32, #tpu.memory_space<vmem>>, vector<8x32xf32>
    tpu.vector_store %arg14[%c1_91, %c192], %118 {strides = array<i32>} : memref<10x320xf32, #tpu.memory_space<vmem>>, vector<8x32xf32>,
    %120 = vector.extract_strided_slice %85 {offsets = [0, 352], sizes = [8, 32], strides = [1, 1]} : vector<8x512xf32> to vector<8x32xf32>
    %121 = vector.extract_strided_slice %85 {offsets = [0, 384], sizes = [8, 32], strides = [1, 1]} : vector<8x512xf32> to vector<8x32xf32>
    %122 = arith.maximumf %120, %121 : vector<8x32xf32>
    %123 = vector.extract_strided_slice %85 {offsets = [0, 416], sizes = [8, 32], strides = [1, 1]} : vector<8x512xf32> to vector<8x32xf32>
    %124 = arith.maximumf %122, %123 : vector<8x32xf32>
    %c1_92 = arith.constant 1 : index
    %c224 = arith.constant 224 : index
    %125 = vector.load %arg14[%c1_92, %c224] : memref<10x320xf32, #tpu.memory_space<vmem>>, vector<8x32xf32>
    tpu.vector_store %arg14[%c1_92, %c224], %124 {strides = array<i32>} : memref<10x320xf32, #tpu.memory_space<vmem>>, vector<8x32xf32>,
    %126 = vector.extract_strided_slice %85 {offsets = [0, 416], sizes = [8, 32], strides = [1, 1]} : vector<8x512xf32> to vector<8x32xf32>
    %127 = vector.extract_strided_slice %85 {offsets = [0, 448], sizes = [8, 32], strides = [1, 1]} : vector<8x512xf32> to vector<8x32xf32>
    %128 = arith.maximumf %126, %127 : vector<8x32xf32>
    %129 = vector.extract_strided_slice %85 {offsets = [0, 480], sizes = [8, 32], strides = [1, 1]} : vector<8x512xf32> to vector<8x32xf32>
    %130 = arith.maximumf %128, %129 : vector<8x32xf32>
    %c1_93 = arith.constant 1 : index
    %c256 = arith.constant 256 : index
    %131 = vector.load %arg14[%c1_93, %c256] : memref<10x320xf32, #tpu.memory_space<vmem>>, vector<8x32xf32>
    tpu.vector_store %arg14[%c1_93, %c256], %130 {strides = array<i32>} : memref<10x320xf32, #tpu.memory_space<vmem>>, vector<8x32xf32>,
    %c0_94 = arith.constant 0 : index
    %c0_95 = arith.constant 0 : index
    %132 = vector.load %arg14[%c0_94, %c0_95] : memref<10x320xf32, #tpu.memory_space<vmem>>, vector<10x320xf32>
    %133 = arith.truncf %132 : vector<10x320xf32> to vector<10x320xbf16>
    %cst_96 = arith.constant 0.000000e+00 : f32
    %134 = vector.broadcast %cst_96 : f32 to vector<8x512xf32>
    %135 = vector.extract_strided_slice %133 {offsets = [0, 0], sizes = [8, 320], strides = [1, 1]} : vector<10x320xbf16> to vector<8x320xbf16>
    %c0_97 = arith.constant 0 : index
    %c0_98 = arith.constant 0 : index
    %c0_99 = arith.constant 0 : index
    %136 = vector.load %arg5[%c0_97, %c0_98, %c0_99] : memref<3x320x512xbf16, #tpu.memory_space<vmem>>, vector<1x320x512xbf16>
    %137 = vector.shape_cast %136 : vector<1x320x512xbf16> to vector<320x512xbf16>
    %cst_100 = arith.constant dense<0.000000e+00> : vector<8x512xf32>
    %138 = tpu.matmul %135, %137, %cst_100 {dimension_numbers = #tpu.dot_dimension_numbers<[1], [0], [0], [1], [0, 0, 1, 1], [], []>} : vector<8x320xbf16>, vector<320x512xbf16>, vector<8x512xf32> -> vector<8x512xf32>
    %139 = arith.addf %134, %138 : vector<8x512xf32>
    %140 = vector.extract_strided_slice %133 {offsets = [1, 0], sizes = [8, 320], strides = [1, 1]} : vector<10x320xbf16> to vector<8x320xbf16>
    %c1_101 = arith.constant 1 : index
    %c0_102 = arith.constant 0 : index
    %c0_103 = arith.constant 0 : index
    %141 = vector.load %arg5[%c1_101, %c0_102, %c0_103] : memref<3x320x512xbf16, #tpu.memory_space<vmem>>, vector<1x320x512xbf16>
    %142 = vector.shape_cast %141 : vector<1x320x512xbf16> to vector<320x512xbf16>
    %cst_104 = arith.constant dense<0.000000e+00> : vector<8x512xf32>
    %143 = tpu.matmul %140, %142, %cst_104 {dimension_numbers = #tpu.dot_dimension_numbers<[1], [0], [0], [1], [0, 0, 1, 1], [], []>} : vector<8x320xbf16>, vector<320x512xbf16>, vector<8x512xf32> -> vector<8x512xf32>
    %144 = arith.addf %139, %143 : vector<8x512xf32>
    %145 = vector.extract_strided_slice %133 {offsets = [2, 0], sizes = [8, 320], strides = [1, 1]} : vector<10x320xbf16> to vector<8x320xbf16>
    %c2_105 = arith.constant 2 : index
    %c0_106 = arith.constant 0 : index
    %c0_107 = arith.constant 0 : index
    %146 = vector.load %arg5[%c2_105, %c0_106, %c0_107] : memref<3x320x512xbf16, #tpu.memory_space<vmem>>, vector<1x320x512xbf16>
    %147 = vector.shape_cast %146 : vector<1x320x512xbf16> to vector<320x512xbf16>
    %cst_108 = arith.constant dense<0.000000e+00> : vector<8x512xf32>
    %148 = tpu.matmul %145, %147, %cst_108 {dimension_numbers = #tpu.dot_dimension_numbers<[1], [0], [0], [1], [0, 0, 1, 1], [], []>} : vector<8x320xbf16>, vector<320x512xbf16>, vector<8x512xf32> -> vector<8x512xf32>
    %149 = arith.addf %144, %148 : vector<8x512xf32>
    %c0_109 = arith.constant 0 : index
    %c0_110 = arith.constant 0 : index
    %150 = vector.load %arg6[%c0_109, %c0_110] : memref<1x512xf32, #tpu.memory_space<vmem>>, vector<1x512xf32>
    %151 = vector.broadcast %150 : vector<1x512xf32> to vector<8x512xf32>
    %152 = arith.mulf %149, %151 : vector<8x512xf32>
    %c0_111 = arith.constant 0 : index
    %c0_112 = arith.constant 0 : index
    %153 = vector.load %arg7[%c0_111, %c0_112] : memref<1x512xf32, #tpu.memory_space<vmem>>, vector<1x512xf32>
    %154 = vector.broadcast %153 : vector<1x512xf32> to vector<8x512xf32>
    %155 = arith.addf %152, %154 : vector<8x512xf32>
    %cst_113 = arith.constant 0.000000e+00 : f32
    %156 = vector.broadcast %cst_113 : f32 to vector<8x512xf32>
    %157 = arith.maximumf %155, %156 : vector<8x512xf32>
    %c1_114 = arith.constant 1 : index
    %c0_115 = arith.constant 0 : index
    %158 = vector.load %arg17[%c1_114, %c0_115] : memref<9x512xf32, #tpu.memory_space<vmem>>, vector<8x512xf32>
    tpu.vector_store %arg17[%c1_114, %c0_115], %157 {strides = array<i32>} : memref<9x512xf32, #tpu.memory_space<vmem>>, vector<8x512xf32>,
    %c0_116 = arith.constant 0 : index
    %c0_117 = arith.constant 0 : index
    %159 = vector.load %arg17[%c0_116, %c0_117] : memref<9x512xf32, #tpu.memory_space<vmem>>, vector<1x512xf32>
    %c1_118 = arith.constant 1 : index
    %c0_119 = arith.constant 0 : index
    %160 = vector.load %arg17[%c1_118, %c0_119] : memref<9x512xf32, #tpu.memory_space<vmem>>, vector<1x512xf32>
    %161 = arith.maximumf %159, %160 : vector<1x512xf32>
    %c2_120 = arith.constant 2 : index
    %c0_121 = arith.constant 0 : index
    %162 = vector.load %arg17[%c2_120, %c0_121] : memref<9x512xf32, #tpu.memory_space<vmem>>, vector<1x512xf32>
    %163 = arith.maximumf %161, %162 : vector<1x512xf32>
    %c0_122 = arith.constant 0 : index
    %c0_123 = arith.constant 0 : index
    %164 = vector.load %arg19[%c0_122, %c0_123] : memref<8x512xf32, #tpu.memory_space<vmem>>, vector<1x512xf32>
    tpu.vector_store %arg19[%c0_122, %c0_123], %163 {strides = array<i32>} : memref<8x512xf32, #tpu.memory_space<vmem>>, vector<1x512xf32>,
    %c2_124 = arith.constant 2 : index
    %c0_125 = arith.constant 0 : index
    %165 = vector.load %arg17[%c2_124, %c0_125] : memref<9x512xf32, #tpu.memory_space<vmem>>, vector<1x512xf32>
    %c3_126 = arith.constant 3 : index
    %c0_127 = arith.constant 0 : index
    %166 = vector.load %arg17[%c3_126, %c0_127] : memref<9x512xf32, #tpu.memory_space<vmem>>, vector<1x512xf32>
    %167 = arith.maximumf %165, %166 : vector<1x512xf32>
    %c4_128 = arith.constant 4 : index
    %c0_129 = arith.constant 0 : index
    %168 = vector.load %arg17[%c4_128, %c0_129] : memref<9x512xf32, #tpu.memory_space<vmem>>, vector<1x512xf32>
    %169 = arith.maximumf %167, %168 : vector<1x512xf32>
    %c1_130 = arith.constant 1 : index
    %c0_131 = arith.constant 0 : index
    %170 = vector.load %arg19[%c1_130, %c0_131] : memref<8x512xf32, #tpu.memory_space<vmem>>, vector<1x512xf32>
    tpu.vector_store %arg19[%c1_130, %c0_131], %169 {strides = array<i32>} : memref<8x512xf32, #tpu.memory_space<vmem>>, vector<1x512xf32>,
    %c4_132 = arith.constant 4 : index
    %c0_133 = arith.constant 0 : index
    %171 = vector.load %arg17[%c4_132, %c0_133] : memref<9x512xf32, #tpu.memory_space<vmem>>, vector<1x512xf32>
    %c5_134 = arith.constant 5 : index
    %c0_135 = arith.constant 0 : index
    %172 = vector.load %arg17[%c5_134, %c0_135] : memref<9x512xf32, #tpu.memory_space<vmem>>, vector<1x512xf32>
    %173 = arith.maximumf %171, %172 : vector<1x512xf32>
    %c6_136 = arith.constant 6 : index
    %c0_137 = arith.constant 0 : index
    %174 = vector.load %arg17[%c6_136, %c0_137] : memref<9x512xf32, #tpu.memory_space<vmem>>, vector<1x512xf32>
    %175 = arith.maximumf %173, %174 : vector<1x512xf32>
    %c2_138 = arith.constant 2 : index
    %c0_139 = arith.constant 0 : index
    %176 = vector.load %arg19[%c2_138, %c0_139] : memref<8x512xf32, #tpu.memory_space<vmem>>, vector<1x512xf32>
    tpu.vector_store %arg19[%c2_138, %c0_139], %175 {strides = array<i32>} : memref<8x512xf32, #tpu.memory_space<vmem>>, vector<1x512xf32>,
    %c6_140 = arith.constant 6 : index
    %c0_141 = arith.constant 0 : index
    %177 = vector.load %arg17[%c6_140, %c0_141] : memref<9x512xf32, #tpu.memory_space<vmem>>, vector<1x512xf32>
    %c7_142 = arith.constant 7 : index
    %c0_143 = arith.constant 0 : index
    %178 = vector.load %arg17[%c7_142, %c0_143] : memref<9x512xf32, #tpu.memory_space<vmem>>, vector<1x512xf32>
    %179 = arith.maximumf %177, %178 : vector<1x512xf32>
    %c8_144 = arith.constant 8 : index
    %c0_145 = arith.constant 0 : index
    %180 = vector.load %arg17[%c8_144, %c0_145] : memref<9x512xf32, #tpu.memory_space<vmem>>, vector<1x512xf32>
    %181 = arith.maximumf %179, %180 : vector<1x512xf32>
    %c3_146 = arith.constant 3 : index
    %c0_147 = arith.constant 0 : index
    %182 = vector.load %arg19[%c3_146, %c0_147] : memref<8x512xf32, #tpu.memory_space<vmem>>, vector<1x512xf32>
    tpu.vector_store %arg19[%c3_146, %c0_147], %181 {strides = array<i32>} : memref<8x512xf32, #tpu.memory_space<vmem>>, vector<1x512xf32>,
    %c0_148 = arith.constant 0 : index
    %c0_149 = arith.constant 0 : index
    %183 = vector.load %arg19[%c0_148, %c0_149] : memref<8x512xf32, #tpu.memory_space<vmem>>, vector<4x512xf32>
    %184 = vector.extract_strided_slice %183 {offsets = [0, 0], sizes = [4, 64], strides = [1, 1]} : vector<4x512xf32> to vector<4x64xf32>
    %185 = vector.extract_strided_slice %183 {offsets = [0, 64], sizes = [4, 64], strides = [1, 1]} : vector<4x512xf32> to vector<4x64xf32>
    %186 = arith.maximumf %184, %185 : vector<4x64xf32>
    %c1_150 = arith.constant 1 : index
    %c64_151 = arith.constant 64 : index
    %187 = vector.load %arg15[%c1_150, %c64_151] : memref<6x384xf32, #tpu.memory_space<vmem>>, vector<4x64xf32>
    tpu.vector_store %arg15[%c1_150, %c64_151], %186 {strides = array<i32>} : memref<6x384xf32, #tpu.memory_space<vmem>>, vector<4x64xf32>,
    %188 = vector.extract_strided_slice %183 {offsets = [0, 64], sizes = [4, 64], strides = [1, 1]} : vector<4x512xf32> to vector<4x64xf32>
    %189 = vector.extract_strided_slice %183 {offsets = [0, 128], sizes = [4, 64], strides = [1, 1]} : vector<4x512xf32> to vector<4x64xf32>
    %190 = arith.maximumf %188, %189 : vector<4x64xf32>
    %191 = vector.extract_strided_slice %183 {offsets = [0, 192], sizes = [4, 64], strides = [1, 1]} : vector<4x512xf32> to vector<4x64xf32>
    %192 = arith.maximumf %190, %191 : vector<4x64xf32>
    %c1_152 = arith.constant 1 : index
    %c128_153 = arith.constant 128 : index
    %193 = vector.load %arg15[%c1_152, %c128_153] : memref<6x384xf32, #tpu.memory_space<vmem>>, vector<4x64xf32>
    tpu.vector_store %arg15[%c1_152, %c128_153], %192 {strides = array<i32>} : memref<6x384xf32, #tpu.memory_space<vmem>>, vector<4x64xf32>,
    %194 = vector.extract_strided_slice %183 {offsets = [0, 192], sizes = [4, 64], strides = [1, 1]} : vector<4x512xf32> to vector<4x64xf32>
    %195 = vector.extract_strided_slice %183 {offsets = [0, 256], sizes = [4, 64], strides = [1, 1]} : vector<4x512xf32> to vector<4x64xf32>
    %196 = arith.maximumf %194, %195 : vector<4x64xf32>
    %197 = vector.extract_strided_slice %183 {offsets = [0, 320], sizes = [4, 64], strides = [1, 1]} : vector<4x512xf32> to vector<4x64xf32>
    %198 = arith.maximumf %196, %197 : vector<4x64xf32>
    %c1_154 = arith.constant 1 : index
    %c192_155 = arith.constant 192 : index
    %199 = vector.load %arg15[%c1_154, %c192_155] : memref<6x384xf32, #tpu.memory_space<vmem>>, vector<4x64xf32>
    tpu.vector_store %arg15[%c1_154, %c192_155], %198 {strides = array<i32>} : memref<6x384xf32, #tpu.memory_space<vmem>>, vector<4x64xf32>,
    %200 = vector.extract_strided_slice %183 {offsets = [0, 320], sizes = [4, 64], strides = [1, 1]} : vector<4x512xf32> to vector<4x64xf32>
    %201 = vector.extract_strided_slice %183 {offsets = [0, 384], sizes = [4, 64], strides = [1, 1]} : vector<4x512xf32> to vector<4x64xf32>
    %202 = arith.maximumf %200, %201 : vector<4x64xf32>
    %203 = vector.extract_strided_slice %183 {offsets = [0, 448], sizes = [4, 64], strides = [1, 1]} : vector<4x512xf32> to vector<4x64xf32>
    %204 = arith.maximumf %202, %203 : vector<4x64xf32>
    %c1_156 = arith.constant 1 : index
    %c256_157 = arith.constant 256 : index
    %205 = vector.load %arg15[%c1_156, %c256_157] : memref<6x384xf32, #tpu.memory_space<vmem>>, vector<4x64xf32>
    tpu.vector_store %arg15[%c1_156, %c256_157], %204 {strides = array<i32>} : memref<6x384xf32, #tpu.memory_space<vmem>>, vector<4x64xf32>,
    %c0_158 = arith.constant 0 : index
    %c0_159 = arith.constant 0 : index
    %206 = vector.load %arg15[%c0_158, %c0_159] : memref<6x384xf32, #tpu.memory_space<vmem>>, vector<6x384xf32>
    %207 = arith.truncf %206 : vector<6x384xf32> to vector<6x384xbf16>
    %cst_160 = arith.constant 0.000000e+00 : f32
    %208 = vector.broadcast %cst_160 : f32 to vector<4x512xf32>
    %209 = vector.extract_strided_slice %207 {offsets = [0, 0], sizes = [4, 384], strides = [1, 1]} : vector<6x384xbf16> to vector<4x384xbf16>
    %c0_161 = arith.constant 0 : index
    %c0_162 = arith.constant 0 : index
    %c0_163 = arith.constant 0 : index
    %210 = vector.load %arg8[%c0_161, %c0_162, %c0_163] : memref<3x384x512xbf16, #tpu.memory_space<vmem>>, vector<1x384x512xbf16>
    %211 = vector.shape_cast %210 : vector<1x384x512xbf16> to vector<384x512xbf16>
    %cst_164 = arith.constant dense<0.000000e+00> : vector<4x512xf32>
    %212 = tpu.matmul %209, %211, %cst_164 {dimension_numbers = #tpu.dot_dimension_numbers<[1], [0], [0], [1], [0, 0, 1, 1], [], []>} : vector<4x384xbf16>, vector<384x512xbf16>, vector<4x512xf32> -> vector<4x512xf32>
    %213 = arith.addf %208, %212 : vector<4x512xf32>
    %214 = vector.extract_strided_slice %207 {offsets = [1, 0], sizes = [4, 384], strides = [1, 1]} : vector<6x384xbf16> to vector<4x384xbf16>
    %c1_165 = arith.constant 1 : index
    %c0_166 = arith.constant 0 : index
    %c0_167 = arith.constant 0 : index
    %215 = vector.load %arg8[%c1_165, %c0_166, %c0_167] : memref<3x384x512xbf16, #tpu.memory_space<vmem>>, vector<1x384x512xbf16>
    %216 = vector.shape_cast %215 : vector<1x384x512xbf16> to vector<384x512xbf16>
    %cst_168 = arith.constant dense<0.000000e+00> : vector<4x512xf32>
    %217 = tpu.matmul %214, %216, %cst_168 {dimension_numbers = #tpu.dot_dimension_numbers<[1], [0], [0], [1], [0, 0, 1, 1], [], []>} : vector<4x384xbf16>, vector<384x512xbf16>, vector<4x512xf32> -> vector<4x512xf32>
    %218 = arith.addf %213, %217 : vector<4x512xf32>
    %219 = vector.extract_strided_slice %207 {offsets = [2, 0], sizes = [4, 384], strides = [1, 1]} : vector<6x384xbf16> to vector<4x384xbf16>
    %c2_169 = arith.constant 2 : index
    %c0_170 = arith.constant 0 : index
    %c0_171 = arith.constant 0 : index
    %220 = vector.load %arg8[%c2_169, %c0_170, %c0_171] : memref<3x384x512xbf16, #tpu.memory_space<vmem>>, vector<1x384x512xbf16>
    %221 = vector.shape_cast %220 : vector<1x384x512xbf16> to vector<384x512xbf16>
    %cst_172 = arith.constant dense<0.000000e+00> : vector<4x512xf32>
    %222 = tpu.matmul %219, %221, %cst_172 {dimension_numbers = #tpu.dot_dimension_numbers<[1], [0], [0], [1], [0, 0, 1, 1], [], []>} : vector<4x384xbf16>, vector<384x512xbf16>, vector<4x512xf32> -> vector<4x512xf32>
    %223 = arith.addf %218, %222 : vector<4x512xf32>
    %c0_173 = arith.constant 0 : index
    %c0_174 = arith.constant 0 : index
    %224 = vector.load %arg9[%c0_173, %c0_174] : memref<1x512xf32, #tpu.memory_space<vmem>>, vector<1x512xf32>
    %225 = vector.broadcast %224 : vector<1x512xf32> to vector<4x512xf32>
    %226 = arith.mulf %223, %225 : vector<4x512xf32>
    %c0_175 = arith.constant 0 : index
    %c0_176 = arith.constant 0 : index
    %227 = vector.load %arg10[%c0_175, %c0_176] : memref<1x512xf32, #tpu.memory_space<vmem>>, vector<1x512xf32>
    %228 = vector.broadcast %227 : vector<1x512xf32> to vector<4x512xf32>
    %229 = arith.addf %226, %228 : vector<4x512xf32>
    %cst_177 = arith.constant 0.000000e+00 : f32
    %230 = vector.broadcast %cst_177 : f32 to vector<4x512xf32>
    %231 = arith.maximumf %229, %230 : vector<4x512xf32>
    %c1_178 = arith.constant 1 : index
    %c0_179 = arith.constant 0 : index
    %232 = vector.load %arg18[%c1_178, %c0_179] : memref<5x512xf32, #tpu.memory_space<vmem>>, vector<4x512xf32>
    tpu.vector_store %arg18[%c1_178, %c0_179], %231 {strides = array<i32>} : memref<5x512xf32, #tpu.memory_space<vmem>>, vector<4x512xf32>,
    %cst_180 = arith.constant 0.000000e+00 : f32
    %233 = vector.broadcast %cst_180 : f32 to vector<1x128xf32>
    %c0_181 = arith.constant 0 : index
    %c0_182 = arith.constant 0 : index
    %234 = vector.load %arg18[%c0_181, %c0_182] : memref<5x512xf32, #tpu.memory_space<vmem>>, vector<1x512xf32>
    %c1_183 = arith.constant 1 : index
    %c0_184 = arith.constant 0 : index
    %235 = vector.load %arg18[%c1_183, %c0_184] : memref<5x512xf32, #tpu.memory_space<vmem>>, vector<1x512xf32>
    %236 = arith.maximumf %234, %235 : vector<1x512xf32>
    %c2_185 = arith.constant 2 : index
    %c0_186 = arith.constant 0 : index
    %237 = vector.load %arg18[%c2_185, %c0_186] : memref<5x512xf32, #tpu.memory_space<vmem>>, vector<1x512xf32>
    %238 = arith.maximumf %236, %237 : vector<1x512xf32>
    %c0_187 = arith.constant 0 : index
    %c0_188 = arith.constant 0 : index
    %239 = vector.load %arg19[%c0_187, %c0_188] : memref<8x512xf32, #tpu.memory_space<vmem>>, vector<1x512xf32>
    tpu.vector_store %arg19[%c0_187, %c0_188], %238 {strides = array<i32>} : memref<8x512xf32, #tpu.memory_space<vmem>>, vector<1x512xf32>,
    %c2_189 = arith.constant 2 : index
    %c0_190 = arith.constant 0 : index
    %240 = vector.load %arg18[%c2_189, %c0_190] : memref<5x512xf32, #tpu.memory_space<vmem>>, vector<1x512xf32>
    %c3_191 = arith.constant 3 : index
    %c0_192 = arith.constant 0 : index
    %241 = vector.load %arg18[%c3_191, %c0_192] : memref<5x512xf32, #tpu.memory_space<vmem>>, vector<1x512xf32>
    %242 = arith.maximumf %240, %241 : vector<1x512xf32>
    %c4_193 = arith.constant 4 : index
    %c0_194 = arith.constant 0 : index
    %243 = vector.load %arg18[%c4_193, %c0_194] : memref<5x512xf32, #tpu.memory_space<vmem>>, vector<1x512xf32>
    %244 = arith.maximumf %242, %243 : vector<1x512xf32>
    %c1_195 = arith.constant 1 : index
    %c0_196 = arith.constant 0 : index
    %245 = vector.load %arg19[%c1_195, %c0_196] : memref<8x512xf32, #tpu.memory_space<vmem>>, vector<1x512xf32>
    tpu.vector_store %arg19[%c1_195, %c0_196], %244 {strides = array<i32>} : memref<8x512xf32, #tpu.memory_space<vmem>>, vector<1x512xf32>,
    %c0_197 = arith.constant 0 : index
    %c0_198 = arith.constant 0 : index
    %246 = vector.load %arg19[%c0_197, %c0_198] : memref<8x512xf32, #tpu.memory_space<vmem>>, vector<2x512xf32>
    %247 = vector.extract_strided_slice %246 {offsets = [0, 0], sizes = [2, 128], strides = [1, 1]} : vector<2x512xf32> to vector<2x128xf32>
    %248 = vector.extract_strided_slice %246 {offsets = [0, 128], sizes = [2, 128], strides = [1, 1]} : vector<2x512xf32> to vector<2x128xf32>
    %249 = arith.maximumf %247, %248 : vector<2x128xf32>
    %250 = vector.extract_strided_slice %249 {offsets = [0, 0], sizes = [1, 128], strides = [1, 1]} : vector<2x128xf32> to vector<1x128xf32>
    %251 = vector.extract_strided_slice %249 {offsets = [1, 0], sizes = [1, 128], strides = [1, 1]} : vector<2x128xf32> to vector<1x128xf32>
    %252 = arith.addf %250, %251 : vector<1x128xf32>
    %253 = arith.addf %233, %252 : vector<1x128xf32>
    %254 = vector.extract_strided_slice %246 {offsets = [0, 128], sizes = [2, 128], strides = [1, 1]} : vector<2x512xf32> to vector<2x128xf32>
    %255 = vector.extract_strided_slice %246 {offsets = [0, 256], sizes = [2, 128], strides = [1, 1]} : vector<2x512xf32> to vector<2x128xf32>
    %256 = arith.maximumf %254, %255 : vector<2x128xf32>
    %257 = vector.extract_strided_slice %246 {offsets = [0, 384], sizes = [2, 128], strides = [1, 1]} : vector<2x512xf32> to vector<2x128xf32>
    %258 = arith.maximumf %256, %257 : vector<2x128xf32>
    %259 = vector.extract_strided_slice %258 {offsets = [0, 0], sizes = [1, 128], strides = [1, 1]} : vector<2x128xf32> to vector<1x128xf32>
    %260 = vector.extract_strided_slice %258 {offsets = [1, 0], sizes = [1, 128], strides = [1, 1]} : vector<2x128xf32> to vector<1x128xf32>
    %261 = arith.addf %259, %260 : vector<1x128xf32>
    %262 = arith.addf %253, %261 : vector<1x128xf32>
    %cst_199 = arith.constant 2.500000e-01 : f32
    %263 = vector.broadcast %cst_199 : f32 to vector<1x128xf32>
    %264 = arith.mulf %262, %263 : vector<1x128xf32>
    %c0_200 = arith.constant 0 : index
    %c0_201 = arith.constant 0 : index
    %265 = vector.load %arg11[%c0_200, %c0_201] : memref<128x2xf32, #tpu.memory_space<vmem>>, vector<128x2xf32>
    %cst_202 = arith.constant dense<0.000000e+00> : vector<1x2xf32>
    %266 = tpu.matmul %264, %265, %cst_202 {dimension_numbers = #tpu.dot_dimension_numbers<[1], [0], [0], [1], [0, 0, 1, 1], [], []>} : vector<1x128xf32>, vector<128x2xf32>, vector<1x2xf32> -> vector<1x2xf32>
    %c0_203 = arith.constant 0 : index
    %c0_204 = arith.constant 0 : index
    %267 = vector.load %arg12[%c0_203, %c0_204] : memref<1x2xf32, #tpu.memory_space<vmem>>, vector<1x2xf32>
    %268 = arith.addf %266, %267 : vector<1x2xf32>
    %cst_205 = arith.constant dense<0xFF800000> : vector<1xf32>
    %269 = vector.multi_reduction <maximumf>, %268, %cst_205 [1] : vector<1x2xf32> to vector<1xf32>
    %270 = vector.shape_cast %269 : vector<1xf32> to vector<1x1xf32>
    %271 = vector.broadcast %270 : vector<1x1xf32> to vector<1x2xf32>
    %272 = arith.subf %268, %271 : vector<1x2xf32>
    %273 = math.exp %272 : vector<1x2xf32>
    %cst_206 = arith.constant dense<0.000000e+00> : vector<1xf32>
    %274 = vector.multi_reduction <add>, %273, %cst_206 [1] : vector<1x2xf32> to vector<1xf32>
    %275 = vector.shape_cast %274 : vector<1xf32> to vector<1x1xf32>
    %276 = vector.broadcast %275 : vector<1x1xf32> to vector<1x2xf32>
    %277 = arith.divf %273, %276 : vector<1x2xf32>
    %c0_207 = arith.constant 0 : index
    %c0_208 = arith.constant 0 : index
    %c0_209 = arith.constant 0 : index
    %278 = vector.load %arg13[%c0_207, %c0_208, %c0_209] : memref<1x1x2xf32, #tpu.memory_space<vmem>>, vector<1x1x2xf32>
    %279 = vector.shape_cast %278 : vector<1x1x2xf32> to vector<1x2xf32>
    %280 = vector.shape_cast %277 : vector<1x2xf32> to vector<1x1x2xf32>
    tpu.vector_store %arg13[%c0_207, %c0_208, %c0_209], %280 {strides = array<i32>} : memref<1x1x2xf32, #tpu.memory_space<vmem>>, vector<1x1x2xf32>,
    return
  }
  func.func @transform_0(%arg0: i32) -> (i32, i32, i32) {
    %c0_i32 = arith.constant 0 : i32
    %c0_i32_0 = arith.constant 0 : i32
    %c0_i32_1 = arith.constant 0 : i32
    return %arg0, %c0_i32, %c0_i32_0 : i32, i32, i32
  }
  func.func @transform_1(%arg0: i32) -> (i32, i32, i32) {
    %c0_i32 = arith.constant 0 : i32
    %c0_i32_0 = arith.constant 0 : i32
    %c0_i32_1 = arith.constant 0 : i32
    %c0_i32_2 = arith.constant 0 : i32
    return %c0_i32, %c0_i32_0, %c0_i32_1 : i32, i32, i32
  }
  func.func @transform_2(%arg0: i32) -> (i32, i32) {
    %c0_i32 = arith.constant 0 : i32
    %c0_i32_0 = arith.constant 0 : i32
    %c0_i32_1 = arith.constant 0 : i32
    return %c0_i32, %c0_i32_0 : i32, i32
  }
  func.func @transform_3(%arg0: i32) -> (i32, i32) {
    %c0_i32 = arith.constant 0 : i32
    %c0_i32_0 = arith.constant 0 : i32
    %c0_i32_1 = arith.constant 0 : i32
    return %c0_i32, %c0_i32_0 : i32, i32
  }
  func.func @transform_4(%arg0: i32) -> (i32, i32, i32) {
    %c0_i32 = arith.constant 0 : i32
    %c0_i32_0 = arith.constant 0 : i32
    %c0_i32_1 = arith.constant 0 : i32
    %c0_i32_2 = arith.constant 0 : i32
    return %c0_i32, %c0_i32_0, %c0_i32_1 : i32, i32, i32
  }
  func.func @transform_5(%arg0: i32) -> (i32, i32) {
    %c0_i32 = arith.constant 0 : i32
    %c0_i32_0 = arith.constant 0 : i32
    %c0_i32_1 = arith.constant 0 : i32
    return %c0_i32, %c0_i32_0 : i32, i32
  }
  func.func @transform_6(%arg0: i32) -> (i32, i32) {
    %c0_i32 = arith.constant 0 : i32
    %c0_i32_0 = arith.constant 0 : i32
    %c0_i32_1 = arith.constant 0 : i32
    return %c0_i32, %c0_i32_0 : i32, i32
  }
  func.func @transform_7(%arg0: i32) -> (i32, i32, i32) {
    %c0_i32 = arith.constant 0 : i32
    %c0_i32_0 = arith.constant 0 : i32
    %c0_i32_1 = arith.constant 0 : i32
    %c0_i32_2 = arith.constant 0 : i32
    return %c0_i32, %c0_i32_0, %c0_i32_1 : i32, i32, i32
  }
  func.func @transform_8(%arg0: i32) -> (i32, i32) {
    %c0_i32 = arith.constant 0 : i32
    %c0_i32_0 = arith.constant 0 : i32
    %c0_i32_1 = arith.constant 0 : i32
    return %c0_i32, %c0_i32_0 : i32, i32
  }
  func.func @transform_9(%arg0: i32) -> (i32, i32) {
    %c0_i32 = arith.constant 0 : i32
    %c0_i32_0 = arith.constant 0 : i32
    %c0_i32_1 = arith.constant 0 : i32
    return %c0_i32, %c0_i32_0 : i32, i32
  }
  func.func @transform_10(%arg0: i32) -> (i32, i32) {
    %c0_i32 = arith.constant 0 : i32
    %c0_i32_0 = arith.constant 0 : i32
    %c0_i32_1 = arith.constant 0 : i32
    return %c0_i32, %c0_i32_0 : i32, i32
  }
  func.func @transform_11(%arg0: i32) -> (i32, i32) {
    %c0_i32 = arith.constant 0 : i32
    %c0_i32_0 = arith.constant 0 : i32
    %c0_i32_1 = arith.constant 0 : i32
    return %c0_i32, %c0_i32_0 : i32, i32
  }
  func.func @transform_12(%arg0: i32) -> (i32, i32, i32) {
    %c0_i32 = arith.constant 0 : i32
    %c0_i32_0 = arith.constant 0 : i32
    %c0_i32_1 = arith.constant 0 : i32
    return %arg0, %c0_i32, %c0_i32_0 : i32, i32, i32
  }
}

</mosaic_0001>

<bundles_post_ra>
// kernel: my_model_forward.1
= control target key start
LH: loop header
LB: loop body
LE: loop exit
PB: predicated region body
PF: predicated region fallthrough
CT: control target
= control target key end

     0   :  { %s10180_s0 = inlined_call_operand.vmem [shape: bf16[2,18,54], index: 0, kind: input, shape index: {}]   ;;  %s10181_s1 = inlined_call_operand.hbm [shape: bf16[3,54,512], index: 1, kind: input, shape index: {}]   ;;  %s10182_s2 = inlined_call_operand.hbm [shape: f32[1,512], index: 2, kind: input, shape index: {}]   ;;  %s10183_s3 = inlined_call_operand.hbm [shape: f32[1,512], index: 3, kind: input, shape index: {}]   ;;  %s10184_s4 = inlined_call_operand.hbm [shape: bf16[3,320,512], index: 4, kind: input, shape index: {}]   ;;  %s10185_s5 = inlined_call_operand.hbm [shape: f32[1,512], index: 5, kind: input, shape index: {}]   ;;  %s10186_s6 = inlined_call_operand.hbm [shape: f32[1,512], index: 6, kind: input, shape index: {}]   ;;  %s10187_s7 = inlined_call_operand.hbm [shape: bf16[3,384,512], index: 7, kind: input, shape index: {}]   ;;  %s10188_s8 = inlined_call_operand.hbm [shape: f32[1,512], index: 8, kind: input, shape index: {}]   ;;  %s10189_s9 = inlined_call_operand.hbm [shape: f32[1,512], index: 9, kind: input, shape index: {}]   ;;  %s10190_s10 = inlined_call_operand.vmem [shape: f32[128,2], index: 10, kind: input, shape index: {}]   ;;  %s10191_s11 = inlined_call_operand.hbm [shape: f32[1,2], index: 11, kind: input, shape index: {}]   ;;  %s10192_s12 = inlined_call_operand.hbm [shape: f32[2,1,2], index: 12, kind: output, shape index: {}]  }
   0x1   :  { %10198 = sst [smem:[#allocation38_spill]] %s10182_s2 }
   0x2   :  { %10199 = sst [smem:[#allocation39_spill]] %s10184_s4 }
   0x3   :  { %10200 = sst [smem:[#allocation40_spill]] %s10186_s6 }
   0x4   :  { %17 = vsyncpa [#allocation9], 0 }
   0x5   :  { %18 = vsyncpa [#allocation12], 0 }
   0x6   :  { %19 = vsyncpa [#allocation15], 0 }
   0x7   :  { %20 = vsyncpa [#allocation18], 0 }
   0x8   :  { %21 = vsyncpa [#allocation21], 0 }
   0x9   :  { %22 = vsyncpa [#allocation24], 0 }
   0xa   :  { %23 = vsyncpa [#allocation10], 0 }
   0xb   :  { %25 = vsyncpa [#allocation10 + $0x1], 0  ;;  %s9538_s21 = smov 0   ;;  %s9540_s22 = smov 0  }
   0xc   :  { %s9542_s23 = smov 0   ;;  %s9544_s24 = smov 0  }
   0xd LB: > { %10201 = sst [smem:[#allocation33_spill]] %s9443_s21  ;;  %s9559_s25 = sadd.s32 4294967295, %s9455_s24   ;;  %s9455_s24 = sphi %s9544_s24, %s10217_s24   ;;  %s9451_s23 = sphi %s9542_s23, %s10219_s23   ;;  %s9447_s22 = sphi %s9540_s22, %s10221_s22   ;;  %s9443_s21 = sphi %s9538_s21, %s10220_s21  }
   0xe   : > { %10202 = sst [smem:[#allocation34_spill]] %s9451_s23  ;;  %s6042_s26 = sadd.s32 4294967294, %s9455_s24  }
   0xf   : > { %s9563_s27 = sadd.s32 1, %s9455_s24   ;;  %s295_s28 = sadd.s32 1, %s9451_s23 }
  0x10   : > { %10203 = sst [smem:[#allocation35_spill]] %s9563_s27  ;;  %s292_s29 = ssub.s32 %s9455_s24, %s9563_s27 }
  0x11   : > { %p305_p0 = scmp.ne.s32.totalorder %s9451_s23, %s9447_s22  ;;  %p293_p1 = scmp.eq.s32.totalorder %s292_s29, 0 }
  0x12   : > { %p306_p2 = scmp.eq.s32.totalorder %s9559_s25, 1  ;;  %p311_p3 = scmp.ne.s32.totalorder %s9447_s22, %s9443_s21 }
  0x13   : > { %p312_p4 = scmp.eq.s32.totalorder %s6042_s26, 1  ;;  %p6043_p7 = scmp.ge.s32.totalorder %s9455_s24, 1 }
  0x14   : > { %s9574_s30 = scalar_select %p293_p1, %s9451_s23, %s295_s28  }
  0x15   : > { %p9576_p5 = por %p306_p2, %p305_p0  ;;  %p9580_p6 = por %p312_p4, %p311_p3 }
  0x16   : > { %10204 = sst [smem:[#allocation36_spill]] %s9574_s30  ;;  %p319_p8 = scmp.lt.s32.totalorder %s9455_s24, 3 }
  0x17   : > { %s10206_s14 = scalar_select %p9580_p6, 1, 0 }
  0x18   : > { %p8996_p9 = scmp.eq.s32.totalorder %s9559_s25, 0  ;;  %p9587_p10 = pnand %p6043_p7, %p319_p8 }
  0x19   : > { %10207 = sst [smem:[#allocation37_spill]] %s10206_s14  ;;  %s9457_s19 = smov [#allocation11]  }
  0x1a   : > { %s10209_s2 = sld [smem:[#allocation38_spill]]  ;;  %p8961_p11 = pneg %p9587_p10 }
  0x1b   : > { %s347_s20 = sshll.u32 %s9457_s19, 4  ;;  %s10211_s4 = sld [smem:[#allocation39_spill]]  ;;  %s348_s20 = int_to_ptr.vmem [resolvable:$true] %s347_s20 }
  0x1c   : > { %p9598_p12 = pnand %p8996_p9, %p8961_p11  ;;  %s9458_s16 = smov [#allocation14]  }
  0x1d   : > { %s370_s17 = sshll.u32 %s9458_s16, 4  ;;  %s10212_s6 = sld [smem:[#allocation40_spill]]  ;;  %s371_s17 = int_to_ptr.vmem [resolvable:$true] %s370_s17 }
  0x1e   : > { %s9459_s27 = smov 256   ;;  %s9460_s14 = smov 16  }
  0x1f   : > { %s330_s21 = sshll.u32 %s10181_s1, 4  ;;  %s357_s28 = sshll.u32 %s10183_s3, 4  ;;  %s331_s21 = int_to_ptr.hbm [resolvable:$true] %s330_s21  ;;  %s358_s28 = int_to_ptr.hbm [resolvable:$true] %s357_s28 }
  0x20   : > { %s345_s18 = sshll.u32 %s10209_s2, 4  ;;  %s9462_s2 = smov [#allocation20]   ;;  %s346_s18 = int_to_ptr.hbm [resolvable:$true] %s345_s18 }
  0x21   : > { %s368_s30 = sshll.u32 %s10211_s4, 4  ;;  %s423_s19 = sshll.u32 %s9462_s2, 4  ;;  %s369_s30 = int_to_ptr.hbm [resolvable:$true] %s368_s30  ;;  %s424_s19 = int_to_ptr.vmem [resolvable:$true] %s423_s19 }
  0x22   : > { %8967 = dma.hbm_to_vmem [thread:$0]  (!%p9598_p12), %s346_s18, 64, %s348_s20, [#allocation12]  }
  0x23   : > { %s395_s23 = sshll.u32 %s10212_s6, 4  ;;  %s421_s18 = sshll.u32 %s10188_s8, 4  ;;  %s396_s23 = int_to_ptr.hbm [resolvable:$true] %s395_s23  ;;  %s422_s18 = int_to_ptr.hbm [resolvable:$true] %s421_s18 }
  0x24   : > { %8973 = dma.hbm_to_vmem [thread:$0]  (!%p9598_p12), %s369_s30, 30720, %s371_s17, [#allocation15], %s9459_s27, %s9459_s27, %s9460_s14  }
  0x25   : > { %s9461_s20 = smov [#allocation17]   ;;  %s9463_s29 = smov [#allocation8]  }
  0x26   : > { %s397_s16 = sshll.u32 %s9461_s20, 4  ;;  %s332_s20 = sshll.u32 %s9463_s29, 4  ;;  %s398_s16 = int_to_ptr.vmem [resolvable:$true] %s397_s16  ;;  %s333_s20 = int_to_ptr.vmem [resolvable:$true] %s332_s20 }
  0x27   : > { %8979 = dma.hbm_to_vmem [thread:$0]  (!%p9598_p12), %s396_s23, 64, %s398_s16, [#allocation18]  }
  0x28   : > { %8985 = dma.hbm_to_vmem [thread:$0]  (!%p9598_p12), %s422_s18, 64, %s424_s19, [#allocation21]  }
  0x29   : > { %8964 = dma.hbm_to_vmem [thread:$0]  (!%p9598_p12), %s331_s21, 5376, %s333_s20, [#allocation9], %s9459_s27, %s9459_s27, %s9460_s14  }
  0x2a   : > { %s9464_s4 = smov [#allocation13]   ;;  %s383_s18 = sshll.u32 %s10185_s5, 4  ;;  %s384_s18 = int_to_ptr.hbm [resolvable:$true] %s383_s18 }
  0x2b   : > { %s359_s6 = sshll.u32 %s9464_s4, 4  ;;  %s406_s30 = sshll.u32 %s10187_s7, 4  ;;  %s360_s6 = int_to_ptr.vmem [resolvable:$true] %s359_s6  ;;  %s407_s30 = int_to_ptr.hbm [resolvable:$true] %s406_s30 }
  0x2c   : > { %8970 = dma.hbm_to_vmem [thread:$0]  (!%p9598_p12), %s358_s28, 64, %s360_s6, [#allocation12]  }
  0x2d   : > { %s9465_s17 = smov [#allocation16]   ;;  %s9466_s21 = smov [#allocation19]  }
  0x2e   : > { %s385_s29 = sshll.u32 %s9465_s17, 4  ;;  %s408_s20 = sshll.u32 %s9466_s21, 4  ;;  %s386_s29 = int_to_ptr.vmem [resolvable:$true] %s385_s29  ;;  %s409_s20 = int_to_ptr.vmem [resolvable:$true] %s408_s20 }
  0x2f   : > { %8976 = dma.hbm_to_vmem [thread:$0]  (!%p9598_p12), %s384_s18, 64, %s386_s29, [#allocation15]  }
  0x30   : > { %s433_s16 = sshll.u32 %s10189_s9, 4  ;;  %s448_s2 = sshll.u32 %s10191_s11, 4  ;;  %s434_s16 = int_to_ptr.hbm [resolvable:$true] %s433_s16  ;;  %s449_s2 = int_to_ptr.hbm [resolvable:$true] %s448_s2 }
  0x31   : > { %8982 = dma.hbm_to_vmem [thread:$0]  (!%p9598_p12), %s407_s30, 36864, %s409_s20, [#allocation18], %s9459_s27, %s9459_s27, %s9460_s14  }
  0x32   : > { %s9467_s19 = smov [#allocation22]   ;;  %s9468_s17 = smov [#allocation23]  }
  0x33   : > { %s435_s18 = sshll.u32 %s9467_s19, 4  ;;  %s450_s29 = sshll.u32 %s9468_s17, 4  ;;  %s436_s18 = int_to_ptr.vmem [resolvable:$true] %s435_s18  ;;  %s451_s29 = int_to_ptr.vmem [resolvable:$true] %s450_s29 }
  0x34   : > { %8988 = dma.hbm_to_vmem [thread:$0]  (!%p9598_p12), %s434_s16, 64, %s436_s18, [#allocation21]  }
  0x35   : > { %8991 = dma.hbm_to_vmem [thread:$0]  (!%p9598_p12), %s449_s2, 16, %s451_s29, [#allocation24]  }
  0x36   : > { %471 = sbr.rel (%p9587_p10) target bundleno = 2011 (0x7db), region = 68 }
  0x3b   : > { %9414 = dma.done.wait (%p8996_p9), [#allocation9], 5376  }
  0x3c   : > { %9416 = vsyncadd (%p8996_p9), [#allocation9], 4294961920 }
  0x3d   : > { %9418 = dma.done.wait (%p8996_p9), [#allocation12], 128  }
  0x3e   : > { %9420 = vsyncadd (%p8996_p9), [#allocation12], 4294967168 }
  0x3f   : > { %9422 = dma.done.wait (%p8996_p9), [#allocation15], 30784  }
  0x40   : > { %9424 = vsyncadd (%p8996_p9), [#allocation15], 4294936512 }
  0x41   : > { %9426 = dma.done.wait (%p8996_p9), [#allocation18], 36928  }
  0x42   : > { %9428 = vsyncadd (%p8996_p9), [#allocation18], 4294930368 }
  0x43   : > { %9430 = dma.done.wait (%p8996_p9), [#allocation21], 128  }
  0x44   : > { %9432 = vsyncadd (%p8996_p9), [#allocation21], 4294967168 }
  0x45   : > { %9434 = dma.done.wait (%p8996_p9), [#allocation24], 16  }
  0x46   : > { %9436 = vsyncadd (%p8996_p9), [#allocation24], 4294967280  ;;  %p558_p13 = scmp.lt.s32.totalorder %s9559_s25, 1  ;;  %v615_v0 = vld [vmem:[#allocation8 + $0xd0] sm:$0x77]  ;;  %vm712_vm0 = vcmask 1042432   ;;  %s5885_s16 = scalar_lea.hbm %s10192_s12, %s9559_s25 }
  0x47   : > { %v616_v1 = vld [vmem:[#allocation8 + $0xd8] sm:$0x77]  ;;  %v676_v2 = vunpack.c.l.b16 %v615_v0  ;;  %v677_v3 = vunpack.c.h.b16 %v615_v0  ;;  %v6105_v6 = vld [vmem:[#allocation8 + $0xb0] sm:$0xf]  ;;  %v8376_v7 = vld [vmem:[#allocation8 + $0xbc] sm:$0xf0] }
  0x48   : > { %s9686_s27 = scalar_select %p558_p13, %s9559_s25, 1  ;;  %v678_v4 = vunpack.c.l.b16 %v616_v1  ;;  %v679_v5 = vunpack.c.h.b16 %v616_v1  ;;  %v8374_v8 = vld [vmem:[#allocation8 + $0xb4] sm:$0xf]  ;;  %v6107_v13 = vld [vmem:[#allocation8 + $0xc0] sm:$0xf0]  ;;  %v6106_v24 = vor.u32 %v8376_v7, %v6105_v6  ;;  %vm708_vm2 = vcmask 441344  }
  0x49   : > { %v692_v9 = vpack.c.b16 %v676_v2, %v676_v2  ;;  %v693_v10 = vpack.c.b16 %v677_v3, %v677_v3  ;;  %v6113_v14 = vld [vmem:[#allocation8 + $0xb8] sm:$0xf]  ;;  %v8377_v15 = vld [vmem:[#allocation8 + $0xc4] sm:$0xf0]  ;;  %v8375_v16 = vld [vmem:[#allocation8 + $0xbc] sm:$0xf]  ;;  %v6110_v25 = vor.u32 %v8374_v8, %v6107_v13 }
  0x4a   : > { %s8918_s14 = smul.u32 12, %s9686_s27  ;;  %v694_v11 = vpack.c.b16 %v678_v4, %v678_v4  ;;  %v695_v12 = vpack.c.b16 %v679_v5, %v679_v5  ;;  %v6115_v17 = vld [vmem:[#allocation8 + $0xc8] sm:$0xf0]  ;;  %v6089_v18 = vld [vmem:[#allocation8 + $0x90] sm:$0xf]  ;;  %v6114_v29 = vor.u32 %v8377_v15, %v6113_v14  ;;  %vm936_vm3 = vcmask 1046528  }
  0x4b   : > { %v714_v19 = vsel %vm712_vm0, %v692_v9, 0  ;;  %v717_v20 = vsel %vm712_vm0, %v693_v10, 0  ;;  %v8372_v23 = vld [vmem:[#allocation8 + $0x9c] sm:$0xf0]  ;;  %v8370_v26 = vld [vmem:[#allocation8 + $0x94] sm:$0xf]  ;;  %v6118_v30 = vor.u32 %v8375_v16, %v6115_v17 }
  0x4c   : > { %v720_v21 = vsel %vm712_vm0, %v694_v11, 0  ;;  %v723_v22 = vsel %vm712_vm0, %v695_v12, 0  ;;  %729 = vmatpush.bf16.msra.mxu0 %v714_v19  ;;  %743 = vmatpush.bf16.msra.mxu1 %v717_v20  ;;  %v6091_v27 = vld [vmem:[#allocation8 + $0xa0] sm:$0xf0]  ;;  %v6097_v28 = vld [vmem:[#allocation8 + $0x98] sm:$0xf]  ;;  %s562_s30 = scalar_lea.vmem %s10180_s0, %s8918_s14  ;;  %v6090_v34 = vor.u32 %v8372_v23, %v6089_v18 }
  0x4d   : > { %757 = vmatpush.bf16.msra.mxu2 %v720_v21  ;;  %771 = vmatpush.bf16.msra.mxu3 %v723_v22  ;;  %v8373_v31 = vld [vmem:[#allocation8 + $0xa4] sm:$0xf0]  ;;  %v8371_v32 = vld [vmem:[#allocation8 + $0x9c] sm:$0xf]  ;;  %v6099_v33 = vld [vmem:[#allocation8 + $0xa8] sm:$0xf0]  ;;  %v6094_v39 = vor.u32 %v8370_v26, %v6091_v27 }
  0x4e   : > { %v6073_v35 = vld [vmem:[#allocation8 + $0x70] sm:$0xf]  ;;  %v8368_v36 = vld [vmem:[#allocation8 + $0x7c] sm:$0xf0]  ;;  %v9696_v37 = vld [vmem:[%s562_s30] sm:$0xff]  ;;  %v6098_v40 = vor.u32 %v8373_v31, %v6097_v28  ;;  %v6102_v41 = vor.u32 %v8371_v32, %v6099_v33  ;;  %vm1141_vm5 = vcmask 1040384  }
  0x4f   : > { %v587_v38 = vld [vmem:[%s562_s30 + $0x8] sm:$0x1]  ;;  %v8366_v42 = vld [vmem:[#allocation8 + $0x74] sm:$0xf]  ;;  %v601_v45 = vld [vmem:[#allocation8 + $0x68] sm:$0x77]  ;;  %v6074_v61 = vor.u32 %v8368_v36, %v6073_v35 }
  0x50   : > { %730 = vmatpush.bf16.msra.mxu0 %v6106_v24  ;;  %744 = vmatpush.bf16.msra.mxu1 %v6110_v25  ;;  %v622_v43 = vunpack.c.l.b16 %v587_v38  ;;  %v600_v44 = vld [vmem:[#allocation8 + $0x60] sm:$0x77]  ;;  %v6081_v47 = vld [vmem:[#allocation8 + $0x78] sm:$0xf]  ;;  %v627_v48 = vshrl.u32 %v9696_v37, 16  ;;  %v629_v49 = vshll.u32 %v9696_v37, 16  ;;  %v821_v56 = vunpack.c.l.b16 %v601_v45 }
  0x51   : > { %758 = vmatpush.bf16.msra.mxu2 %v6114_v29  ;;  %772 = vmatpush.bf16.msra.mxu3 %v6118_v30  ;;  %v6075_v46 = vld [vmem:[#allocation8 + $0x80] sm:$0xf0]  ;;  %v819_v50 = vunpack.c.l.b16 %v600_v44  ;;  %v820_v51 = vunpack.c.h.b16 %v600_v44  ;;  %v8369_v52 = vld [vmem:[#allocation8 + $0x84] sm:$0xf0]  ;;  %v8367_v53 = vld [vmem:[#allocation8 + $0x7c] sm:$0xf]  ;;  %v822_v57 = vunpack.c.h.b16 %v601_v45 }
  0x52   : > { %v6083_v54 = vld [vmem:[#allocation8 + $0x88] sm:$0xf0]  ;;  %v9700_v55 = vpack.c.b16 %v622_v43, %v622_v43  ;;  %v631_v58 = vrot.slane %v629_v49, 1  ;;  %v6078_v62 = vor.u32 %v8366_v42, %v6075_v46  ;;  %v6082_v0 = vor.u32 %v8369_v52, %v6081_v47  ;;  %v6157_v6 = vld [vmem:[#allocation8 + $0x40] sm:$0xf]  ;;  %s9470_s21 = smov 64  }
  0x53   : > { %v835_v59 = vpack.c.b16 %v819_v50, %v819_v50  ;;  %v836_v60 = vpack.c.b16 %v820_v51, %v820_v51  ;;  %v6086_v1 = vor.u32 %v8367_v53, %v6083_v54  ;;  %vm625_vm1 = vsmask.f32 7424  ;;  %v8364_v7 = vld [vmem:[#allocation8 + $0x4c] sm:$0xf0]  ;;  %v8362_v10 = vld [vmem:[#allocation8 + $0x44] sm:$0xf] }
  0x54   : > { %731 = vmatpush.bf16.msra.mxu0 %v6090_v34  ;;  %745 = vmatpush.bf16.msra.mxu1 %v6094_v39  ;;  %v634_v63 = vshll.u32 %v9700_v55, 16  ;;  %v632_v2 = vor.u32 %v631_v58, %v627_v48  ;;  %v837_v4 = vpack.c.b16 %v821_v56, %v821_v56  ;;  %v838_v5 = vpack.c.b16 %v822_v57, %v822_v57  ;;  %v6159_v11 = vld [vmem:[#allocation8 + $0x50] sm:$0xf0]  ;;  %v6165_v13 = vld [vmem:[#allocation8 + $0x48] sm:$0xf]  ;;  %s9471_s20 = smov 96  }
  0x55   : > { %759 = vmatpush.bf16.msra.mxu2 %v6098_v40  ;;  %773 = vmatpush.bf16.msra.mxu3 %v6102_v41  ;;  %v854_v8 = vsel %vm712_vm0, %v835_v59, 0  ;;  %v857_v9 = vsel %vm712_vm0, %v836_v60, 0  ;;  %v8365_v14 = vld [vmem:[#allocation8 + $0x54] sm:$0xf0]  ;;  %v8363_v15 = vld [vmem:[#allocation8 + $0x4c] sm:$0xf]  ;;  %v6158_v19 = vor.u32 %v8364_v7, %v6157_v6  ;;  %v6162_v20 = vor.u32 %v8362_v10, %v6159_v11 }
  0x56   : > { %v636_v3 = vrot.slane %v634_v63, 1  ;;  %v6167_v16 = vld [vmem:[#allocation8 + $0x58] sm:$0xf0]  ;;  %v860_v17 = vsel %vm712_vm0, %v837_v4, 0  ;;  %v863_v18 = vsel %vm712_vm0, %v838_v5, 0  ;;  %v6166_v29 = vor.u32 %v8365_v14, %v6165_v13  ;;  %s9472_s4 = smov 32  }
  0x57   : > { %v6141_v21 = vld [vmem:[#allocation8 + $0x20] sm:$0xf]  ;;  %v8360_v23 = vld [vmem:[#allocation8 + $0x2c] sm:$0xf0]  ;;  %v8358_v24 = vld [vmem:[#allocation8 + $0x24] sm:$0xf]  ;;  %v6170_v30 = vor.u32 %v8363_v15, %v6167_v16 }
  0x58   : > { %732 = vmatpush.bf16.msra.mxu0 %v6074_v61  ;;  %746 = vmatpush.bf16.msra.mxu1 %v6078_v62  ;;  %v637_v12 = vsel %vm625_vm1, %v632_v2, %v636_v3  ;;  %v934_v22 = vld [vmem:[#allocation8 + $0x140] sm:$0x77]  ;;  %v6143_v25 = vld [vmem:[#allocation8 + $0x30] sm:$0xf0]  ;;  %v935_v28 = vld [vmem:[#allocation8 + $0x148] sm:$0x77]  ;;  %v6142_v33 = vor.u32 %v8360_v23, %v6141_v21 }
  0x59   : > { %760 = vmatpush.bf16.msra.mxu2 %v6082_v0  ;;  %774 = vmatpush.bf16.msra.mxu3 %v6086_v1  ;;  %v978_v26 = vunpack.c.l.b16 %v934_v22  ;;  %v979_v27 = vunpack.c.h.b16 %v934_v22  ;;  %v6149_v31 = vld [vmem:[#allocation8 + $0x28] sm:$0xf]  ;;  %v8361_v32 = vld [vmem:[#allocation8 + $0x34] sm:$0xf0]  ;;  %v6146_v34 = vor.u32 %v8358_v24, %v6143_v25  ;;  %v8359_v35 = vld [vmem:[#allocation8 + $0x2c] sm:$0xf]  ;;  %v980_v42 = vunpack.c.l.b16 %v935_v28 }
  0x5a   : > { %v6151_v36 = vld [vmem:[#allocation8 + $0x38] sm:$0xf0]  ;;  %v6125_v38 = vld [vmem:[#allocation8] sm:$0xf]  ;;  %v8356_v39 = vld [vmem:[#allocation8 + $0xc] sm:$0xf0]  ;;  %v981_v43 = vunpack.c.h.b16 %v935_v28  ;;  %v6150_v46 = vor.u32 %v8361_v32, %v6149_v31 }
  0x5b   : > { %6119 = vmatmul.msk.bf16.vlgmr.msra.gmra.mxu0 %vm708_vm2, %v637_v12  ;;  %6120 = vmatmul.msk.bf16.vlgmr.msra.gmra.mxu1 %vm708_vm2, %v637_v12  ;;  %v8354_v40 = vld [vmem:[#allocation8 + $0x4] sm:$0xf]  ;;  %v6127_v41 = vld [vmem:[#allocation8 + $0x10] sm:$0xf0]  ;;  %v994_v44 = vpack.c.b16 %v978_v26, %v978_v26  ;;  %v995_v45 = vpack.c.b16 %v979_v27, %v979_v27  ;;  %v6154_v47 = vor.u32 %v8359_v35, %v6151_v36  ;;  %v6133_v48 = vld [vmem:[#allocation8 + $0x8] sm:$0xf] }
  0x5c   : > { %869 = vmatpush.bf16.msrb.mxu0 %v854_v8  ;;  %883 = vmatpush.bf16.msrb.mxu1 %v857_v9  ;;  %v6126_v49 = vor.u32 %v8356_v39, %v6125_v38  ;;  %v6130_v50 = vor.u32 %v8354_v40, %v6127_v41  ;;  %v8357_v51 = vld [vmem:[#allocation8 + $0x14] sm:$0xf0]  ;;  %v8355_v52 = vld [vmem:[#allocation8 + $0xc] sm:$0xf]  ;;  %v6135_v53 = vld [vmem:[#allocation8 + $0x18] sm:$0xf0]  ;;  %v996_v54 = vpack.c.b16 %v980_v42, %v980_v42 }
  0x5d   : > { %6121 = vmatmul.msk.bf16.vlgmr.msra.gmra.mxu2 %vm708_vm2, %v637_v12  ;;  %6122 = vmatmul.msk.bf16.vlgmr.msra.gmra.mxu3 %vm708_vm2, %v637_v12  ;;  %v997_v56 = vpack.c.b16 %v981_v43, %v981_v43  ;;  %v1014_v57 = vsel %vm712_vm0, %v994_v44, 0  ;;  %v1017_v58 = vsel %vm712_vm0, %v995_v45, 0  ;;  %v6134_v59 = vor.u32 %v8357_v51, %v6133_v48  ;;  %v6209_v61 = vld [vmem:[#allocation8 + $0x120] sm:$0xf]  ;;  %v8388_v62 = vld [vmem:[#allocation8 + $0x12c] sm:$0xf0] }
  0x5e   : > { %897 = vmatpush.bf16.msrb.mxu2 %v860_v17  ;;  %911 = vmatpush.bf16.msrb.mxu3 %v863_v18  ;;  %v6138_v60 = vor.u32 %v8355_v52, %v6135_v53  ;;  %v8386_v63 = vld [vmem:[#allocation8 + $0x124] sm:$0xf]  ;;  %v6211_v0 = vld [vmem:[#allocation8 + $0x130] sm:$0xf0]  ;;  %v6217_v1 = vld [vmem:[#allocation8 + $0x128] sm:$0xf]  ;;  %v6210_v7 = vor.u32 %v8388_v62, %v6209_v61  ;;  %v575_v45 = vlaneseq }
  0x5f   : > { %v8389_v2 = vld [vmem:[#allocation8 + $0x134] sm:$0xf0]  ;;  %v1020_v3 = vsel %vm712_vm0, %v996_v54, 0  ;;  %v1023_v4 = vsel %vm712_vm0, %v997_v56, 0  ;;  %v8387_v5 = vld [vmem:[#allocation8 + $0x12c] sm:$0xf]  ;;  %v6214_v8 = vor.u32 %v8386_v63, %v6211_v0 }
  0x60   : > { %870 = vmatpush.bf16.msrb.mxu0 %v6158_v19  ;;  %884 = vmatpush.bf16.msrb.mxu1 %v6162_v20  ;;  %v6219_v6 = vld [vmem:[#allocation8 + $0x138] sm:$0xf0]  ;;  %v6193_v9 = vld [vmem:[#allocation8 + $0x100] sm:$0xf]  ;;  %v8384_v10 = vld [vmem:[#allocation8 + $0x10c] sm:$0xf0]  ;;  %v6218_v11 = vor.u32 %v8389_v2, %v6217_v1 }
  0x61   : > { %v6222_v12 = vor.u32 %v8387_v5, %v6219_v6  ;;  %v8382_v13 = vld [vmem:[#allocation8 + $0x104] sm:$0xf]  ;;  %v6195_v14 = vld [vmem:[#allocation8 + $0x110] sm:$0xf0]  ;;  %v6201_v15 = vld [vmem:[#allocation8 + $0x108] sm:$0xf]  ;;  %v6194_v19 = vor.u32 %v8384_v10, %v6193_v9 }
  0x62   : > { %898 = vmatpush.bf16.msrb.mxu2 %v6166_v29  ;;  %912 = vmatpush.bf16.msrb.mxu3 %v6170_v30  ;;  %v8385_v16 = vld [vmem:[#allocation8 + $0x114] sm:$0xf0]  ;;  %v8383_v17 = vld [vmem:[#allocation8 + $0x10c] sm:$0xf]  ;;  %v6203_v18 = vld [vmem:[#allocation8 + $0x118] sm:$0xf0]  ;;  %v6198_v20 = vor.u32 %v8382_v13, %v6195_v14 }
  0x63   : > { %v6177_v21 = vld [vmem:[#allocation8 + $0xe0] sm:$0xf]  ;;  %v8380_v22 = vld [vmem:[#allocation8 + $0xec] sm:$0xf0]  ;;  %v6202_v23 = vor.u32 %v8385_v16, %v6201_v15  ;;  %v6206_v24 = vor.u32 %v8383_v17, %v6203_v18  ;;  %v8378_v25 = vld [vmem:[#allocation8 + $0xe4] sm:$0xf] }
  0x64   : > { %871 = vmatpush.bf16.msrb.mxu0 %v6142_v33  ;;  %885 = vmatpush.bf16.msrb.mxu1 %v6146_v34  ;;  %v6179_v26 = vld [vmem:[#allocation8 + $0xf0] sm:$0xf0]  ;;  %v6185_v27 = vld [vmem:[#allocation8 + $0xe8] sm:$0xf]  ;;  %v8381_v28 = vld [vmem:[#allocation8 + $0xf4] sm:$0xf0]  ;;  %v6178_v31 = vor.u32 %v8380_v22, %v6177_v21 }
  0x65   : > { %v8379_v29 = vld [vmem:[#allocation8 + $0xec] sm:$0xf]  ;;  %v6187_v30 = vld [vmem:[#allocation8 + $0xf8] sm:$0xf0]  ;;  %v6182_v32 = vor.u32 %v8378_v25, %v6179_v26  ;;  %v6186_v33 = vor.u32 %v8381_v28, %v6185_v27  ;;  %v937_v35 = vrot.slane %v9696_v37, 1  ;;  %v938_v36 = vrot.slane %v9700_v55, 1 }
  0x66   : > { %899 = vmatpush.bf16.msrb.mxu2 %v6150_v46  ;;  %913 = vmatpush.bf16.msrb.mxu3 %v6154_v47  ;;  %v6190_v34 = vor.u32 %v8379_v29, %v6187_v30  ;;  %vm9733_vm4 = vcmp.lt.s32.totalorder %v575_v45, 512  ;;  %v9753_v54 = vld [vmem:[#allocation11] sm:$0xf]  ;;  %v9755_v56 = vld [vmem:[#allocation13] sm:$0xf]  ;;  %vm1311_vm6 = vcmask 261121  }
  0x67   : > { %v939_v38 = vsel %vm936_vm3, %v937_v35, %v938_v36  ;;  %v1091_v61 = vperm.slane %v9753_v54, 0  ;;  %v1092_v62 = vperm.slane %v9753_v54, 1  ;;  %v1109_v2 = vperm.slane %v9755_v56, 0  ;;  %s5889_s2 = sshll.u32 %s5885_s16, 4  ;;  %s9389_s27 = scalar_lea.hbm %s10192_s12, 2  ;;  %s5890_s2 = int_to_ptr.hbm [resolvable:$true] %s5889_s2 }
  0x68   : > { %872 = vmatpush.bf16.msrb.mxu0 %v6126_v49  ;;  %886 = vmatpush.bf16.msrb.mxu1 %v6130_v50  ;;  %v9469_v49 = vmov 0.0   ;;  %v1112_v22 = vperm.slane %v9755_v56, 3  ;;  %vm1313_vm7 = vcmask 253952   ;;  %vm566_vm8 = vcmask 523264   ;;  %s9383_s18 = sshra.s32 %s5890_s2, 4  ;;  %s9384_s18 = int_to_ptr.hbm [resolvable:$true] %s9383_s18 }
  0x69   : > { %579 = vst.msk [vmem:[#allocation4] ss:$8 sm:$0xf] %vm9733_vm4, %v9469_v49  ;;  %vm570_vm9 = vcmask 517120   ;;  %vm1271_vm10 = vcmask 523521   ;;  %vm1273_vm11 = vcmask 516352   ;;  %p9390_p3 = scmp.lt.s32.totalorder %s9384_s18, %s10192_s12 }
  0x6a   : > { %900 = vmatpush.bf16.msrb.mxu2 %v6134_v59  ;;  %914 = vmatpush.bf16.msrb.mxu3 %v6138_v60  ;;  %564 = vst [vmem:[#allocation2] sm:$0xff] %v9469_v49  ;;  %vm1284_vm12 = vcmask 785921   ;;  %vm1286_vm13 = vcmask 778752   ;;  %vm1300_vm14 = vcmask 1048321   ;;  %vm1302_vm15 = vcmask 1041152   ;;  %s9385_s25 = scalar_lea.hbm %s9384_s18, 1 }
  0x6b   : > { %6171 = vmatmul.msk.bf16.vlgmr.msrb.gmra.mxu0 %vm708_vm2, %v9696_v37  ;;  %6172 = vmatmul.msk.bf16.vlgmr.msrb.gmra.mxu1 %vm708_vm2, %v9696_v37  ;;  %565 = vst [vmem:[#allocation2 + $0x8] sm:$0xff] %v9469_v49  ;;  %vm3444_vm0 = vcmask 1044993   ;;  %vm3457_vm1 = vcmask 520193   ;;  %p9386_p0 = scmp.ne.s32.totalorder %s9384_s18, %s9385_s25  ;;  %p9391_p4 = scmp.lt.s32.totalorder %s9389_s27, %s9385_s25 }
  0x6c   : > { %1029 = vmatpush.bf16.msra.mxu0 %v1014_v57  ;;  %1043 = vmatpush.bf16.msra.mxu1 %v1017_v58  ;;  %568 = vst [vmem:[#allocation2 + $0x18] sm:$0x3] %v9469_v49 }
  0x6d   : > { %6173 = vmatmul.msk.bf16.vlgmr.msrb.gmra.mxu2 %vm708_vm2, %v9696_v37  ;;  %6174 = vmatmul.msk.bf16.vlgmr.msrb.gmra.mxu3 %vm708_vm2, %v9696_v37  ;;  %569 = vst [vmem:[#allocation2 + $0x20] sm:$0x3] %v9469_v49  ;;  %p9387_p1 = pnand %p9386_p0, %p9576_p5  ;;  %p9392_p7 = por %p9391_p4, %p9390_p3 }
  0x6e   : > { %1057 = vmatpush.bf16.msra.mxu2 %v1020_v3  ;;  %1071 = vmatpush.bf16.msra.mxu3 %v1023_v4  ;;  %572 = vst [vmem:[#allocation3] sm:$0x3f] %v9469_v49  ;;  %v1110_v4 = vperm.slane %v9755_v56, 1 }
  0x6f   : > { %573 = vst [vmem:[#allocation3 + $0x8] sm:$0x3f] %v9469_v49  ;;  %p9388_p2 = pneg %p9387_p1 }
  0x70   : > { %1030 = vmatpush.bf16.msra.mxu0 %v6210_v7  ;;  %1044 = vmatpush.bf16.msra.mxu1 %v6214_v8  ;;  %574 = vst [vmem:[#allocation3 + $0x10] sm:$0x3f] %v9469_v49 }
  0x71   : > { %581 = vst.msk [vmem:[#allocation5] ss:$8 sm:$0xf] %vm9733_vm4, %v9469_v49  ;;  %p9393_p8 = pnand %p9392_p7, %p9388_p2 }
  0x72   : > { %1058 = vmatpush.bf16.msra.mxu2 %v6218_v11  ;;  %1072 = vmatpush.bf16.msra.mxu3 %v6222_v12  ;;  %583 = vst.msk [vmem:[#allocation6] ss:$8 sm:$0xf] %vm9733_vm4, %v9469_v49  ;;  %v1093_v11 = vperm.slane %v9753_v54, 2  ;;  %v1094_v12 = vperm.slane %v9753_v54, 3 }
  0x73   : > { %567 = vst.msk [vmem:[#allocation2 + $0x10] sm:$0xff] %vm566_vm8, %v9469_v49 }
  0x74   : > { %1031 = vmatpush.bf16.msra.mxu0 %v6194_v19  ;;  %1045 = vmatpush.bf16.msra.mxu1 %v6198_v20  ;;  %v1111_v20 = vperm.slane %v9755_v56, 2  ;;  %571 = vst.msk [vmem:[#allocation2 + $0x28] sm:$0x3] %vm570_vm9, %v9469_v49  ;;  %v6397_v49 = vld [vmem:[#allocation14 + $0x3c8] sm:$0xf] }
  0x76   : > { %1059 = vmatpush.bf16.msra.mxu2 %v6202_v23  ;;  %1073 = vmatpush.bf16.msra.mxu3 %v6206_v24 }
  0x78   : > { %1032 = vmatpush.bf16.msra.mxu0 %v6178_v31  ;;  %1046 = vmatpush.bf16.msra.mxu1 %v6182_v32 }
  0x7a   : > { %1060 = vmatpush.bf16.msra.mxu2 %v6186_v33  ;;  %1074 = vmatpush.bf16.msra.mxu3 %v6190_v34 }
  0x7b   : > { %6223 = vmatmul.msk.bf16.vlgmr.msra.gmra.mxu0 %vm708_vm2, %v939_v38  ;;  %6224 = vmatmul.msk.bf16.vlgmr.msra.gmra.mxu1 %vm708_vm2, %v939_v38 }
  0x7d   : > { %6225 = vmatmul.msk.bf16.vlgmr.msra.gmra.mxu2 %vm708_vm2, %v939_v38  ;;  %6226 = vmatmul.msk.bf16.vlgmr.msra.gmra.mxu3 %vm708_vm2, %v939_v38  ;;  %vm5850_vm2 = vcmask 8192  }
  0xd8   : > { %v734_v39 = vpop.f32.mrf.mxu0  ;;  %v748_v40 = vpop.f32.mrf.mxu1 }
  0xe0   : > { %v762_v41 = vpop.f32.mrf.mxu2  ;;  %v776_v37 = vpop.f32.mrf.mxu3 }
  0xe1   : > { %v736_v42 = vpop.f32.mrf.mxu0  ;;  %v750_v55 = vpop.f32.mrf.mxu1 }
  0xe8   : > { %v9729_v43 = vpop.f32.mrf.mxu2  ;;  %v9731_v44 = vpop.f32.mrf.mxu3 }
  0xe9   : > { %v874_v46 = vpop.f32.mrf.mxu0  ;;  %v888_v47 = vpop.f32.mrf.mxu1 }
  0xea   : > { %v875_v57 = vadd.f32 %v874_v46, %v734_v39  ;;  %v889_v58 = vadd.f32 %v888_v47, %v748_v40 }
  0xf0   : > { %v902_v50 = vpop.f32.mrf.mxu2  ;;  %v916_v51 = vpop.f32.mrf.mxu3 }
  0xf1   : > { %v876_v52 = vpop.f32.mrf.mxu0  ;;  %v890_v53 = vpop.f32.mrf.mxu1  ;;  %v903_v9 = vadd.f32 %v902_v50, %v762_v41  ;;  %v917_v10 = vadd.f32 %v916_v51, %v776_v37 }
  0xf2   : > { %v877_v13 = vadd.f32 %v876_v52, %v736_v42  ;;  %v891_v14 = vadd.f32 %v890_v53, %v750_v55 }
  0xf8   : > { %v904_v59 = vpop.f32.mrf.mxu2  ;;  %v918_v60 = vpop.f32.mrf.mxu3 }
  0xf9   : > { %v1034_v63 = vpop.f32.mrf.mxu0  ;;  %v1048_v0 = vpop.f32.mrf.mxu1  ;;  %v905_v38 = vadd.f32 %v904_v59, %v9729_v43  ;;  %v919_v39 = vadd.f32 %v918_v60, %v9731_v44 }
  0xfa   : > { %v1081_v1 = vadd.f32 %v1034_v63, %v875_v57  ;;  %v1082_v3 = vadd.f32 %v1048_v0, %v889_v58 }
  0xfc   : > { %v1099_v5 = vmul.f32 %v1091_v61, %v1081_v1  ;;  %v1100_v6 = vmul.f32 %v1092_v62, %v1082_v3 }
  0xfe   : > { %v1117_v7 = vadd.f32 %v1109_v2, %v1099_v5  ;;  %v1118_v8 = vadd.f32 %v1110_v4, %v1100_v6 }
 0x100   : > { %v1125_v15 = vmax.f32 %v1117_v7, 0.0  ;;  %v1126_v16 = vmax.f32 %v1118_v8, 0.0  ;;  %v1062_v17 = vpop.f32.mrf.mxu2  ;;  %v1076_v18 = vpop.f32.mrf.mxu3 }
 0x101   : > { %v1083_v19 = vadd.f32 %v1062_v17, %v903_v9  ;;  %v1084_v21 = vadd.f32 %v1076_v18, %v917_v10  ;;  %v1036_v23 = vpop.f32.mrf.mxu0  ;;  %v1050_v24 = vpop.f32.mrf.mxu1 }
 0x102   : > { %v1142_v25 = vrot.slane %v1125_v15, 7  ;;  %v1143_v26 = vrot.slane %v1126_v16, 7  ;;  %v1085_v27 = vadd.f32 %v1036_v23, %v877_v13  ;;  %v1086_v28 = vadd.f32 %v1050_v24, %v891_v14 }
 0x103   : > { %v1101_v29 = vmul.f32 %v1093_v11, %v1083_v19  ;;  %v1102_v30 = vmul.f32 %v1094_v12, %v1084_v21 }
 0x104   : > { %1166 = vst [vmem:[#allocation4] sm:$0xfe] %v1142_v25  ;;  %v1103_v31 = vmul.f32 %v1091_v61, %v1085_v27  ;;  %v1104_v32 = vmul.f32 %v1092_v62, %v1086_v28  ;;  %v1178_v61 = vld [vmem:[#allocation4] ss:$8 sm:$0xf] }
 0x105   : > { %1167 = vst [vmem:[#allocation4 + $0x8] sm:$0xfe] %v1143_v26  ;;  %v1119_v33 = vadd.f32 %v1111_v20, %v1101_v29  ;;  %v1120_v34 = vadd.f32 %v1112_v22, %v1102_v30 }
 0x106   : > { %v1121_v35 = vadd.f32 %v1109_v2, %v1103_v31  ;;  %v1122_v36 = vadd.f32 %v1110_v4, %v1104_v32 }
 0x107   : > { %v1127_v40 = vmax.f32 %v1119_v33, 0.0  ;;  %v1128_v41 = vmax.f32 %v1120_v34, 0.0 }
 0x108   : > { %v1129_v37 = vmax.f32 %v1121_v35, 0.0  ;;  %v1130_v42 = vmax.f32 %v1122_v36, 0.0  ;;  %v1064_v55 = vpop.f32.mrf.mxu2  ;;  %v1078_v45 = vpop.f32.mrf.mxu3 }
 0x109   : > { %v1144_v46 = vrot.slane %v1127_v40, 7  ;;  %v1145_v47 = vrot.slane %v1128_v41, 7  ;;  %v1087_v50 = vadd.f32 %v1064_v55, %v905_v38  ;;  %v1088_v51 = vadd.f32 %v1078_v45, %v919_v39 }
 0x10a   : > { %v1146_v52 = vrot.slane %v1129_v37, 7  ;;  %v1148_v53 = vrot.slane %v1130_v42, 7 }
 0x10b   : > { %1168 = vst [vmem:[#allocation4 + $0x10] sm:$0xfe] %v1144_v46  ;;  %v1105_v54 = vmul.f32 %v1093_v11, %v1087_v50  ;;  %v1106_v56 = vmul.f32 %v1094_v12, %v1088_v51  ;;  %v6469_v50 = vld [vmem:[#allocation14 + $0x460] sm:$0xf] }
 0x10c   : > { %1169 = vst [vmem:[#allocation4 + $0x18] sm:$0xfe] %v1145_v47  ;;  %v1147_v43 = vsel %vm1141_vm5, %v1142_v25, %v1146_v52  ;;  %v1149_v44 = vsel %vm1141_vm5, %v1143_v26, %v1148_v53 }
 0x10d   : > { %1170 = vst [vmem:[#allocation4 + $0x20] sm:$0xff] %v1147_v43  ;;  %v1123_v57 = vadd.f32 %v1111_v20, %v1105_v54  ;;  %v1124_v58 = vadd.f32 %v1112_v22, %v1106_v56  ;;  %v6327_v54 = vld [vmem:[#allocation14 + $0x350] sm:$0xf0]  ;;  %v6453_v43 = vld [vmem:[#allocation14 + $0x440] sm:$0xf] }
 0x10e   : > { %1174 = vst [vmem:[#allocation4 + $0x40] sm:$0x1] %v1146_v52  ;;  %v8532_v52 = vld [vmem:[#allocation14 + $0x46c] sm:$0xf0] }
 0x10f   : > { %1171 = vst [vmem:[#allocation4 + $0x28] sm:$0xff] %v1149_v44  ;;  %v1131_v59 = vmax.f32 %v1123_v57, 0.0  ;;  %v1132_v60 = vmax.f32 %v1124_v58, 0.0  ;;  %v6470_v56 = vor.u32 %v8532_v52, %v6469_v50  ;;  %v8528_v44 = vld [vmem:[#allocation14 + $0x44c] sm:$0xf0] }
 0x110   : > { %1175 = vst [vmem:[#allocation4 + $0x48] sm:$0x1] %v1148_v53  ;;  %v8494_v53 = vld [vmem:[#allocation14 + $0x344] sm:$0xf]  ;;  %v6454_v58 = vor.u32 %v8528_v44, %v6453_v43  ;;  %v8548_v50 = vld [vmem:[#allocation14 + $0x4ec] sm:$0xf0] }
 0x111   : > { %v1150_v63 = vrot.slane %v1131_v59, 7  ;;  %v1152_v0 = vrot.slane %v1132_v60, 7  ;;  %v6330_v57 = vor.u32 %v8494_v53, %v6327_v54  ;;  %1986 = vmatpush.bf16.msrb.mxu1 %v6470_v56  ;;  %v8490_v59 = vld [vmem:[#allocation14 + $0x324] sm:$0xf]  ;;  %v6311_v60 = vld [vmem:[#allocation14 + $0x330] sm:$0xf0] }
 0x112   : > { %v8496_v53 = vld [vmem:[#allocation14 + $0x34c] sm:$0xf0]  ;;  %v6389_v54 = vld [vmem:[#allocation14 + $0x3c0] sm:$0xf] }
 0x113   : > { %v1180_v62 = vld [vmem:[#allocation4 + $0x1] ss:$8 sm:$0xf]  ;;  %v1187_v2 = vld [vmem:[#allocation4 + $0x2] ss:$8 sm:$0xf]  ;;  %v1151_v12 = vsel %vm1141_vm5, %v1144_v46, %v1150_v63  ;;  %v1153_v15 = vsel %vm1141_vm5, %v1145_v47, %v1152_v0 }
 0x114   : > { %v1181_v1 = vmax.f32 %v1178_v61, %v1180_v62  ;;  %v1189_v3 = vld [vmem:[#allocation4 + $0x3] ss:$8 sm:$0xf]  ;;  %v1183_v4 = vld [vmem:[#allocation4 + $0x2] ss:$8 sm:$0xf]  ;;  %v6314_v61 = vor.u32 %v8490_v59, %v6311_v60 }
 0x115   : > { %v1190_v5 = vmax.f32 %v1187_v2, %v1189_v3  ;;  %v1197_v6 = vld [vmem:[#allocation4 + $0x4] ss:$8 sm:$0xf]  ;;  %v1199_v9 = vld [vmem:[#allocation4 + $0x5] ss:$8 sm:$0xf]  ;;  %1987 = vmatpush.bf16.msrb.mxu1 %v6454_v58 }
 0x116   : > { %v1184_v7 = vmax.f32 %v1181_v1, %v1183_v4  ;;  %v1192_v8 = vld [vmem:[#allocation4 + $0x4] ss:$8 sm:$0xf]  ;;  %v1200_v11 = vmax.f32 %v1197_v6, %v1199_v9  ;;  %v1202_v13 = vld [vmem:[#allocation4 + $0x6] ss:$8 sm:$0xf] }
 0x117   : > { %v1193_v10 = vmax.f32 %v1190_v5, %v1192_v8  ;;  %1172 = vst [vmem:[#allocation4 + $0x30] sm:$0xff] %v1151_v12  ;;  %v1207_v16 = vld [vmem:[#allocation4 + $0x6] ss:$8 sm:$0xf]  ;;  %v8512_v56 = vld [vmem:[#allocation14 + $0x3cc] sm:$0xf0] }
 0x118   : > { %1185 = vst.msk [vmem:[#allocation7] ss:$8 sm:$0xf] %vm9733_vm4, %v1184_v7  ;;  %v1203_v14 = vmax.f32 %v1200_v11, %v1202_v13  ;;  %v1209_v17 = vld [vmem:[#allocation4 + $0x7] ss:$8 sm:$0xf]  ;;  %v6390_v44 = vor.u32 %v8512_v56, %v6389_v54 }
 0x119   : > { %1195 = vst.msk [vmem:[#allocation7 + $0x1] ss:$8 sm:$0xf] %vm9733_vm4, %v1193_v10  ;;  %v1210_v18 = vmax.f32 %v1207_v16, %v1209_v17  ;;  %v8498_v46 = vld [vmem:[#allocation14 + $0x364] sm:$0xf] }
 0x11a   : > { %1205 = vst.msk [vmem:[#allocation7 + $0x2] ss:$8 sm:$0xf] %vm9733_vm4, %v1203_v14  ;;  %v6343_v47 = vld [vmem:[#allocation14 + $0x370] sm:$0xf0] }
 0x11b   : > { %1176 = vst [vmem:[#allocation4 + $0x50] sm:$0x1] %v1150_v63  ;;  %v6346_v51 = vor.u32 %v8498_v46, %v6343_v47  ;;  %v6533_v47 = vld [vmem:[#allocation14 + $0x4e0] sm:$0xf]  ;;  %v6247_v58 = vld [vmem:[#allocation14 + $0x2b0] sm:$0xf0] }
 0x11c   : > { %1173 = vst [vmem:[#allocation4 + $0x38] sm:$0xff] %v1153_v15  ;;  %v6534_v52 = vor.u32 %v8548_v50, %v6533_v47  ;;  %v6517_v60 = vld [vmem:[#allocation14 + $0x4c0] sm:$0xf]  ;;  %v8480_v47 = vld [vmem:[#allocation14 + $0x2cc] sm:$0xf0] }
 0x11d   : > { %1177 = vst [vmem:[#allocation4 + $0x58] sm:$0x1] %v1152_v0  ;;  %2012 = vmatpush.bf16.msrb.mxu3 %v6346_v51  ;;  %v6325_v51 = vld [vmem:[#allocation14 + $0x340] sm:$0xf]  ;;  %v8526_v50 = vld [vmem:[#allocation14 + $0x444] sm:$0xf] }
 0x11e   : > { %v6326_v43 = vor.u32 %v8496_v53, %v6325_v51  ;;  %2003 = vmatpush.bf16.msrb.mxu2 %v6534_v52  ;;  %v6455_v52 = vld [vmem:[#allocation14 + $0x450] sm:$0xf0]  ;;  %v6317_v53 = vld [vmem:[#allocation14 + $0x328] sm:$0xf]  ;;  %v8493_v54 = vld [vmem:[#allocation14 + $0x334] sm:$0xf0] }
 0x121   : > { %2013 = vmatpush.bf16.msrb.mxu3 %v6330_v57  ;;  %v8474_v57 = vld [vmem:[#allocation14 + $0x2a4] sm:$0xf] }
 0x122   : > { %v6250_v59 = vor.u32 %v8474_v57, %v6247_v58  ;;  %v6429_v57 = vld [vmem:[#allocation14 + $0x408] sm:$0xf]  ;;  %v8521_v58 = vld [vmem:[#allocation14 + $0x414] sm:$0xf0] }
 0x123   : > { %v1212_v19 = vld [vmem:[#allocation4 + $0x20] ss:$8 sm:$0xf]  ;;  %v1219_v22 = vld [vmem:[#allocation4 + $0x21] ss:$8 sm:$0xf] }
 0x124   : > { %v1217_v20 = vld [vmem:[#allocation4 + $0x20] ss:$8 sm:$0xf]  ;;  %v1213_v21 = vmax.f32 %v1210_v18, %v1212_v19  ;;  %v1222_v23 = vld [vmem:[#allocation4 + $0x22] ss:$8 sm:$0xf] }
 0x125   : > { %v1220_v24 = vmax.f32 %v1217_v20, %v1219_v22  ;;  %v1227_v25 = vld [vmem:[#allocation4 + $0x22] ss:$8 sm:$0xf]  ;;  %v1229_v26 = vld [vmem:[#allocation4 + $0x23] ss:$8 sm:$0xf]  ;;  %2014 = vmatpush.bf16.msrb.mxu3 %v6314_v61 }
 0x126   : > { %1215 = vst.msk [vmem:[#allocation7 + $0x3] ss:$8 sm:$0xf] %vm9733_vm4, %v1213_v21  ;;  %v1230_v27 = vmax.f32 %v1227_v25, %v1229_v26  ;;  %v1232_v28 = vld [vmem:[#allocation4 + $0x24] ss:$8 sm:$0xf] }
 0x127   : > { %v1223_v29 = vmax.f32 %v1220_v24, %v1222_v23  ;;  %v1237_v30 = vld [vmem:[#allocation4 + $0x24] ss:$8 sm:$0xf]  ;;  %v1239_v31 = vld [vmem:[#allocation4 + $0x25] ss:$8 sm:$0xf] }
 0x128   : > { %v1233_v32 = vmax.f32 %v1230_v27, %v1232_v28  ;;  %v1240_v33 = vmax.f32 %v1237_v30, %v1239_v31  ;;  %v1242_v34 = vld [vmem:[#allocation4 + $0x26] ss:$8 sm:$0xf]  ;;  %v1249_v36 = vld [vmem:[#allocation4 + $0x27] ss:$8 sm:$0xf] }
 0x129   : > { %v1247_v35 = vld [vmem:[#allocation4 + $0x26] ss:$8 sm:$0xf]  ;;  %1225 = vst.msk [vmem:[#allocation7 + $0x4] ss:$8 sm:$0xf] %vm9733_vm4, %v1223_v29 }
 0x12a   : > { %1235 = vst.msk [vmem:[#allocation7 + $0x5] ss:$8 sm:$0xf] %vm9733_vm4, %v1233_v32  ;;  %v1243_v38 = vmax.f32 %v1240_v33, %v1242_v34  ;;  %v1250_v39 = vmax.f32 %v1247_v35, %v1249_v36  ;;  %v1252_v40 = vld [vmem:[#allocation4 + $0x40] ss:$8 sm:$0xf] }
 0x12b   : > { %v6437_v24 = vld [vmem:[#allocation14 + $0x420] sm:$0xf]  ;;  %v8524_v25 = vld [vmem:[#allocation14 + $0x42c] sm:$0xf0]  ;;  %v8486_v27 = vld [vmem:[#allocation14 + $0x304] sm:$0xf] }
 0x12c   : > { %1245 = vst.msk [vmem:[#allocation7 + $0x6] ss:$8 sm:$0xf] %vm9733_vm4, %v1243_v38  ;;  %v1253_v41 = vmax.f32 %v1250_v39, %v1252_v40  ;;  %v6438_v26 = vor.u32 %v8524_v25, %v6437_v24  ;;  %v6295_v28 = vld [vmem:[#allocation14 + $0x310] sm:$0xf0] }
 0x12d   : > { %v6298_v29 = vor.u32 %v8486_v27, %v6295_v28  ;;  %v6421_v30 = vld [vmem:[#allocation14 + $0x400] sm:$0xf]  ;;  %v8520_v31 = vld [vmem:[#allocation14 + $0x40c] sm:$0xf0]  ;;  %v8482_v32 = vld [vmem:[#allocation14 + $0x2e4] sm:$0xf] }
 0x12e   : > { %1255 = vst.msk [vmem:[#allocation7 + $0x7] ss:$8 sm:$0xf] %vm9733_vm4, %v1253_v41  ;;  %1988 = vmatpush.bf16.msrb.mxu1 %v6438_v26  ;;  %v6422_v33 = vor.u32 %v8520_v31, %v6421_v30  ;;  %v6279_v34 = vld [vmem:[#allocation14 + $0x2f0] sm:$0xf0] }
 0x12f   : > { %2015 = vmatpush.bf16.msrb.mxu3 %v6298_v29  ;;  %v6282_v35 = vor.u32 %v8482_v32, %v6279_v34  ;;  %v6341_v36 = vld [vmem:[#allocation14 + $0x360] sm:$0xf]  ;;  %v8500_v38 = vld [vmem:[#allocation14 + $0x36c] sm:$0xf0]  ;;  %v6461_v26 = vld [vmem:[#allocation14 + $0x448] sm:$0xf] }
 0x130   : > { %v6405_v39 = vld [vmem:[#allocation14 + $0x3e0] sm:$0xf]  ;;  %v6342_v40 = vor.u32 %v8500_v38, %v6341_v36  ;;  %v8516_v41 = vld [vmem:[#allocation14 + $0x3ec] sm:$0xf0]  ;;  %v8529_v27 = vld [vmem:[#allocation14 + $0x454] sm:$0xf0] }
 0x131   : > { %v8544_v61 = vld [vmem:[#allocation14 + $0x4cc] sm:$0xf0]  ;;  %v6485_v28 = vld [vmem:[#allocation14 + $0x480] sm:$0xf]  ;;  %v6462_v29 = vor.u32 %v8529_v27, %v6461_v26  ;;  %v6471_v36 = vld [vmem:[#allocation14 + $0x470] sm:$0xf0] }
 0x132   : > { %1989 = vmatpush.bf16.msrb.mxu1 %v6422_v33  ;;  %1973 = vmatpush.bf16.msrb.mxu0 %v6342_v40  ;;  %v8536_v30 = vld [vmem:[#allocation14 + $0x48c] sm:$0xf0]  ;;  %v6277_v31 = vld [vmem:[#allocation14 + $0x2e0] sm:$0xf]  ;;  %v8497_v40 = vld [vmem:[#allocation14 + $0x354] sm:$0xf0] }
 0x133   : > { %2016 = vmatpush.bf16.msrb.mxu3 %v6282_v35  ;;  %v8484_v32 = vld [vmem:[#allocation14 + $0x2ec] sm:$0xf0]  ;;  %v6486_v33 = vor.u32 %v8536_v30, %v6485_v28  ;;  %v8530_v35 = vld [vmem:[#allocation14 + $0x464] sm:$0xf]  ;;  %v6519_v28 = vld [vmem:[#allocation14 + $0x4d0] sm:$0xf0] }
 0x134   : > { %v6278_v34 = vor.u32 %v8484_v32, %v6277_v31  ;;  %v6474_v38 = vor.u32 %v8530_v35, %v6471_v36  ;;  %v8542_v27 = vld [vmem:[#allocation14 + $0x4c4] sm:$0xf]  ;;  %v8481_v32 = vld [vmem:[#allocation14 + $0x2d4] sm:$0xf0] }
 0x135   : > { %v9787_v37 = vld [vmem:[#allocation7 + $0x10] sm:$0xff]  ;;  %v1258_v42 = vld [vmem:[#allocation7 + $0x8] sm:$0xff]  ;;  %v1257_v55 = vld [vmem:[#allocation7] sm:$0xff]  ;;  %v6522_v31 = vor.u32 %v8542_v27, %v6519_v28 }
 0x136   : > { %1320 = vrot.lane.b32.xlu2 %v9787_v37, %s9470_s21  ;;  %1289 = vrot.lane.b32.xlu0 %v1258_v42, %s9471_s20  ;;  %v1260_v45 = vld [vmem:[#allocation7 + $0x18] sm:$0xff]  ;;  %v6541_v27 = vld [vmem:[#allocation14 + $0x4e8] sm:$0xf]  ;;  %v8549_v28 = vld [vmem:[#allocation14 + $0x4f4] sm:$0xf0] }
 0x137   : > { %1262 = vrot.lane.b32.xlu1 %v1257_v55, %s9471_s20  ;;  %1974 = vmatpush.bf16.msrb.mxu0 %v6326_v43  ;;  %v6458_v43 = vor.u32 %v8526_v50, %v6455_v52 }
 0x13e   : > { %1316 = vrot.lane.b32.xlu0 %v9787_v37, %s9471_s20  ;;  %1275 = vrot.lane.b32.xlu2 %v1257_v55, %s9470_s21 }
 0x13f   : > { %1293 = vrot.lane.b32.xlu1 %v1258_v42, %s9470_s21 }
 0x146   : > { %1341 = vrot.lane.b32.xlu0 %v1260_v45, %s9471_s20 }
 0x147   : > { %1345 = vrot.lane.b32.xlu1 %v1260_v45, %s9470_s21 }
 0x190   : > { %v1321_v2 = vpop.permute.xlu2 %1320 }
 0x198   : > { %v1276_v16 = vpop.permute.xlu2 %1275 }
 0x1a8   : > { %v1290_v62 = vpop.permute.xlu0 %1289 }
 0x1a9   : > { %v1263_v63 = vpop.permute.xlu1 %1262  ;;  %v1292_v3 = vmax.f32 %v1257_v55, %v1290_v62  ;;  %v1304_v4 = vmax.f32 %v1258_v42, %v1290_v62  ;;  %v6518_v62 = vor.u32 %v8544_v61, %v6517_v60  ;;  %v6430_v60 = vor.u32 %v8521_v58, %v6429_v57  ;;  %v8476_v61 = vld [vmem:[#allocation14 + $0x2ac] sm:$0xf0] }
 0x1aa   : > { %v1265_v0 = vmax.f32 %v1257_v55, %v1263_v63  ;;  %v6263_v55 = vld [vmem:[#allocation14 + $0x2d0] sm:$0xf0]  ;;  %v6309_v63 = vld [vmem:[#allocation14 + $0x320] sm:$0xf] }
 0x1ab   : > { %2004 = vmatpush.bf16.msrb.mxu2 %v6518_v62  ;;  %v8522_v62 = vld [vmem:[#allocation14 + $0x424] sm:$0xf] }
 0x1ac   : > { %v1267_v1 = vrot.slane %v1265_v0, 7  ;;  %v1278_v17 = vmax.f32 %v1265_v0, %v1276_v16  ;;  %v8492_v0 = vld [vmem:[#allocation14 + $0x32c] sm:$0xf0] }
 0x1ad   : > { %v8488_v16 = vld [vmem:[#allocation14 + $0x30c] sm:$0xf0] }
 0x1ae   : > { %1268 = vrot.lane.b32.xlu0 %v1267_v1, %s9472_s4  ;;  %v1280_v22 = vrot.slane %v1278_v17, 7  ;;  %v6373_v1 = vld [vmem:[#allocation14 + $0x3a0] sm:$0xf] }
 0x1af   : > { %v6357_v17 = vld [vmem:[#allocation14 + $0x380] sm:$0xf] }
 0x1b0   : > { %v1317_v5 = vpop.permute.xlu0 %1316 }
 0x1b1   : > { %v1319_v6 = vmax.f32 %v1258_v42, %v1317_v5  ;;  %v1331_v7 = vmax.f32 %v9787_v37, %v1317_v5  ;;  %v1294_v8 = vpop.permute.xlu1 %1293  ;;  %v8478_v42 = vld [vmem:[#allocation14 + $0x2c4] sm:$0xf]  ;;  %v6231_v5 = vld [vmem:[#allocation14 + $0x290] sm:$0xf0] }
 0x1b2   : > { %v9800_v9 = vmax.f32 %v1292_v3, %v1294_v8  ;;  %v1305_v10 = vmax.f32 %v1304_v4, %v1294_v8  ;;  %v6266_v46 = vor.u32 %v8478_v42, %v6263_v55  ;;  %v8508_v3 = vld [vmem:[#allocation14 + $0x3ac] sm:$0xf0]  ;;  %v8470_v4 = vld [vmem:[#allocation14 + $0x284] sm:$0xf]  ;;  %v6477_v8 = vld [vmem:[#allocation14 + $0x468] sm:$0xf] }
 0x1b3   : > { %v1323_v11 = vmax.f32 %v1319_v6, %v1321_v2  ;;  %v1332_v12 = vmax.f32 %v1331_v7, %v1321_v2  ;;  %v6310_v2 = vor.u32 %v8492_v0, %v6309_v63  ;;  %v6374_v6 = vor.u32 %v8508_v3, %v6373_v1  ;;  %v6445_v42 = vld [vmem:[#allocation14 + $0x428] sm:$0xf]  ;;  %v8525_v55 = vld [vmem:[#allocation14 + $0x434] sm:$0xf0]  ;;  %v6439_v0 = vld [vmem:[#allocation14 + $0x430] sm:$0xf0] }
 0x1b4   : > { %v1307_v13 = vrot.slane %v1305_v10, 7  ;;  %2017 = vmatpush.bf16.msrb.mxu3 %v6266_v46  ;;  %v6234_v7 = vor.u32 %v8470_v4, %v6231_v5  ;;  %v8533_v10 = vld [vmem:[#allocation14 + $0x474] sm:$0xf0]  ;;  %v6261_v46 = vld [vmem:[#allocation14 + $0x2c0] sm:$0xf]  ;;  %v6442_v1 = vor.u32 %v8522_v62, %v6439_v0 }
 0x1b5   : > { %v1325_v14 = vrot.slane %v1323_v11, 7  ;;  %v1334_v15 = vrot.slane %v1332_v12, 7  ;;  %1975 = vmatpush.bf16.msrb.mxu0 %v6310_v2  ;;  %v6478_v11 = vor.u32 %v8533_v10, %v6477_v8  ;;  %v6501_v12 = vld [vmem:[#allocation14 + $0x4a0] sm:$0xf]  ;;  %v6262_v51 = vor.u32 %v8480_v47, %v6261_v46  ;;  %v6301_v2 = vld [vmem:[#allocation14 + $0x308] sm:$0xf] }
 0x1b6   : > { %1308 = vrot.lane.b32.xlu2 %v1307_v13, %s9471_s20  ;;  %v8540_v13 = vld [vmem:[#allocation14 + $0x4ac] sm:$0xf0]  ;;  %v8489_v3 = vld [vmem:[#allocation14 + $0x314] sm:$0xf0]  ;;  %v6413_v5 = vld [vmem:[#allocation14 + $0x3e8] sm:$0xf] }
 0x1b7   : > { %1326 = vrot.lane.b32.xlu1 %v1325_v14, %s9470_s21  ;;  %1335 = vrot.lane.b32.xlu0 %v1334_v15, %s9472_s4  ;;  %v6502_v14 = vor.u32 %v8540_v13, %v6501_v12  ;;  %v6293_v15 = vld [vmem:[#allocation14 + $0x300] sm:$0xf]  ;;  %v6302_v4 = vor.u32 %v8489_v3, %v6301_v2  ;;  %v8472_v10 = vld [vmem:[#allocation14 + $0x28c] sm:$0xf0]  ;;  %v6423_v13 = vld [vmem:[#allocation14 + $0x410] sm:$0xf0] }
 0x1b8   : > { %v9804_v18 = vpop.permute.xlu0 %1341  ;;  %2018 = vmatpush.bf16.msrb.mxu3 %v6250_v59  ;;  %v6245_v59 = vld [vmem:[#allocation14 + $0x2a0] sm:$0xf]  ;;  %v8505_v46 = vld [vmem:[#allocation14 + $0x394] sm:$0xf0] }
 0x1b9   : > { %v1354_v19 = vmax.f32 %v1260_v45, %v9804_v18  ;;  %v9807_v20 = vpop.permute.xlu1 %1345  ;;  %v6406_v45 = vor.u32 %v8516_v41, %v6405_v39  ;;  %2005 = vmatpush.bf16.msrb.mxu2 %v6502_v14  ;;  %v6333_v39 = vld [vmem:[#allocation14 + $0x348] sm:$0xf]  ;;  %v6246_v63 = vor.u32 %v8476_v61, %v6245_v59  ;;  %v6229_v8 = vld [vmem:[#allocation14 + $0x280] sm:$0xf]  ;;  %v8546_v14 = vld [vmem:[#allocation14 + $0x4e4] sm:$0xf]  ;;  %v1344_v57 = vmax.f32 %v9787_v37, %v9804_v18 }
 0x1ba   : > { %v6334_v41 = vor.u32 %v8497_v40, %v6333_v39  ;;  %v6230_v12 = vor.u32 %v8472_v10, %v6229_v8  ;;  %v6391_v39 = vld [vmem:[#allocation14 + $0x3d0] sm:$0xf0]  ;;  %v8538_v40 = vld [vmem:[#allocation14 + $0x4a4] sm:$0xf]  ;;  %v6237_v61 = vld [vmem:[#allocation14 + $0x288] sm:$0xf] }
 0x1bb   : > { %v1355_v21 = vmax.f32 %v1354_v19, %v9807_v20  ;;  %1990 = vmatpush.bf16.msrb.mxu1 %v6406_v45  ;;  %v6294_v19 = vor.u32 %v8488_v16, %v6293_v15  ;;  %v6446_v45 = vor.u32 %v8525_v55, %v6445_v42  ;;  %v6535_v15 = vld [vmem:[#allocation14 + $0x4f0] sm:$0xf0]  ;;  %v6253_v42 = vld [vmem:[#allocation14 + $0x2a8] sm:$0xf]  ;;  %v8477_v55 = vld [vmem:[#allocation14 + $0x2b4] sm:$0xf0]  ;;  %v1348_v0 = vmax.f32 %v1344_v57, %v9807_v20 }
 0x1bc   : > { %2019 = vmatpush.bf16.msrb.mxu3 %v6234_v7  ;;  %v6487_v59 = vld [vmem:[#allocation14 + $0x490] sm:$0xf0]  ;;  %v8473_v62 = vld [vmem:[#allocation14 + $0x294] sm:$0xf0] }
 0x1bd   : > { %v1357_v23 = vrot.slane %v1355_v21, 7  ;;  %v8504_v21 = vld [vmem:[#allocation14 + $0x38c] sm:$0xf0]  ;;  %1976 = vmatpush.bf16.msrb.mxu0 %v6294_v19  ;;  %2006 = vmatpush.bf16.msrb.mxu2 %v6486_v33  ;;  %v6285_v19 = vld [vmem:[#allocation14 + $0x2e8] sm:$0xf] }
 0x1be   : > { %1281 = vrot.lane.b32.xlu2 %v1280_v22, %s9472_s4  ;;  %v6349_v22 = vld [vmem:[#allocation14 + $0x368] sm:$0xf]  ;;  %v6358_v24 = vor.u32 %v8504_v21, %v6357_v17  ;;  %v6538_v17 = vor.u32 %v8546_v14, %v6535_v15  ;;  %v8485_v21 = vld [vmem:[#allocation14 + $0x2f4] sm:$0xf0]  ;;  %v6359_v37 = vld [vmem:[#allocation14 + $0x390] sm:$0xf0] }
 0x1bf   : > { %1358 = vrot.lane.b32.xlu1 %v1357_v23, %s9471_s20  ;;  %1991 = vmatpush.bf16.msrb.mxu1 %v6390_v44  ;;  %v8501_v23 = vld [vmem:[#allocation14 + $0x374] sm:$0xf0]  ;;  %v6318_v44 = vor.u32 %v8493_v54, %v6317_v53  ;;  %v6381_v33 = vld [vmem:[#allocation14 + $0x3a8] sm:$0xf]  ;;  %v1298_v54 = vrot.slane %v9800_v9, 7  ;;  %s556_s20 = sand.u32 1, %s9447_s22  }
 0x1c0   : > { %2064 = vmatpush.bf16.msra.mxu3 %v6478_v11  ;;  %v6350_v25 = vor.u32 %v8501_v23, %v6349_v22  ;;  %v8518_v11 = vld [vmem:[#allocation14 + $0x404] sm:$0xf]  ;;  %v6286_v22 = vor.u32 %v8485_v21, %v6285_v19  ;;  %v8513_v23 = vld [vmem:[#allocation14 + $0x3d4] sm:$0xf0]  ;;  %s557_s28 = scalar_lea.vmem [#allocation25], %s556_s20  ;;  %s5877_s19 = scalar_lea.sflag [#allocation10], %s556_s20 }
 0x1c1   : > { %1977 = vmatpush.bf16.msrb.mxu0 %v6278_v34  ;;  %2025 = vmatpush.bf16.msra.mxu2 %v6474_v38  ;;  %v6426_v16 = vor.u32 %v8518_v11, %v6423_v13  ;;  %v6398_v26 = vor.u32 %v8513_v23, %v6397_v49  ;;  %v8509_v34 = vld [vmem:[#allocation14 + $0x3b4] sm:$0xf0]  ;;  %v8510_v38 = vld [vmem:[#allocation14 + $0x3c4] sm:$0xf]  ;;  %v6665_v23 = vld [vmem:[#allocation14 + $0xe0] sm:$0xf] }
 0x1c2   : > { %v6382_v36 = vor.u32 %v8509_v34, %v6381_v33  ;;  %v6394_v47 = vor.u32 %v8510_v38, %v6391_v39  ;;  %v8534_v9 = vld [vmem:[#allocation14 + $0x484] sm:$0xf]  ;;  %v6542_v38 = vor.u32 %v8549_v28, %v6541_v27  ;;  %v6649_v39 = vld [vmem:[#allocation14 + $0xc0] sm:$0xf]  ;;  %v8404_v28 = vld [vmem:[#allocation14 + $0x6c] sm:$0xf0] }
 0x1c3   : > { %1992 = vmatpush.bf16.msrb.mxu1 %v6374_v6  ;;  %v8517_v6 = vld [vmem:[#allocation14 + $0x3f4] sm:$0xf0]  ;;  %s5887_s6 = sshll.u32 %s557_s28, 4  ;;  %s5888_s6 = int_to_ptr.vmem [resolvable:$true] %s5887_s6 }
 0x1c4   : > { %2065 = vmatpush.bf16.msra.mxu3 %v6462_v29  ;;  %v6414_v7 = vor.u32 %v8517_v6, %v6413_v5  ;;  %v6269_v29 = vld [vmem:[#allocation14 + $0x2c8] sm:$0xf] }
 0x1c5   : > { %1978 = vmatpush.bf16.msrb.mxu0 %v6262_v51  ;;  %2026 = vmatpush.bf16.msra.mxu2 %v6458_v43  ;;  %v6270_v35 = vor.u32 %v8481_v32, %v6269_v29  ;;  %v6254_v51 = vor.u32 %v8477_v55, %v6253_v42  ;;  %v8506_v43 = vld [vmem:[#allocation14 + $0x3a4] sm:$0xf]  ;;  %v8420_v29 = vld [vmem:[#allocation14 + $0xec] sm:$0xf0] }
 0x1c6   : > { %v6666_v55 = vor.u32 %v8420_v29, %v6665_v23  ;;  %v8531_v23 = vld [vmem:[#allocation14 + $0x46c] sm:$0xf]  ;;  %v6793_v29 = vld [vmem:[#allocation14 + $0x1e0] sm:$0xf] }
 0x1c7   : > { %1993 = vmatpush.bf16.msrb.mxu1 %v6358_v24  ;;  %v8514_v24 = vld [vmem:[#allocation14 + $0x3e4] sm:$0xf] }
 0x1c8   : > { %2066 = vmatpush.bf16.msra.mxu3 %v6446_v45  ;;  %v6365_v45 = vld [vmem:[#allocation14 + $0x388] sm:$0xf] }
 0x1c9   : > { %1979 = vmatpush.bf16.msrb.mxu0 %v6246_v63  ;;  %2027 = vmatpush.bf16.msra.mxu2 %v6442_v1  ;;  %v6366_v52 = vor.u32 %v8505_v46, %v6365_v45  ;;  %v6238_v63 = vor.u32 %v8473_v62, %v6237_v61  ;;  %v8502_v1 = vld [vmem:[#allocation14 + $0x384] sm:$0xf]  ;;  %v8416_v46 = vld [vmem:[#allocation14 + $0xcc] sm:$0xf0]  ;;  %v8541_v61 = vld [vmem:[#allocation14 + $0x4b4] sm:$0xf0] }
 0x1ca   : > { %v6362_v3 = vor.u32 %v8502_v1, %v6359_v37  ;;  %v8495_v1 = vld [vmem:[#allocation14 + $0x34c] sm:$0xf]  ;;  %v6335_v37 = vld [vmem:[#allocation14 + $0x358] sm:$0xf0] }
 0x1cb   : > { %2051 = vmatpush.bf16.msra.mxu1 %v6350_v25  ;;  %v6407_v25 = vld [vmem:[#allocation14 + $0x3f0] sm:$0xf0] }
 0x1cc   : > { %2067 = vmatpush.bf16.msra.mxu3 %v6430_v60  ;;  %v6410_v30 = vor.u32 %v8514_v24, %v6407_v25  ;;  %v6490_v60 = vor.u32 %v8534_v9, %v6487_v59  ;;  %v6633_v59 = vld [vmem:[#allocation14 + $0xa0] sm:$0xf] }
 0x1cd   : > { %1980 = vmatpush.bf16.msrb.mxu0 %v6230_v12  ;;  %2028 = vmatpush.bf16.msra.mxu2 %v6426_v16 }
 0x1cf   : > { %2052 = vmatpush.bf16.msra.mxu1 %v6334_v41  ;;  %v6503_v41 = vld [vmem:[#allocation14 + $0x4b0] sm:$0xf0] }
 0x1d0   : > { %2068 = vmatpush.bf16.msra.mxu3 %v6414_v7  ;;  %v6506_v50 = vor.u32 %v8538_v40, %v6503_v41 }
 0x1d1   : > { %2042 = vmatpush.bf16.msra.mxu0 %v6538_v17  ;;  %2029 = vmatpush.bf16.msra.mxu2 %v6410_v30  ;;  %v8547_v30 = vld [vmem:[#allocation14 + $0x4ec] sm:$0xf] }
 0x1d3   : > { %2053 = vmatpush.bf16.msra.mxu1 %v6318_v44  ;;  %v6375_v44 = vld [vmem:[#allocation14 + $0x3b0] sm:$0xf0] }
 0x1d4   : > { %2069 = vmatpush.bf16.msra.mxu3 %v6398_v26  ;;  %v6378_v58 = vor.u32 %v8506_v43, %v6375_v44 }
 0x1d5   : > { %2043 = vmatpush.bf16.msra.mxu0 %v6522_v31  ;;  %2030 = vmatpush.bf16.msra.mxu2 %v6394_v47  ;;  %v6543_v31 = vld [vmem:[#allocation14 + $0x4f8] sm:$0xf0]  ;;  %v6525_v47 = vld [vmem:[#allocation14 + $0x4c8] sm:$0xf] }
 0x1d6   : > { %v6546_v45 = vor.u32 %v8547_v30, %v6543_v31  ;;  %v8452_v30 = vld [vmem:[#allocation14 + $0x1ec] sm:$0xf0]  ;;  %v8487_v31 = vld [vmem:[#allocation14 + $0x30c] sm:$0xf] }
 0x1d7   : > { %2054 = vmatpush.bf16.msra.mxu1 %v6302_v4  ;;  %v1350_v4 = vrot.slane %v1348_v0, 7  ;;  %v8412_v0 = vld [vmem:[#allocation14 + $0xac] sm:$0xf0] }
 0x1d8   : > { %2070 = vmatpush.bf16.msra.mxu3 %v6382_v36 }
 0x1d9   : > { %2044 = vmatpush.bf16.msra.mxu0 %v6506_v50  ;;  %2031 = vmatpush.bf16.msra.mxu2 %v6378_v58  ;;  %v8545_v50 = vld [vmem:[#allocation14 + $0x4d4] sm:$0xf0]  ;;  %v6650_v58 = vor.u32 %v8416_v46, %v6649_v39  ;;  %v6585_v39 = vld [vmem:[#allocation14 + $0x40] sm:$0xf] }
 0x1da   : > { %v6526_v57 = vor.u32 %v8545_v50, %v6525_v47  ;;  %v6777_v46 = vld [vmem:[#allocation14 + $0x1c0] sm:$0xf]  ;;  %v8448_v47 = vld [vmem:[#allocation14 + $0x1cc] sm:$0xf0]  ;;  %v8483_v50 = vld [vmem:[#allocation14 + $0x2ec] sm:$0xf] }
 0x1db   : > { %2055 = vmatpush.bf16.msra.mxu1 %v6286_v22 }
 0x1dc   : > { %2071 = vmatpush.bf16.msra.mxu3 %v6366_v52  ;;  %v8499_v52 = vld [vmem:[#allocation14 + $0x36c] sm:$0xf] }
 0x1dd   : > { %2045 = vmatpush.bf16.msra.mxu0 %v6490_v60  ;;  %2032 = vmatpush.bf16.msra.mxu2 %v6362_v3  ;;  %v6509_v60 = vld [vmem:[#allocation14 + $0x4a8] sm:$0xf] }
 0x1de   : > { %v6510_v3 = vor.u32 %v8541_v61, %v6509_v60  ;;  %v8479_v60 = vld [vmem:[#allocation14 + $0x2cc] sm:$0xf]  ;;  %v6271_v61 = vld [vmem:[#allocation14 + $0x2d8] sm:$0xf0] }
 0x1df   : > { %2056 = vmatpush.bf16.msra.mxu1 %v6270_v35 }
 0x1e3   : > { %2057 = vmatpush.bf16.msra.mxu1 %v6254_v51 }
 0x1e7   : > { %2058 = vmatpush.bf16.msra.mxu1 %v6238_v63 }
 0x210   : > { %v1309_v56 = vpop.permute.xlu2 %1308 }
 0x211   : > { %1312 = vst.msk [vmem:[#allocation2 + $0x8] sm:$0xfe] %vm1311_vm6, %v1309_v56 }
 0x212   : > { %1314 = vst.msk [vmem:[#allocation2 + $0x20] sm:$0x1] %vm1313_vm7, %v1309_v56 }
 0x218   : > { %v1282_v56 = vpop.permute.xlu2 %1281 }
 0x220   : > { %v1269_v53 = vpop.permute.xlu0 %1268 }
 0x221   : > { %1272 = vst.msk [vmem:[#allocation2] sm:$0xfe] %vm1271_vm10, %v1269_v53 }
 0x222   : > { %1274 = vst.msk [vmem:[#allocation2 + $0x18] sm:$0x1] %vm1273_vm11, %v1269_v53  ;;  %v6351_v53 = vld [vmem:[#allocation14 + $0x378] sm:$0xf0] }
 0x223   : > { %1285 = vst.msk [vmem:[#allocation2] sm:$0xfe] %vm1284_vm12, %v1282_v56  ;;  %v6354_v9 = vor.u32 %v8499_v52, %v6351_v53 }
 0x224   : > { %1287 = vst.msk [vmem:[#allocation2 + $0x18] sm:$0x1] %vm1286_vm13, %v1282_v56  ;;  %v6527_v56 = vld [vmem:[#allocation14 + $0x4d8] sm:$0xf0] }
 0x225   : > { %1301 = vst.msk [vmem:[#allocation2] sm:$0xfe] %vm1300_vm14, %v1298_v54 }
 0x226   : > { %1303 = vst.msk [vmem:[#allocation2 + $0x18] sm:$0x1] %vm1302_vm15, %v1298_v54  ;;  %v8543_v54 = vld [vmem:[#allocation14 + $0x4cc] sm:$0xf] }
 0x227   : > { %v6530_v63 = vor.u32 %v8543_v54, %v6527_v56  ;;  %v6778_v54 = vor.u32 %v8448_v47, %v6777_v46  ;;  %v8523_v56 = vld [vmem:[#allocation14 + $0x42c] sm:$0xf]  ;;  %v8458_v47 = vld [vmem:[#allocation14 + $0x224] sm:$0xf] }
 0x229   : > { %v1336_v18 = vpop.permute.xlu0 %1335  ;;  %v1327_v2 = vpop.permute.xlu1 %1326 }
 0x22a   : > { %1329 = vst.msk [vmem:[#allocation2 + $0x8] sm:$0xfe] %vm1271_vm10, %v1327_v2 }
 0x22b   : > { %1330 = vst.msk [vmem:[#allocation2 + $0x20] sm:$0x1] %vm1273_vm11, %v1327_v2  ;;  %v6511_v2 = vld [vmem:[#allocation14 + $0x4b8] sm:$0xf0] }
 0x22c   : > { %1338 = vst.msk [vmem:[#allocation2 + $0x8] sm:$0xfe] %vm1284_vm12, %v1336_v18  ;;  %v1363_v5 = vld [vmem:[#allocation2] sm:$0xff] }
 0x22d   : > { %1339 = vst.msk [vmem:[#allocation2 + $0x20] sm:$0x1] %vm1286_vm13, %v1336_v18  ;;  %v1366_v7 = vld [vmem:[#allocation2 + $0x18] sm:$0x3]  ;;  %v8539_v18 = vld [vmem:[#allocation14 + $0x4ac] sm:$0xf] }
 0x22e   : > { %1352 = vst.msk [vmem:[#allocation2 + $0x8] sm:$0xfe] %vm1300_vm14, %v1350_v4 }
 0x22f   : > { %1353 = vst.msk [vmem:[#allocation2 + $0x20] sm:$0x1] %vm1302_vm15, %v1350_v4  ;;  %v6634_v4 = vor.u32 %v8412_v0, %v6633_v59  ;;  %v8444_v59 = vld [vmem:[#allocation14 + $0x1ac] sm:$0xf0]  ;;  %v8519_v0 = vld [vmem:[#allocation14 + $0x40c] sm:$0xf] }
 0x231   : > { %v1359_v20 = vpop.permute.xlu1 %1358 }
 0x232   : > { %1361 = vst.msk [vmem:[#allocation2 + $0x10] sm:$0xfe] %vm1311_vm6, %v1359_v20 }
 0x233   : > { %1362 = vst.msk [vmem:[#allocation2 + $0x28] sm:$0x1] %vm1313_vm7, %v1359_v20  ;;  %v6338_v20 = vor.u32 %v8495_v1, %v6335_v37 }
 0x235   : > { %v1364_v6 = vld [vmem:[#allocation2 + $0x8] sm:$0xff] }
 0x236   : > { %v1367_v8 = vld [vmem:[#allocation2 + $0x20] sm:$0x3]  ;;  %v1369_v10 = vpack.c.bf16 %v1364_v6, %v1363_v5  ;;  %v6493_v6 = vld [vmem:[#allocation14 + $0x488] sm:$0xf] }
 0x237   : > { %v1371_v11 = vpack.c.bf16 %v1367_v8, %v1366_v7  ;;  %v6617_v5 = vld [vmem:[#allocation14 + $0x80] sm:$0xf]  ;;  %v8537_v7 = vld [vmem:[#allocation14 + $0x494] sm:$0xf0]  ;;  %v6514_v8 = vor.u32 %v8539_v18, %v6511_v2  ;;  %v6431_v18 = vld [vmem:[#allocation14 + $0x418] sm:$0xf0] }
 0x238   : > { %v9834_v12 = vunpack.c.l.b16 %v1369_v10  ;;  %v9836_v13 = vunpack.c.h.b16 %v1369_v10  ;;  %v8408_v10 = vld [vmem:[#allocation14 + $0x8c] sm:$0xf0]  ;;  %v6553_v2 = vld [vmem:[#allocation14] sm:$0xf] }
 0x239   : > { %v1541_v14 = vunpack.c.l.b16 %v1371_v11  ;;  %v1542_v15 = vunpack.c.h.b16 %v1371_v11  ;;  %v1365_v16 = vld [vmem:[#allocation2 + $0x10] sm:$0xff]  ;;  %v8491_v11 = vld [vmem:[#allocation14 + $0x32c] sm:$0xf] }
 0x23a   : > { %v1368_v17 = vld [vmem:[#allocation2 + $0x28] sm:$0x3]  ;;  %v1370_v19 = vpack.c.bf16 %v1365_v16, %v1365_v16  ;;  %v6495_v16 = vld [vmem:[#allocation14 + $0x498] sm:$0xf0] }
 0x23b   : > { %v9839_v21 = vpack.c.b16 %v1541_v14, %v9834_v12  ;;  %v9842_v49 = vpack.c.b16 %v1542_v15, %v9836_v13  ;;  %v1372_v22 = vpack.c.bf16 %v1368_v17, %v1368_v17  ;;  %v6319_v14 = vld [vmem:[#allocation14 + $0x338] sm:$0xf0]  ;;  %v8535_v15 = vld [vmem:[#allocation14 + $0x48c] sm:$0xf]  ;;  %v6494_v17 = vor.u32 %v8537_v7, %v6493_v6  ;;  %v8466_v6 = vld [vmem:[#allocation14 + $0x264] sm:$0xf] }
 0x23c   : > { %v9844_v24 = vunpack.c.l.b16 %v1370_v19  ;;  %v6618_v19 = vor.u32 %v8408_v10, %v6617_v5  ;;  %v6498_v27 = vor.u32 %v8535_v15, %v6495_v16  ;;  %v8440_v5 = vld [vmem:[#allocation14 + $0x18c] sm:$0xf0]  ;;  %v6859_v7 = vld [vmem:[#allocation14 + $0x270] sm:$0xf0]  ;;  %v6255_v10 = vld [vmem:[#allocation14 + $0x2b8] sm:$0xf0] }
 0x23d   : > { %v1550_v25 = vshll.u32 %v9839_v21, 16  ;;  %v1557_v26 = vshll.u32 %v9842_v49, 16  ;;  %v1543_v32 = vunpack.c.l.b16 %v1372_v22  ;;  %v1548_v33 = vshrl.u32 %v9839_v21, 16  ;;  %v8515_v16 = vld [vmem:[#allocation14 + $0x3ec] sm:$0xf] }
 0x23e   : > { %v1555_v35 = vshrl.u32 %v9842_v49, 16  ;;  %v6322_v22 = vor.u32 %v8491_v11, %v6319_v14  ;;  %v6434_v11 = vor.u32 %v8519_v0, %v6431_v18  ;;  %v8460_v0 = vld [vmem:[#allocation14 + $0x22c] sm:$0xf0]  ;;  %v6367_v18 = vld [vmem:[#allocation14 + $0x398] sm:$0xf0] }
 0x23f   : > { %v1552_v34 = vrot.slane %v1550_v25, 1  ;;  %v1559_v36 = vrot.slane %v1557_v26, 1  ;;  %v9851_v40 = vpack.c.b16 %v1543_v32, %v9844_v24  ;;  %v6479_v25 = vld [vmem:[#allocation14 + $0x478] sm:$0xf0]  ;;  %v6601_v26 = vld [vmem:[#allocation14 + $0x60] sm:$0xf] }
 0x240   : > { %v6303_v32 = vld [vmem:[#allocation14 + $0x318] sm:$0xf0] }
 0x241   : > { %v9853_v41 = vor.u32 %v1552_v34, %v1548_v33  ;;  %v9855_v42 = vor.u32 %v1559_v36, %v1555_v35  ;;  %v1564_v51 = vshll.u32 %v9851_v40, 16  ;;  %v1562_v43 = vshrl.u32 %v9851_v40, 16  ;;  %v8527_v36 = vld [vmem:[#allocation14 + $0x44c] sm:$0xf] }
 0x242   : > { %v6482_v33 = vor.u32 %v8531_v23, %v6479_v25  ;;  %v6602_v34 = vor.u32 %v8404_v28, %v6601_v26  ;;  %v6794_v35 = vor.u32 %v8452_v30, %v6793_v29  ;;  %v6729_v23 = vld [vmem:[#allocation14 + $0x160] sm:$0xf]  ;;  %v8436_v25 = vld [vmem:[#allocation14 + $0x16c] sm:$0xf0]  ;;  %v8462_v26 = vld [vmem:[#allocation14 + $0x244] sm:$0xf] }
 0x243   : > { %1981 = vmatmul.bf16.vlgmr.msrb.gmra.mxu0 %v9853_v41  ;;  %1994 = vmatmul.bf16.vlgmr.msrb.gmra.mxu1 %v9855_v42  ;;  %v1566_v44 = vrot.slane %v1564_v51, 1  ;;  %v6287_v51 = vld [vmem:[#allocation14 + $0x2f8] sm:$0xf0]  ;;  %v8471_v28 = vld [vmem:[#allocation14 + $0x28c] sm:$0xf] }
 0x244   : > { %2020 = vmatmul.bf16.vlgmr.msrb.gmra.mxu3 %v9853_v41  ;;  %2081 = vmatpush.bf16.msrb.mxu0 %v6542_v38  ;;  %v6463_v38 = vld [vmem:[#allocation14 + $0x458] sm:$0xf0] }
 0x245   : > { %2537 = vmatpush.bf16.msrb.mxu3 %v6666_v55  ;;  %2120 = vmatpush.bf16.msrb.mxu1 %v6546_v45  ;;  %v9862_v62 = vor.u32 %v1566_v44, %v1562_v43  ;;  %v6306_v55 = vor.u32 %v8487_v31, %v6303_v32  ;;  %v8400_v45 = vld [vmem:[#allocation14 + $0x4c] sm:$0xf0]  ;;  %v6466_v52 = vor.u32 %v8527_v36, %v6463_v38  ;;  %v6447_v43 = vld [vmem:[#allocation14 + $0x438] sm:$0xf0]  ;;  %v6569_v44 = vld [vmem:[#allocation14 + $0x20] sm:$0xf] }
 0x246   : > { %v6586_v53 = vor.u32 %v8400_v45, %v6585_v39  ;;  %v6239_v29 = vld [vmem:[#allocation14 + $0x298] sm:$0xf0]  ;;  %v6857_v31 = vld [vmem:[#allocation14 + $0x260] sm:$0xf]  ;;  %v8468_v32 = vld [vmem:[#allocation14 + $0x26c] sm:$0xf0]  ;;  %v9873_v36 = vpack.c.b16 %v9834_v12, %v9834_v12 }
 0x247   : > { %6547 = vmatmul.msk.bf16.vlgmr.msrb.gmra.mxu2 %vm566_vm8, %v9862_v62  ;;  %v6242_v39 = vor.u32 %v8471_v28, %v6239_v29  ;;  %v8432_v45 = vld [vmem:[#allocation14 + $0x14c] sm:$0xf0]  ;;  %v6858_v46 = vor.u32 %v8468_v32, %v6857_v31  ;;  %v6651_v29 = vld [vmem:[#allocation14 + $0xd0] sm:$0xf0]  ;;  %v8417_v31 = vld [vmem:[#allocation14 + $0xd4] sm:$0xf0] }
 0x248   : > { %2082 = vmatpush.bf16.msrb.mxu0 %v6526_v57  ;;  %2090 = vmatpush.bf16.msrb.mxu2 %v6354_v9  ;;  %v6290_v57 = vor.u32 %v8483_v50, %v6287_v51  ;;  %v6761_v9 = vld [vmem:[#allocation14 + $0x1a0] sm:$0xf]  ;;  %v6827_v50 = vld [vmem:[#allocation14 + $0x230] sm:$0xf0]  ;;  %v8464_v12 = vld [vmem:[#allocation14 + $0x24c] sm:$0xf0] }
 0x249   : > { %2538 = vmatpush.bf16.msrb.mxu3 %v6650_v58  ;;  %2121 = vmatpush.bf16.msrb.mxu1 %v6530_v63  ;;  %v8396_v58 = vld [vmem:[#allocation14 + $0x2c] sm:$0xf0]  ;;  %v6450_v63 = vor.u32 %v8523_v56, %v6447_v43  ;;  %v6762_v37 = vor.u32 %v8444_v59, %v6761_v9  ;;  %v6383_v56 = vld [vmem:[#allocation14 + $0x3b8] sm:$0xf0]  ;;  %v6830_v43 = vor.u32 %v8458_v47, %v6827_v50  ;;  %v6811_v9 = vld [vmem:[#allocation14 + $0x210] sm:$0xf0] }
 0x24a   : > { %v6570_v1 = vor.u32 %v8396_v58, %v6569_v44  ;;  %v6697_v44 = vld [vmem:[#allocation14 + $0x120] sm:$0xf]  ;;  %v8454_v58 = vld [vmem:[#allocation14 + $0x204] sm:$0xf]  ;;  %v6801_v59 = vld [vmem:[#allocation14 + $0x1e8] sm:$0xf]  ;;  %v9887_v47 = vpack.c.b16 %v9844_v24, %v9844_v24 }
 0x24b   : > { %v6769_v32 = vld [vmem:[#allocation14 + $0x1a8] sm:$0xf] }
 0x24c   : > { %2083 = vmatpush.bf16.msrb.mxu0 %v6510_v3  ;;  %2091 = vmatpush.bf16.msrb.mxu2 %v6338_v20  ;;  %v8392_v3 = vld [vmem:[#allocation14 + $0xc] sm:$0xf0]  ;;  %v6745_v20 = vld [vmem:[#allocation14 + $0x180] sm:$0xf] }
 0x24d   : > { %2539 = vmatpush.bf16.msrb.mxu3 %v6634_v4  ;;  %2122 = vmatpush.bf16.msrb.mxu1 %v6514_v8  ;;  %v6274_v4 = vor.u32 %v8479_v60, %v6271_v61  ;;  %v8475_v8 = vld [vmem:[#allocation14 + $0x2ac] sm:$0xf]  ;;  %v6554_v14 = vor.u32 %v8392_v3, %v6553_v2  ;;  %v6746_v15 = vor.u32 %v8440_v5, %v6745_v20  ;;  %v8453_v61 = vld [vmem:[#allocation14 + $0x1f4] sm:$0xf0]  ;;  %v6681_v2 = vld [vmem:[#allocation14 + $0x100] sm:$0xf] }
 0x24e   : > { %v6814_v3 = vor.u32 %v8454_v58, %v6811_v9  ;;  %v8418_v20 = vld [vmem:[#allocation14 + $0xe4] sm:$0xf]  ;;  %v6667_v5 = vld [vmem:[#allocation14 + $0xf0] sm:$0xf0]  ;;  %v8409_v9 = vld [vmem:[#allocation14 + $0x94] sm:$0xf0] }
 0x24f   : > { %v6619_v58 = vld [vmem:[#allocation14 + $0x90] sm:$0xf0] }
 0x250   : > { %2084 = vmatpush.bf16.msrb.mxu0 %v6494_v17  ;;  %2092 = vmatpush.bf16.msrb.mxu2 %v6322_v22  ;;  %v6415_v17 = vld [vmem:[#allocation14 + $0x3f8] sm:$0xf0]  ;;  %v6258_v22 = vor.u32 %v8475_v8, %v6255_v10  ;;  %v6673_v8 = vld [vmem:[#allocation14 + $0xe8] sm:$0xf]  ;;  %v8421_v10 = vld [vmem:[#allocation14 + $0xf4] sm:$0xf0] }
 0x251   : > { %2540 = vmatpush.bf16.msrb.mxu3 %v6618_v19  ;;  %2123 = vmatpush.bf16.msrb.mxu1 %v6498_v27  ;;  %v6862_v19 = vor.u32 %v8466_v6, %v6859_v7  ;;  %v6843_v27 = vld [vmem:[#allocation14 + $0x250] sm:$0xf0]  ;;  %v6418_v30 = vor.u32 %v8515_v16, %v6415_v17  ;;  %v6802_v6 = vor.u32 %v8453_v61, %v6801_v59  ;;  %v6809_v16 = vld [vmem:[#allocation14 + $0x200] sm:$0xf]  ;;  %v6737_v59 = vld [vmem:[#allocation14 + $0x168] sm:$0xf] }
 0x252   : > { %v6846_v38 = vor.u32 %v8462_v26, %v6843_v27  ;;  %v8414_v26 = vld [vmem:[#allocation14 + $0xc4] sm:$0xf] }
 0x253   : > { %6548 = vmatmul.msk.bf16.vlgmr.msra.gmra.mxu0 %vm566_vm8, %v9862_v62  ;;  %2059 = vmatmul.bf16.vlgmr.msra.gmra.mxu1 %v9853_v41 }
 0x254   : > { %2072 = vmatmul.bf16.vlgmr.msra.gmra.mxu3 %v9855_v42  ;;  %2103 = vmatpush.bf16.msra.mxu0 %v6482_v33  ;;  %v6730_v33 = vor.u32 %v8436_v25, %v6729_v23  ;;  %v8450_v23 = vld [vmem:[#allocation14 + $0x1e4] sm:$0xf]  ;;  %v6795_v25 = vld [vmem:[#allocation14 + $0x1f0] sm:$0xf0] }
 0x255   : > { %2541 = vmatpush.bf16.msrb.mxu3 %v6602_v34  ;;  %2550 = vmatpush.bf16.msra.mxu1 %v6794_v35  ;;  %v8511_v34 = vld [vmem:[#allocation14 + $0x3cc] sm:$0xf]  ;;  %v6399_v35 = vld [vmem:[#allocation14 + $0x3d8] sm:$0xf0] }
 0x256   : > { %2093 = vmatpush.bf16.msrb.mxu2 %v6306_v55  ;;  %v6713_v55 = vld [vmem:[#allocation14 + $0x140] sm:$0xf]  ;;  %v6402_v51 = vor.u32 %v8511_v34, %v6399_v35  ;;  %v6798_v34 = vor.u32 %v8450_v23, %v6795_v25  ;;  %v9883_v35 = vpack.c.b16 %v9836_v13, %v9836_v13  ;;  %v6753_v13 = vld [vmem:[#allocation14 + $0x188] sm:$0xf]  ;;  %v8429_v23 = vld [vmem:[#allocation14 + $0x134] sm:$0xf0] }
 0x257   : > { %2033 = vmatmul.bf16.vlgmr.msra.gmra.mxu2 %v9855_v42 }
 0x258   : > { %2104 = vmatpush.bf16.msra.mxu0 %v6466_v52  ;;  %v6841_v52 = vld [vmem:[#allocation14 + $0x240] sm:$0xf] }
 0x259   : > { %2542 = vmatpush.bf16.msrb.mxu3 %v6586_v53  ;;  %2551 = vmatpush.bf16.msra.mxu1 %v6778_v54  ;;  %v6714_v53 = vor.u32 %v8432_v45, %v6713_v55  ;;  %v8507_v54 = vld [vmem:[#allocation14 + $0x3ac] sm:$0xf]  ;;  %v8446_v55 = vld [vmem:[#allocation14 + $0x1c4] sm:$0xf]  ;;  %v6779_v45 = vld [vmem:[#allocation14 + $0x1d0] sm:$0xf0] }
 0x25a   : > { %2094 = vmatpush.bf16.msrb.mxu2 %v6290_v57  ;;  %v8428_v57 = vld [vmem:[#allocation14 + $0x12c] sm:$0xf0]  ;;  %v6386_v60 = vor.u32 %v8507_v54, %v6383_v56  ;;  %v6782_v54 = vor.u32 %v8446_v55, %v6779_v45  ;;  %v6989_v45 = vld [vmem:[#allocation14 + $0x5e0] sm:$0xf] }
 0x25c   : > { %2105 = vmatpush.bf16.msra.mxu0 %v6450_v63  ;;  %v6825_v63 = vld [vmem:[#allocation14 + $0x220] sm:$0xf] }
 0x25d   : > { %2543 = vmatpush.bf16.msrb.mxu3 %v6570_v1  ;;  %2552 = vmatpush.bf16.msra.mxu1 %v6762_v37  ;;  %v6698_v1 = vor.u32 %v8428_v57, %v6697_v44  ;;  %v8503_v37 = vld [vmem:[#allocation14 + $0x38c] sm:$0xf]  ;;  %v6826_v7 = vor.u32 %v8460_v0, %v6825_v63  ;;  %v6763_v44 = vld [vmem:[#allocation14 + $0x1b0] sm:$0xf0]  ;;  %v8406_v57 = vld [vmem:[#allocation14 + $0x84] sm:$0xf] }
 0x25e   : > { %2095 = vmatpush.bf16.msrb.mxu2 %v6274_v4  ;;  %v8424_v4 = vld [vmem:[#allocation14 + $0x10c] sm:$0xf0]  ;;  %v6622_v63 = vor.u32 %v8406_v57, %v6619_v58  ;;  %v8469_v57 = vld [vmem:[#allocation14 + $0x274] sm:$0xf0] }
 0x25f   : > { %v6682_v17 = vor.u32 %v8424_v4, %v6681_v2  ;;  %v6609_v4 = vld [vmem:[#allocation14 + $0x68] sm:$0xf] }
 0x260   : > { %2106 = vmatpush.bf16.msra.mxu0 %v6434_v11  ;;  %v6785_v11 = vld [vmem:[#allocation14 + $0x1c8] sm:$0xf] }
 0x261   : > { %2544 = vmatpush.bf16.msrb.mxu3 %v6554_v14  ;;  %2553 = vmatpush.bf16.msra.mxu1 %v6746_v15  ;;  %v6370_v14 = vor.u32 %v8503_v37, %v6367_v18  ;;  %v8449_v15 = vld [vmem:[#allocation14 + $0x1d4] sm:$0xf0]  ;;  %v6747_v37 = vld [vmem:[#allocation14 + $0x190] sm:$0xf0]  ;;  %v8402_v18 = vld [vmem:[#allocation14 + $0x64] sm:$0xf] }
 0x262   : > { %2096 = vmatpush.bf16.msrb.mxu2 %v6258_v22  ;;  %v6674_v22 = vor.u32 %v8421_v10, %v6673_v8  ;;  %v6786_v27 = vor.u32 %v8449_v15, %v6785_v11  ;;  %v8434_v11 = vld [vmem:[#allocation14 + $0x164] sm:$0xf] }
 0x263   : > { %6549 = vmatmul.msk.bf16.vlgmr.msrb.gmra.mxu0 %vm566_vm8, %v9862_v62  ;;  %6550 = vmatmul.msk.bf16.vlgmr.msrb.gmra.mxu1 %vm566_vm8, %v9862_v62  ;;  %v6842_v62 = vor.u32 %v8464_v12, %v6841_v52  ;;  %v6641_v52 = vld [vmem:[#allocation14 + $0xa8] sm:$0xf]  ;;  %v8413_v12 = vld [vmem:[#allocation14 + $0xb4] sm:$0xf0]  ;;  %v8398_v15 = vld [vmem:[#allocation14 + $0x44] sm:$0xf] }
 0x264   : > { %2107 = vmatpush.bf16.msra.mxu0 %v6418_v30  ;;  %2545 = vmatmul.bf16.vlgmr.msrb.gmra.mxu3 %v9873_v36  ;;  %v6657_v30 = vld [vmem:[#allocation14 + $0xc8] sm:$0xf]  ;;  %v6642_v24 = vor.u32 %v8413_v12, %v6641_v52  ;;  %v8426_v52 = vld [vmem:[#allocation14 + $0x124] sm:$0xf]  ;;  %v6699_v12 = vld [vmem:[#allocation14 + $0x130] sm:$0xf0] }
 0x265   : > { %2606 = vmatpush.bf16.msra.mxu3 %v6862_v19  ;;  %2554 = vmatpush.bf16.msra.mxu1 %v6730_v33  ;;  %v6670_v19 = vor.u32 %v8418_v20, %v6667_v5  ;;  %v8445_v33 = vld [vmem:[#allocation14 + $0x1b4] sm:$0xf0]  ;;  %v6721_v5 = vld [vmem:[#allocation14 + $0x148] sm:$0xf]  ;;  %v6702_v58 = vor.u32 %v8426_v52, %v6699_v12  ;;  %v8564_v52 = vld [vmem:[#allocation14 + $0x56c] sm:$0xf0] }
 0x266   : > { %2097 = vmatpush.bf16.msrb.mxu2 %v6242_v39  ;;  %v6658_v39 = vor.u32 %v8417_v31, %v6657_v30  ;;  %v6770_v50 = vor.u32 %v8445_v33, %v6769_v32  ;;  %v8405_v20 = vld [vmem:[#allocation14 + $0x74] sm:$0xf0]  ;;  %v8394_v30 = vld [vmem:[#allocation14 + $0x24] sm:$0xf]  ;;  %v6571_v32 = vld [vmem:[#allocation14 + $0x30] sm:$0xf0] }
 0x267   : > { %v6610_v10 = vor.u32 %v8405_v20, %v6609_v4  ;;  %v6577_v33 = vld [vmem:[#allocation14 + $0x28] sm:$0xf]  ;;  %v8465_v20 = vld [vmem:[#allocation14 + $0x254] sm:$0xf0]  ;;  %v7117_v12 = vld [vmem:[#allocation14 + $0x6e0] sm:$0xf] }
 0x268   : > { %2108 = vmatpush.bf16.msra.mxu0 %v6402_v51  ;;  %v6635_v51 = vld [vmem:[#allocation14 + $0xb0] sm:$0xf0]  ;;  %v6849_v4 = vld [vmem:[#allocation14 + $0x248] sm:$0xf] }
 0x269   : > { %2607 = vmatpush.bf16.msra.mxu3 %v6846_v38  ;;  %2555 = vmatpush.bf16.msra.mxu1 %v6714_v53  ;;  %v6654_v38 = vor.u32 %v8414_v26, %v6651_v29  ;;  %v8441_v53 = vld [vmem:[#allocation14 + $0x194] sm:$0xf0]  ;;  %v6715_v29 = vld [vmem:[#allocation14 + $0x150] sm:$0xf0] }
 0x26a   : > { %2567 = vmatpush.bf16.msra.mxu2 %v6858_v46  ;;  %v8410_v46 = vld [vmem:[#allocation14 + $0xa4] sm:$0xf] }
 0x26b   : > { %2098 = vmatmul.bf16.vlgmr.msrb.gmra.mxu2 %v9853_v41  ;;  %v8456_v41 = vld [vmem:[#allocation14 + $0x20c] sm:$0xf0]  ;;  %v6638_v56 = vor.u32 %v8410_v46, %v6635_v51 }
 0x26c   : > { %2109 = vmatpush.bf16.msra.mxu0 %v6386_v60  ;;  %v6810_v28 = vor.u32 %v8456_v41, %v6809_v16  ;;  %v8437_v60 = vld [vmem:[#allocation14 + $0x174] sm:$0xf0]  ;;  %v6587_v41 = vld [vmem:[#allocation14 + $0x50] sm:$0xf0]  ;;  %v8580_v46 = vld [vmem:[#allocation14 + $0x5ec] sm:$0xf0] }
 0x26d   : > { %2608 = vmatpush.bf16.msra.mxu3 %v6830_v43  ;;  %2556 = vmatpush.bf16.msra.mxu1 %v6698_v1  ;;  %v8442_v43 = vld [vmem:[#allocation14 + $0x1a4] sm:$0xf]  ;;  %v6738_v2 = vor.u32 %v8437_v60, %v6737_v59  ;;  %v6590_v26 = vor.u32 %v8398_v15, %v6587_v41  ;;  %v8576_v59 = vld [vmem:[#allocation14 + $0x5cc] sm:$0xf0]  ;;  %v8415_v15 = vld [vmem:[#allocation14 + $0xcc] sm:$0xf] }
 0x26e   : > { %2568 = vmatpush.bf16.msra.mxu2 %v6842_v62  ;;  %v6754_v62 = vor.u32 %v8441_v53, %v6753_v13  ;;  %v6766_v61 = vor.u32 %v8442_v43, %v6763_v44  ;;  %v8438_v1 = vld [vmem:[#allocation14 + $0x184] sm:$0xf]  ;;  %v6990_v43 = vor.u32 %v8580_v46, %v6989_v45  ;;  %v6865_v44 = vld [vmem:[#allocation14 + $0x268] sm:$0xf]  ;;  %v8451_v45 = vld [vmem:[#allocation14 + $0x1ec] sm:$0xf] }
 0x26f   : > { %v8390_v13 = vld [vmem:[#allocation14 + $0x4] sm:$0xf]  ;;  %v6803_v46 = vld [vmem:[#allocation14 + $0x1f8] sm:$0xf0] }
 0x270   : > { %2110 = vmatpush.bf16.msra.mxu0 %v6370_v14  ;;  %v6731_v14 = vld [vmem:[#allocation14 + $0x170] sm:$0xf0] }
 0x271   : > { %2609 = vmatpush.bf16.msra.mxu3 %v6814_v3  ;;  %2557 = vmatpush.bf16.msra.mxu1 %v6682_v17  ;;  %v6603_v3 = vld [vmem:[#allocation14 + $0x70] sm:$0xf0]  ;;  %v6593_v17 = vld [vmem:[#allocation14 + $0x48] sm:$0xf]  ;;  %v6734_v25 = vor.u32 %v8434_v11, %v6731_v14  ;;  %v8572_v11 = vld [vmem:[#allocation14 + $0x5ac] sm:$0xf0]  ;;  %v6850_v14 = vor.u32 %v8465_v20, %v6849_v4 }
 0x272   : > { %2569 = vmatpush.bf16.msra.mxu2 %v6826_v7  ;;  %v6750_v7 = vor.u32 %v8438_v1, %v6747_v37  ;;  %v6606_v8 = vor.u32 %v8402_v18, %v6603_v3  ;;  %v6866_v1 = vor.u32 %v8469_v57, %v6865_v44  ;;  %v8419_v37 = vld [vmem:[#allocation14 + $0xec] sm:$0xf]  ;;  %v6675_v18 = vld [vmem:[#allocation14 + $0xf8] sm:$0xf0]  ;;  %v6893_v4 = vld [vmem:[#allocation14 + $0x520] sm:$0xf] }
 0x273   : > { %2111 = vmatmul.bf16.vlgmr.msra.gmra.mxu0 %v9855_v42  ;;  %v6625_v42 = vld [vmem:[#allocation14 + $0x88] sm:$0xf]  ;;  %v8556_v20 = vld [vmem:[#allocation14 + $0x52c] sm:$0xf0] }
 0x274   : > { %2576 = vmatpush.bf16.msrb.mxu0 %v6670_v19  ;;  %2558 = vmatmul.bf16.vlgmr.msra.gmra.mxu1 %v9883_v35  ;;  %v6626_v0 = vor.u32 %v8409_v9, %v6625_v42  ;;  %v8401_v19 = vld [vmem:[#allocation14 + $0x54] sm:$0xf0]  ;;  %v6867_v42 = vld [vmem:[#allocation14 + $0x278] sm:$0xf0]  ;;  %v6973_v9 = vld [vmem:[#allocation14 + $0x5c0] sm:$0xf] }
 0x275   : > { %2628 = vmatpush.bf16.msrb.mxu3 %v6802_v6  ;;  %2615 = vmatpush.bf16.msrb.mxu1 %v6674_v22  ;;  %v8433_v6 = vld [vmem:[#allocation14 + $0x154] sm:$0xf0]  ;;  %v6705_v22 = vld [vmem:[#allocation14 + $0x128] sm:$0xf]  ;;  %v6974_v3 = vor.u32 %v8576_v59, %v6973_v9  ;;  %v8560_v59 = vld [vmem:[#allocation14 + $0x54c] sm:$0xf0] }
 0x276   : > { %2570 = vmatpush.bf16.msra.mxu2 %v6810_v28  ;;  %6872 = vmatmul.msk.bf16.vlgmr.msra.gmra.mxu3 %vm566_vm8, %v9887_v47  ;;  %v6722_v16 = vor.u32 %v8433_v6, %v6721_v5  ;;  %v8430_v28 = vld [vmem:[#allocation14 + $0x144] sm:$0xf]  ;;  %v6706_v31 = vor.u32 %v8429_v23, %v6705_v22  ;;  %v8463_v6 = vld [vmem:[#allocation14 + $0x24c] sm:$0xf] }
 0x277   : > { %v6718_v55 = vor.u32 %v8430_v28, %v6715_v29  ;;  %v8459_v23 = vld [vmem:[#allocation14 + $0x22c] sm:$0xf]  ;;  %v8568_v28 = vld [vmem:[#allocation14 + $0x58c] sm:$0xf0] }
 0x278   : > { %2577 = vmatpush.bf16.msrb.mxu0 %v6654_v38  ;;  %v6689_v38 = vld [vmem:[#allocation14 + $0x108] sm:$0xf] }
 0x279   : > { %2629 = vmatpush.bf16.msrb.mxu3 %v6786_v27  ;;  %2616 = vmatpush.bf16.msrb.mxu1 %v6658_v39  ;;  %v6594_v27 = vor.u32 %v8401_v19, %v6593_v17  ;;  %v8425_v39 = vld [vmem:[#allocation14 + $0x114] sm:$0xf0]  ;;  %v6833_v17 = vld [vmem:[#allocation14 + $0x228] sm:$0xf] }
 0x27a   : > { %2589 = vmatpush.bf16.msrb.mxu2 %v6798_v34  ;;  %v8397_v34 = vld [vmem:[#allocation14 + $0x34] sm:$0xf0]  ;;  %v6690_v53 = vor.u32 %v8425_v39, %v6689_v38  ;;  %v8455_v38 = vld [vmem:[#allocation14 + $0x20c] sm:$0xf]  ;;  %v6819_v39 = vld [vmem:[#allocation14 + $0x218] sm:$0xf0] }
 0x27b   : > { %6871 = vmatmul.msk.bf16.vlgmr.msra.gmra.mxu2 %vm566_vm8, %v9887_v47  ;;  %v6578_v51 = vor.u32 %v8397_v34, %v6577_v33  ;;  %v8461_v19 = vld [vmem:[#allocation14 + $0x234] sm:$0xf0] }
 0x27c   : > { %2578 = vmatpush.bf16.msrb.mxu0 %v6638_v56  ;;  %v6561_v56 = vld [vmem:[#allocation14 + $0x8] sm:$0xf]  ;;  %v6834_v29 = vor.u32 %v8461_v19, %v6833_v17  ;;  %v8457_v34 = vld [vmem:[#allocation14 + $0x214] sm:$0xf0]  ;;  %v6877_v17 = vld [vmem:[#allocation14 + $0x500] sm:$0xf] }
 0x27d   : > { %2630 = vmatpush.bf16.msrb.mxu3 %v6770_v50  ;;  %2617 = vmatpush.bf16.msrb.mxu1 %v6642_v24  ;;  %v6574_v50 = vor.u32 %v8394_v30, %v6571_v32  ;;  %v8393_v24 = vld [vmem:[#allocation14 + $0x14] sm:$0xf0]  ;;  %v8411_v30 = vld [vmem:[#allocation14 + $0xac] sm:$0xf]  ;;  %v6817_v32 = vld [vmem:[#allocation14 + $0x208] sm:$0xf] }
 0x27e   : > { %2590 = vmatpush.bf16.msrb.mxu2 %v6782_v54  ;;  %v6555_v54 = vld [vmem:[#allocation14 + $0x10] sm:$0xf0]  ;;  %v8552_v19 = vld [vmem:[#allocation14 + $0x50c] sm:$0xf0] }
 0x27f   : > { %v6558_v60 = vor.u32 %v8390_v13, %v6555_v54  ;;  %v8612_v13 = vld [vmem:[#allocation14 + $0x6ec] sm:$0xf0]  ;;  %v8407_v54 = vld [vmem:[#allocation14 + $0x8c] sm:$0xf] }
 0x280   : > { %2579 = vmatpush.bf16.msrb.mxu0 %v6622_v63  ;;  %v8422_v63 = vld [vmem:[#allocation14 + $0x104] sm:$0xf]  ;;  %v7118_v57 = vor.u32 %v8612_v13, %v7117_v12  ;;  %v7181_v12 = vld [vmem:[#allocation14 + $0x760] sm:$0xf] }
 0x281   : > { %2631 = vmatpush.bf16.msrb.mxu3 %v6754_v62  ;;  %2618 = vmatpush.bf16.msrb.mxu1 %v6626_v0  ;;  %v8467_v62 = vld [vmem:[#allocation14 + $0x26c] sm:$0xf]  ;;  %v6683_v0 = vld [vmem:[#allocation14 + $0x110] sm:$0xf0] }
 0x282   : > { %2591 = vmatpush.bf16.msrb.mxu2 %v6766_v61  ;;  %v6562_v61 = vor.u32 %v8393_v24, %v6561_v56  ;;  %v6686_v5 = vor.u32 %v8422_v63, %v6683_v0  ;;  %v6627_v56 = vld [vmem:[#allocation14 + $0x98] sm:$0xf0]  ;;  %v6822_v24 = vor.u32 %v8455_v38, %v6819_v39  ;;  %v8403_v0 = vld [vmem:[#allocation14 + $0x6c] sm:$0xf]  ;;  %v7053_v39 = vld [vmem:[#allocation14 + $0x660] sm:$0xf] }
 0x283   : > { %v6630_v9 = vor.u32 %v8407_v54, %v6627_v56  ;;  %v8431_v54 = vld [vmem:[#allocation14 + $0x14c] sm:$0xf]  ;;  %v6723_v56 = vld [vmem:[#allocation14 + $0x158] sm:$0xf0] }
 0x284   : > { %2580 = vmatpush.bf16.msrb.mxu0 %v6606_v8  ;;  %v6678_v8 = vor.u32 %v8419_v37, %v6675_v18 }
 0x285   : > { %2632 = vmatpush.bf16.msrb.mxu3 %v6738_v2  ;;  %2619 = vmatpush.bf16.msrb.mxu1 %v6610_v10  ;;  %v6870_v2 = vor.u32 %v8467_v62, %v6867_v42  ;;  %v6957_v10 = vld [vmem:[#allocation14 + $0x5a0] sm:$0xf]  ;;  %v8447_v62 = vld [vmem:[#allocation14 + $0x1cc] sm:$0xf] }
 0x286   : > { %2592 = vmatpush.bf16.msrb.mxu2 %v6750_v7  ;;  %v6851_v7 = vld [vmem:[#allocation14 + $0x258] sm:$0xf0]  ;;  %v6958_v22 = vor.u32 %v8572_v11, %v6957_v10  ;;  %v6909_v42 = vld [vmem:[#allocation14 + $0x540] sm:$0xf]  ;;  %v8399_v10 = vld [vmem:[#allocation14 + $0x4c] sm:$0xf] }
 0x287   : > { %v6854_v41 = vor.u32 %v8463_v6, %v6851_v7  ;;  %v6910_v37 = vor.u32 %v8560_v59, %v6909_v42  ;;  %v8604_v6 = vld [vmem:[#allocation14 + $0x6ac] sm:$0xf0]  ;;  %v6595_v11 = vld [vmem:[#allocation14 + $0x58] sm:$0xf0]  ;;  %v7151_v42 = vld [vmem:[#allocation14 + $0x730] sm:$0xf0]  ;;  %v6726_v59 = vor.u32 %v8431_v54, %v6723_v56 }
 0x288   : > { %2581 = vmatpush.bf16.msrb.mxu0 %v6590_v26 }
 0x289   : > { %2633 = vmatpush.bf16.msrb.mxu3 %v6722_v16  ;;  %2620 = vmatpush.bf16.msrb.mxu1 %v6594_v27  ;;  %v6659_v16 = vld [vmem:[#allocation14 + $0xd8] sm:$0xf0]  ;;  %v6941_v27 = vld [vmem:[#allocation14 + $0x580] sm:$0xf] }
 0x28a   : > { %2593 = vmatpush.bf16.msrb.mxu2 %v6734_v25  ;;  %v6835_v25 = vld [vmem:[#allocation14 + $0x238] sm:$0xf0]  ;;  %v6662_v26 = vor.u32 %v8415_v15, %v6659_v16  ;;  %v8439_v16 = vld [vmem:[#allocation14 + $0x18c] sm:$0xf] }
 0x28b   : > { %v6838_v33 = vor.u32 %v8459_v23, %v6835_v25  ;;  %v8600_v23 = vld [vmem:[#allocation14 + $0x68c] sm:$0xf0]  ;;  %v6598_v25 = vor.u32 %v8399_v10, %v6595_v11  ;;  %v8423_v11 = vld [vmem:[#allocation14 + $0x10c] sm:$0xf] }
 0x28c   : > { %2582 = vmatpush.bf16.msrb.mxu0 %v6574_v50  ;;  %v6925_v50 = vld [vmem:[#allocation14 + $0x560] sm:$0xf] }
 0x28d   : > { %2634 = vmatpush.bf16.msrb.mxu3 %v6706_v31  ;;  %2621 = vmatpush.bf16.msrb.mxu1 %v6578_v51  ;;  %v6643_v31 = vld [vmem:[#allocation14 + $0xb8] sm:$0xf0]  ;;  %v6926_v44 = vor.u32 %v8564_v52, %v6925_v50 }
 0x28e   : > { %2594 = vmatpush.bf16.msrb.mxu2 %v6718_v55  ;;  %v6942_v55 = vor.u32 %v8568_v28, %v6941_v27  ;;  %v6646_v51 = vor.u32 %v8411_v30, %v6643_v31  ;;  %v7183_v27 = vld [vmem:[#allocation14 + $0x770] sm:$0xf0]  ;;  %v6579_v30 = vld [vmem:[#allocation14 + $0x38] sm:$0xf0]  ;;  %v6878_v31 = vor.u32 %v8552_v19, %v6877_v17  ;;  %v8578_v17 = vld [vmem:[#allocation14 + $0x5e4] sm:$0xf] }
 0x28f   : > { %v6563_v52 = vld [vmem:[#allocation14 + $0x18] sm:$0xf0]  ;;  %v6991_v19 = vld [vmem:[#allocation14 + $0x5f0] sm:$0xf0] }
 0x290   : > { %2583 = vmatpush.bf16.msrb.mxu0 %v6558_v60  ;;  %v7101_v60 = vld [vmem:[#allocation14 + $0x6c0] sm:$0xf] }
 0x291   : > { %2635 = vmatpush.bf16.msrb.mxu3 %v6690_v53  ;;  %2622 = vmatpush.bf16.msrb.mxu1 %v6562_v61  ;;  %v6818_v53 = vor.u32 %v8457_v34, %v6817_v32  ;;  %v8608_v61 = vld [vmem:[#allocation14 + $0x6cc] sm:$0xf0]  ;;  %v6739_v34 = vld [vmem:[#allocation14 + $0x178] sm:$0xf0] }
 0x292   : > { %2595 = vmatpush.bf16.msrb.mxu2 %v6702_v58  ;;  %v6787_v58 = vld [vmem:[#allocation14 + $0x1d8] sm:$0xf0]  ;;  %v7102_v18 = vor.u32 %v8608_v61, %v7101_v60  ;;  %v7165_v60 = vld [vmem:[#allocation14 + $0x740] sm:$0xf] }
 0x293   : > { %2584 = vmatmul.bf16.vlgmr.msrb.gmra.mxu0 %v9873_v36  ;;  %v6790_v63 = vor.u32 %v8447_v62, %v6787_v58  ;;  %v8618_v58 = vld [vmem:[#allocation14 + $0x724] sm:$0xf] }
 0x294   : > { %2636 = vmatmul.bf16.vlgmr.msrb.gmra.mxu3 %v9883_v35  ;;  %2645 = vmatpush.bf16.msra.mxu0 %v6866_v1  ;;  %v6611_v1 = vld [vmem:[#allocation14 + $0x78] sm:$0xf0] }
 0x295   : > { %3182 = vmatpush.bf16.msra.mxu3 %v6990_v43  ;;  %2684 = vmatpush.bf16.msra.mxu1 %v6870_v2  ;;  %v6806_v43 = vor.u32 %v8451_v45, %v6803_v46  ;;  %v8443_v2 = vld [vmem:[#allocation14 + $0x1ac] sm:$0xf]  ;;  %v6614_v7 = vor.u32 %v8403_v0, %v6611_v1  ;;  %v8622_v45 = vld [vmem:[#allocation14 + $0x744] sm:$0xf]  ;;  %v7167_v46 = vld [vmem:[#allocation14 + $0x750] sm:$0xf0] }
 0x296   : > { %2596 = vmatpush.bf16.msrb.mxu2 %v6686_v5  ;;  %2623 = vmatmul.bf16.vlgmr.msrb.gmra.mxu1 %v9873_v36  ;;  %v7085_v5 = vld [vmem:[#allocation14 + $0x6a0] sm:$0xf]  ;;  %v8427_v0 = vld [vmem:[#allocation14 + $0x12c] sm:$0xf]  ;;  %v6707_v1 = vld [vmem:[#allocation14 + $0x138] sm:$0xf0] }
 0x297   : > { %v7086_v15 = vor.u32 %v8604_v6, %v7085_v5  ;;  %v6710_v5 = vor.u32 %v8427_v0, %v6707_v1  ;;  %v8613_v6 = vld [vmem:[#allocation14 + $0x6f4] sm:$0xf0]  ;;  %v8566_v1 = vld [vmem:[#allocation14 + $0x584] sm:$0xf] }
 0x298   : > { %2646 = vmatpush.bf16.msra.mxu0 %v6850_v14  ;;  %v6894_v14 = vor.u32 %v8556_v20, %v6893_v4  ;;  %v7125_v4 = vld [vmem:[#allocation14 + $0x6e8] sm:$0xf] }
 0x299   : > { %3183 = vmatpush.bf16.msra.mxu3 %v6974_v3  ;;  %2685 = vmatpush.bf16.msra.mxu1 %v6854_v41  ;;  %v6771_v3 = vld [vmem:[#allocation14 + $0x1b8] sm:$0xf0] }
 0x29a   : > { %2654 = vmatpush.bf16.msra.mxu2 %v6678_v8  ;;  %v6774_v8 = vor.u32 %v8443_v2, %v6771_v3  ;;  %v6755_v41 = vld [vmem:[#allocation14 + $0x198] sm:$0xf0]  ;;  %v8614_v2 = vld [vmem:[#allocation14 + $0x704] sm:$0xf]  ;;  %v7135_v3 = vld [vmem:[#allocation14 + $0x710] sm:$0xf0] }
 0x29b   : > { %2597 = vmatmul.bf16.vlgmr.msrb.gmra.mxu2 %v9883_v35  ;;  %v6758_v28 = vor.u32 %v8439_v16, %v6755_v41  ;;  %v7138_v16 = vor.u32 %v8614_v2, %v7135_v3  ;;  %v8584_v41 = vld [vmem:[#allocation14 + $0x60c] sm:$0xf0]  ;;  %v8569_v3 = vld [vmem:[#allocation14 + $0x594] sm:$0xf0] }
 0x29c   : > { %2647 = vmatpush.bf16.msra.mxu0 %v6834_v29  ;;  %v8395_v29 = vld [vmem:[#allocation14 + $0x2c] sm:$0xf] }
 0x29d   : > { %3184 = vmatpush.bf16.msra.mxu3 %v6958_v22  ;;  %2686 = vmatpush.bf16.msra.mxu1 %v6838_v33  ;;  %v7069_v22 = vld [vmem:[#allocation14 + $0x680] sm:$0xf]  ;;  %v8435_v33 = vld [vmem:[#allocation14 + $0x16c] sm:$0xf] }
 0x29e   : > { %2655 = vmatpush.bf16.msra.mxu2 %v6662_v26  ;;  %v8626_v26 = vld [vmem:[#allocation14 + $0x764] sm:$0xf]  ;;  %v7070_v32 = vor.u32 %v8600_v23, %v7069_v22  ;;  %v6742_v50 = vor.u32 %v8435_v33, %v6739_v34  ;;  %v7126_v22 = vor.u32 %v8613_v6, %v7125_v4  ;;  %v6997_v23 = vld [vmem:[#allocation14 + $0x5e8] sm:$0xf]  ;;  %v8616_v33 = vld [vmem:[#allocation14 + $0x70c] sm:$0xf0] }
 0x29f   : > { %v7186_v38 = vor.u32 %v8626_v26, %v7183_v27  ;;  %v8610_v34 = vld [vmem:[#allocation14 + $0x6e4] sm:$0xf]  ;;  %v7061_v4 = vld [vmem:[#allocation14 + $0x668] sm:$0xf] }
 0x2a0   : > { %2648 = vmatpush.bf16.msra.mxu0 %v6818_v53  ;;  %v8628_v53 = vld [vmem:[#allocation14 + $0x76c] sm:$0xf0] }
 0x2a1   : > { %3185 = vmatpush.bf16.msra.mxu3 %v6942_v55  ;;  %2687 = vmatpush.bf16.msra.mxu1 %v6822_v24  ;;  %v6582_v55 = vor.u32 %v8395_v29, %v6579_v30  ;;  %v9904_v24 = vrot.slane %v9839_v21, 1  ;;  %v7154_v21 = vor.u32 %v8618_v58, %v7151_v42  ;;  %v8609_v29 = vld [vmem:[#allocation14 + $0x6d4] sm:$0xf0]  ;;  %v6959_v58 = vld [vmem:[#allocation14 + $0x5b0] sm:$0xf0] }
 0x2a2   : > { %2656 = vmatpush.bf16.msra.mxu2 %v6646_v51  ;;  %v8391_v51 = vld [vmem:[#allocation14 + $0xc] sm:$0xf]  ;;  %v6965_v42 = vld [vmem:[#allocation14 + $0x5a8] sm:$0xf] }
 0x2a3   : > { %6873 = vmatmul.msk.bf16.vlgmr.msra.gmra.mxu0 %vm566_vm8, %v9887_v47  ;;  %v6566_v62 = vor.u32 %v8391_v51, %v6563_v52  ;;  %v7093_v51 = vld [vmem:[#allocation14 + $0x6a8] sm:$0xf]  ;;  %v8605_v52 = vld [vmem:[#allocation14 + $0x6b4] sm:$0xf0] }
 0x2a4   : > { %2667 = vmatpush.bf16.msrb.mxu0 %v6806_v43  ;;  %v7170_v43 = vor.u32 %v8622_v45, %v7167_v46  ;;  %v6981_v45 = vld [vmem:[#allocation14 + $0x5c8] sm:$0xf]  ;;  %v8577_v46 = vld [vmem:[#allocation14 + $0x5d4] sm:$0xf0] }
 0x2a5   : > { %3186 = vmatpush.bf16.msra.mxu3 %v6926_v44  ;;  %3195 = vmatpush.bf16.msrb.mxu1 %v7118_v57  ;;  %v7037_v44 = vld [vmem:[#allocation14 + $0x640] sm:$0xf]  ;;  %v8592_v57 = vld [vmem:[#allocation14 + $0x64c] sm:$0xf0]  ;;  %v6982_v56 = vor.u32 %v8577_v46, %v6981_v45  ;;  %v8590_v46 = vld [vmem:[#allocation14 + $0x644] sm:$0xf] }
 0x2a6   : > { %2657 = vmatpush.bf16.msra.mxu2 %v6630_v9  ;;  %6874 = vmatmul.msk.bf16.vlgmr.msra.gmra.mxu1 %vm566_vm8, %v9887_v47  ;;  %v8596_v47 = vld [vmem:[#allocation14 + $0x66c] sm:$0xf0]  ;;  %v7182_v9 = vor.u32 %v8628_v53, %v7181_v12  ;;  %v7038_v61 = vor.u32 %v8592_v57, %v7037_v44  ;;  %v9912_v53 = vrot.slane %v9851_v40, 1  ;;  %v7103_v44 = vld [vmem:[#allocation14 + $0x6d0] sm:$0xf0]  ;;  %v7094_v57 = vor.u32 %v8605_v52, %v7093_v51 }
 0x2a7   : > { %v7054_v13 = vor.u32 %v8596_v47, %v7053_v39  ;;  %v8574_v39 = vld [vmem:[#allocation14 + $0x5c4] sm:$0xf] }
 0x2a8   : > { %2668 = vmatpush.bf16.msrb.mxu0 %v6790_v63  ;;  %v8624_v63 = vld [vmem:[#allocation14 + $0x74c] sm:$0xf0] }
 0x2a9   : > { %3187 = vmatpush.bf16.msra.mxu3 %v6910_v37  ;;  %3196 = vmatpush.bf16.msrb.mxu1 %v7102_v18  ;;  %v7021_v37 = vld [vmem:[#allocation14 + $0x620] sm:$0xf]  ;;  %v8588_v18 = vld [vmem:[#allocation14 + $0x62c] sm:$0xf0]  ;;  %v7166_v20 = vor.u32 %v8624_v63, %v7165_v60 }
 0x2aa   : > { %2658 = vmatpush.bf16.msra.mxu2 %v6614_v7  ;;  %v7149_v7 = vld [vmem:[#allocation14 + $0x720] sm:$0xf]  ;;  %v7022_v10 = vor.u32 %v8588_v18, %v7021_v37  ;;  %v6949_v37 = vld [vmem:[#allocation14 + $0x588] sm:$0xf] }
 0x2ac   : > { %2669 = vmatpush.bf16.msrb.mxu0 %v6774_v8  ;;  %v8620_v8 = vld [vmem:[#allocation14 + $0x72c] sm:$0xf0] }
 0x2ad   : > { %3188 = vmatpush.bf16.msra.mxu3 %v6894_v14  ;;  %3197 = vmatpush.bf16.msrb.mxu1 %v7086_v15  ;;  %v6691_v14 = vld [vmem:[#allocation14 + $0x118] sm:$0xf0]  ;;  %v7005_v15 = vld [vmem:[#allocation14 + $0x600] sm:$0xf]  ;;  %v7150_v26 = vor.u32 %v8620_v8, %v7149_v7  ;;  %v8598_v8 = vld [vmem:[#allocation14 + $0x684] sm:$0xf] }
 0x2ae   : > { %2659 = vmatpush.bf16.msra.mxu2 %v6598_v25  ;;  %v8581_v25 = vld [vmem:[#allocation14 + $0x5f4] sm:$0xf0]  ;;  %v6694_v27 = vor.u32 %v8423_v11, %v6691_v14  ;;  %v7006_v30 = vor.u32 %v8584_v41, %v7005_v15  ;;  %v6950_v11 = vor.u32 %v8569_v3, %v6949_v37  ;;  %v8562_v15 = vld [vmem:[#allocation14 + $0x564] sm:$0xf]  ;;  %v6933_v41 = vld [vmem:[#allocation14 + $0x568] sm:$0xf] }
 0x2af   : > { %v8553_v37 = vld [vmem:[#allocation14 + $0x514] sm:$0xf0] }
 0x2b0   : > { %2670 = vmatpush.bf16.msrb.mxu0 %v6758_v28  ;;  %v7109_v28 = vld [vmem:[#allocation14 + $0x6c8] sm:$0xf] }
 0x2b1   : > { %3189 = vmatpush.bf16.msra.mxu3 %v6878_v31  ;;  %3198 = vmatpush.bf16.msrb.mxu1 %v7070_v32  ;;  %v6994_v31 = vor.u32 %v8578_v17, %v6991_v19  ;;  %v7133_v32 = vld [vmem:[#allocation14 + $0x700] sm:$0xf]  ;;  %v7110_v47 = vor.u32 %v8609_v29, %v7109_v28  ;;  %v8565_v17 = vld [vmem:[#allocation14 + $0x574] sm:$0xf0]  ;;  %v7045_v19 = vld [vmem:[#allocation14 + $0x648] sm:$0xf] }
 0x2b2   : > { %2660 = vmatpush.bf16.msra.mxu2 %v6582_v55  ;;  %v6975_v55 = vld [vmem:[#allocation14 + $0x5d0] sm:$0xf0]  ;;  %v6934_v29 = vor.u32 %v8565_v17, %v6933_v41  ;;  %v7173_v41 = vld [vmem:[#allocation14 + $0x748] sm:$0xf]  ;;  %v8625_v17 = vld [vmem:[#allocation14 + $0x754] sm:$0xf0] }
 0x2b3   : > { %v6978_v54 = vor.u32 %v8574_v39, %v6975_v55  ;;  %v7029_v39 = vld [vmem:[#allocation14 + $0x628] sm:$0xf] }
 0x2b4   : > { %3190 = vmatmul.bf16.vlgmr.msra.gmra.mxu3 %v9904_v24  ;;  %2671 = vmatpush.bf16.msrb.mxu0 %v6742_v50  ;;  %v7134_v50 = vor.u32 %v8616_v33, %v7133_v32  ;;  %v6911_v32 = vld [vmem:[#allocation14 + $0x550] sm:$0xf0]  ;;  %v6917_v33 = vld [vmem:[#allocation14 + $0x548] sm:$0xf] }
 0x2b5   : > { %3251 = vmatpush.bf16.msrb.mxu3 %v7186_v38  ;;  %3199 = vmatpush.bf16.msrb.mxu1 %v7054_v13  ;;  %v7119_v38 = vld [vmem:[#allocation14 + $0x6f0] sm:$0xf0]  ;;  %v9909_v13 = vrot.slane %v9842_v49, 1  ;;  %v7077_v49 = vld [vmem:[#allocation14 + $0x688] sm:$0xf] }
 0x2b6   : > { %2661 = vmatpush.bf16.msra.mxu2 %v6566_v62  ;;  %v7122_v12 = vor.u32 %v8610_v34, %v7119_v38  ;;  %v8570_v62 = vld [vmem:[#allocation14 + $0x5a4] sm:$0xf]  ;;  %v8561_v38 = vld [vmem:[#allocation14 + $0x554] sm:$0xf0] }
 0x2b7   : > { %v6962_v60 = vor.u32 %v8570_v62, %v6959_v58  ;;  %v6918_v51 = vor.u32 %v8561_v38, %v6917_v33  ;;  %v7013_v62 = vld [vmem:[#allocation14 + $0x608] sm:$0xf]  ;;  %v8585_v58 = vld [vmem:[#allocation14 + $0x614] sm:$0xf0] }
 0x2b8   : > { %2672 = vmatpush.bf16.msrb.mxu0 %v6726_v59  ;;  %v8601_v59 = vld [vmem:[#allocation14 + $0x694] sm:$0xf0] }
 0x2b9   : > { %3252 = vmatpush.bf16.msrb.mxu3 %v7170_v43  ;;  %3200 = vmatpush.bf16.msrb.mxu1 %v7038_v61  ;;  %v8606_v43 = vld [vmem:[#allocation14 + $0x6c4] sm:$0xf]  ;;  %v7078_v0 = vor.u32 %v8601_v59, %v7077_v49  ;;  %v7023_v59 = vld [vmem:[#allocation14 + $0x630] sm:$0xf0]  ;;  %v8621_v38 = vld [vmem:[#allocation14 + $0x734] sm:$0xf0] }
 0x2ba   : > { %3212 = vmatpush.bf16.msrb.mxu2 %v7182_v9  ;;  %v8573_v9 = vld [vmem:[#allocation14 + $0x5b4] sm:$0xf0]  ;;  %v7106_v40 = vor.u32 %v8606_v43, %v7103_v44  ;;  %v8602_v61 = vld [vmem:[#allocation14 + $0x6a4] sm:$0xf]  ;;  %v6901_v43 = vld [vmem:[#allocation14 + $0x528] sm:$0xf] }
 0x2bb   : > { %2662 = vmatmul.bf16.vlgmr.msra.gmra.mxu2 %v9873_v36  ;;  %v6998_v36 = vor.u32 %v8581_v25, %v6997_v23  ;;  %v6966_v63 = vor.u32 %v8573_v9, %v6965_v42  ;;  %v8586_v49 = vld [vmem:[#allocation14 + $0x624] sm:$0xf] }
 0x2bc   : > { %2673 = vmatpush.bf16.msrb.mxu0 %v6710_v5  ;;  %v7026_v3 = vor.u32 %v8586_v49, %v7023_v59 }
 0x2bd   : > { %3253 = vmatpush.bf16.msrb.mxu3 %v7154_v21  ;;  %3201 = vmatpush.bf16.msrb.mxu1 %v7022_v10  ;;  %v6943_v21 = vld [vmem:[#allocation14 + $0x590] sm:$0xf0] }
 0x2be   : > { %3213 = vmatpush.bf16.msrb.mxu2 %v7166_v20  ;;  %v8597_v20 = vld [vmem:[#allocation14 + $0x674] sm:$0xf0]  ;;  %v6946_v7 = vor.u32 %v8566_v1, %v6943_v21  ;;  %v7071_v10 = vld [vmem:[#allocation14 + $0x690] sm:$0xf0] }
 0x2bf   : > { %v7062_v14 = vor.u32 %v8597_v20, %v7061_v4  ;;  %v7074_v23 = vor.u32 %v8598_v8, %v7071_v10  ;;  %v8627_v4 = vld [vmem:[#allocation14 + $0x76c] sm:$0xf]  ;;  %v7191_v20 = vld [vmem:[#allocation14 + $0x778] sm:$0xf0] }
 0x2c0   : > { %2674 = vmatpush.bf16.msrb.mxu0 %v6694_v27  ;;  %v1982_v18 = vpop.f32.mrf.mxu0  ;;  %v1995_v2 = vpop.f32.mrf.mxu1  ;;  %v7055_v27 = vld [vmem:[#allocation14 + $0x670] sm:$0xf0] }
 0x2c1   : > { %3254 = vmatpush.bf16.msrb.mxu3 %v7138_v16  ;;  %3202 = vmatpush.bf16.msrb.mxu1 %v7006_v30  ;;  %v1996_v5 = vadd.f32 %v1995_v2, %v1982_v18  ;;  %v6927_v16 = vld [vmem:[#allocation14 + $0x570] sm:$0xf0]  ;;  %v7189_v18 = vld [vmem:[#allocation14 + $0x768] sm:$0xf]  ;;  %v8629_v2 = vld [vmem:[#allocation14 + $0x774] sm:$0xf0] }
 0x2c2   : > { %3214 = vmatpush.bf16.msrb.mxu2 %v7150_v26  ;;  %v6930_v25 = vor.u32 %v8562_v15, %v6927_v16  ;;  %v8594_v26 = vld [vmem:[#allocation14 + $0x664] sm:$0xf]  ;;  %v6999_v15 = vld [vmem:[#allocation14 + $0x5f8] sm:$0xf0]  ;;  %v7194_v16 = vor.u32 %v8627_v4, %v7191_v20  ;;  %v8603_v20 = vld [vmem:[#allocation14 + $0x6ac] sm:$0xf] }
 0x2c3   : > { %2675 = vmatmul.bf16.vlgmr.msrb.gmra.mxu0 %v9883_v35  ;;  %v7087_v35 = vld [vmem:[#allocation14 + $0x6b0] sm:$0xf0]  ;;  %v7058_v55 = vor.u32 %v8594_v26, %v7055_v27  ;;  %v7174_v27 = vor.u32 %v8625_v17, %v7173_v41  ;;  %v8599_v41 = vld [vmem:[#allocation14 + $0x68c] sm:$0xf]  ;;  %v7079_v17 = vld [vmem:[#allocation14 + $0x698] sm:$0xf0] }
 0x2c4   : > { %3221 = vmatpush.bf16.msra.mxu0 %v6994_v31  ;;  %3203 = vmatmul.bf16.vlgmr.msrb.gmra.mxu1 %v9909_v13  ;;  %v7090_v6 = vor.u32 %v8602_v61, %v7087_v35  ;;  %v8558_v31 = vld [vmem:[#allocation14 + $0x544] sm:$0xf]  ;;  %v7014_v61 = vor.u32 %v8585_v58, %v7013_v62  ;;  %v8615_v62 = vld [vmem:[#allocation14 + $0x70c] sm:$0xf]  ;;  %v7143_v58 = vld [vmem:[#allocation14 + $0x718] sm:$0xf0] }
 0x2c5   : > { %3273 = vmatpush.bf16.msra.mxu3 %v7126_v22  ;;  %3260 = vmatpush.bf16.msra.mxu1 %v6998_v36  ;;  %v8593_v22 = vld [vmem:[#allocation14 + $0x654] sm:$0xf0]  ;;  %v6914_v45 = vor.u32 %v8558_v31, %v6911_v32  ;;  %v8550_v35 = vld [vmem:[#allocation14 + $0x504] sm:$0xf] }
 0x2c6   : > { %3215 = vmatpush.bf16.msrb.mxu2 %v7134_v50  ;;  %7196 = vmatmul.msk.bf16.vlgmr.msrb.gmra.mxu3 %vm566_vm8, %v9912_v53  ;;  %v7046_v30 = vor.u32 %v8593_v22, %v7045_v19  ;;  %v7039_v50 = vld [vmem:[#allocation14 + $0x650] sm:$0xf0]  ;;  %v8623_v22 = vld [vmem:[#allocation14 + $0x74c] sm:$0xf] }
 0x2c7   : > { %v9920_v28 = vpop.f32.mrf.mxu3  ;;  %v7042_v42 = vor.u32 %v8590_v46, %v7039_v50  ;;  %v8571_v50 = vld [vmem:[#allocation14 + $0x5ac] sm:$0xf] }
 0x2c8   : > { %3222 = vmatpush.bf16.msra.mxu0 %v6978_v54  ;;  %v1984_v36 = vpop.f32.mrf.mxu0  ;;  %v1997_v34 = vpop.f32.mrf.mxu1  ;;  %v8554_v54 = vld [vmem:[#allocation14 + $0x524] sm:$0xf] }
 0x2c9   : > { %3274 = vmatpush.bf16.msra.mxu3 %v7110_v47  ;;  %3261 = vmatpush.bf16.msra.mxu1 %v6982_v56  ;;  %v8589_v47 = vld [vmem:[#allocation14 + $0x634] sm:$0xf0]  ;;  %v6895_v56 = vld [vmem:[#allocation14 + $0x530] sm:$0xf0]  ;;  %v7157_v34 = vld [vmem:[#allocation14 + $0x728] sm:$0xf] }
 0x2ca   : > { %3234 = vmatpush.bf16.msra.mxu2 %v7122_v12  ;;  %v2008_v52 = vpop.f32.mrf.mxu2  ;;  %v7030_v12 = vor.u32 %v8589_v47, %v7029_v39  ;;  %v6898_v9 = vor.u32 %v8554_v54, %v6895_v56  ;;  %v8619_v39 = vld [vmem:[#allocation14 + $0x72c] sm:$0xf]  ;;  %v7159_v47 = vld [vmem:[#allocation14 + $0x738] sm:$0xf0]  ;;  %v7158_v46 = vor.u32 %v8621_v38, %v7157_v34  ;;  %v7141_v54 = vld [vmem:[#allocation14 + $0x708] sm:$0xf] }
 0x2cb   : > { %7195 = vmatmul.msk.bf16.vlgmr.msrb.gmra.mxu2 %vm566_vm8, %v9912_v53  ;;  %v9922_v44 = vadd.f32 %v2008_v52, %v1996_v5  ;;  %v8617_v56 = vld [vmem:[#allocation14 + $0x714] sm:$0xf0]  ;;  %v8591_v38 = vld [vmem:[#allocation14 + $0x64c] sm:$0xf] }
 0x2cc   : > { %3223 = vmatpush.bf16.msra.mxu0 %v6962_v60  ;;  %v7142_v59 = vor.u32 %v8617_v56, %v7141_v54 }
 0x2cd   : > { %3275 = vmatpush.bf16.msra.mxu3 %v7094_v57  ;;  %3262 = vmatpush.bf16.msra.mxu1 %v6966_v63  ;;  %v8557_v57 = vld [vmem:[#allocation14 + $0x534] sm:$0xf0]  ;;  %v6879_v63 = vld [vmem:[#allocation14 + $0x510] sm:$0xf0] }
 0x2ce   : > { %3235 = vmatpush.bf16.msra.mxu2 %v7106_v40  ;;  %v6902_v60 = vor.u32 %v8557_v57, %v6901_v43  ;;  %v6882_v5 = vor.u32 %v8550_v35, %v6879_v63  ;;  %v8611_v43 = vld [vmem:[#allocation14 + $0x6ec] sm:$0xf]  ;;  %v7127_v57 = vld [vmem:[#allocation14 + $0x6f8] sm:$0xf0]  ;;  %v7146_v63 = vor.u32 %v8615_v62, %v7143_v58 }
 0x2cf   : > { %v2023_v40 = vpop.f32.mrf.mxu3  ;;  %v7130_v35 = vor.u32 %v8611_v43, %v7127_v57  ;;  %v8583_v57 = vld [vmem:[#allocation14 + $0x60c] sm:$0xf]  ;;  %v7015_v62 = vld [vmem:[#allocation14 + $0x618] sm:$0xf0] }
 0x2d0   : > { %3224 = vmatpush.bf16.msra.mxu0 %v6946_v7  ;;  %v9924_v1 = vpop.f32.mrf.mxu0  ;;  %v2060_v21 = vpop.f32.mrf.mxu1  ;;  %v7007_v7 = vld [vmem:[#allocation14 + $0x610] sm:$0xf0]  ;;  %v8567_v40 = vld [vmem:[#allocation14 + $0x58c] sm:$0xf]  ;;  %v7018_v58 = vor.u32 %v8583_v57, %v7015_v62 }
 0x2d1   : > { %3276 = vmatpush.bf16.msra.mxu3 %v7078_v0  ;;  %3263 = vmatpush.bf16.msra.mxu1 %v6950_v11  ;;  %v6885_v0 = vld [vmem:[#allocation14 + $0x508] sm:$0xf]  ;;  %v7190_v11 = vor.u32 %v8629_v2, %v7189_v18 }
 0x2d2   : > { %3236 = vmatpush.bf16.msra.mxu2 %v7090_v6  ;;  %v8582_v6 = vld [vmem:[#allocation14 + $0x604] sm:$0xf]  ;;  %v6886_v8 = vor.u32 %v8553_v37, %v6885_v0  ;;  %v2010_v10 = vpop.f32.mrf.mxu2  ;;  %v7111_v37 = vld [vmem:[#allocation14 + $0x6d8] sm:$0xf0] }
 0x2d3   : > { %v7010_v19 = vor.u32 %v8582_v6, %v7007_v7  ;;  %v6919_v10 = vld [vmem:[#allocation14 + $0x558] sm:$0xf0] }
 0x2d4   : > { %3225 = vmatpush.bf16.msra.mxu0 %v6930_v25 }
 0x2d5   : > { %3277 = vmatpush.bf16.msra.mxu3 %v7062_v14  ;;  %3264 = vmatpush.bf16.msra.mxu1 %v6934_v29  ;;  %v8579_v14 = vld [vmem:[#allocation14 + $0x5ec] sm:$0xf] }
 0x2d6   : > { %3237 = vmatpush.bf16.msra.mxu2 %v7074_v23  ;;  %v7175_v23 = vld [vmem:[#allocation14 + $0x758] sm:$0xf0]  ;;  %v7002_v25 = vor.u32 %v8579_v14, %v6999_v15  ;;  %v8575_v29 = vld [vmem:[#allocation14 + $0x5cc] sm:$0xf] }
 0x2d7   : > { %v2073_v26 = vpop.f32.mrf.mxu3  ;;  %v7178_v36 = vor.u32 %v8623_v22, %v7175_v23  ;;  %v8555_v22 = vld [vmem:[#allocation14 + $0x52c] sm:$0xf]  ;;  %v6903_v23 = vld [vmem:[#allocation14 + $0x538] sm:$0xf0] }
 0x2d8   : > { %3226 = vmatpush.bf16.msra.mxu0 %v6914_v45  ;;  %v2074_v31 = vadd.f32 %v2073_v26, %v2060_v21  ;;  %v2049_v32 = vpop.f32.mrf.mxu0  ;;  %v2062_v33 = vpop.f32.mrf.mxu1  ;;  %v8607_v21 = vld [vmem:[#allocation14 + $0x6cc] sm:$0xf]  ;;  %v7082_v26 = vor.u32 %v8599_v41, %v7079_v17 }
 0x2d9   : > { %3278 = vmatpush.bf16.msra.mxu3 %v7046_v30  ;;  %3265 = vmatpush.bf16.msra.mxu1 %v6918_v51  ;;  %v6983_v30 = vld [vmem:[#allocation14 + $0x5d8] sm:$0xf0]  ;;  %v7114_v4 = vor.u32 %v8607_v21, %v7111_v37 }
 0x2da   : > { %3238 = vmatpush.bf16.msra.mxu2 %v7058_v55  ;;  %v6986_v55 = vor.u32 %v8575_v29, %v6983_v30  ;;  %v2034_v45 = vpop.f32.mrf.mxu2  ;;  %v6967_v51 = vld [vmem:[#allocation14 + $0x5b8] sm:$0xf0]  ;;  %v6906_v29 = vor.u32 %v8555_v22, %v6903_v23  ;;  %v3342_v23 = vld [vmem:[#allocation16] sm:$0xf] }
 0x2db   : > { %v2035_v52 = vadd.f32 %v2034_v45, %v9920_v28  ;;  %v6887_v32 = vld [vmem:[#allocation14 + $0x518] sm:$0xf0] }
 0x2dc   : > { %3227 = vmatpush.bf16.msra.mxu0 %v6898_v9 }
 0x2dd   : > { %3279 = vmatpush.bf16.msra.mxu3 %v7030_v12  ;;  %3266 = vmatpush.bf16.msra.mxu1 %v6902_v60  ;;  %v7162_v12 = vor.u32 %v8619_v39, %v7159_v47  ;;  %v9932_v9 = vadd.f32 %v9924_v1, %v2035_v52  ;;  %v6951_v60 = vld [vmem:[#allocation14 + $0x598] sm:$0xf0]  ;;  %v8563_v1 = vld [vmem:[#allocation14 + $0x56c] sm:$0xf] }
 0x2de   : > { %3239 = vmatpush.bf16.msra.mxu2 %v7042_v42  ;;  %v6970_v42 = vor.u32 %v8571_v50, %v6967_v51  ;;  %v6954_v18 = vor.u32 %v8567_v40, %v6951_v60  ;;  %v8587_v51 = vld [vmem:[#allocation14 + $0x62c] sm:$0xf]  ;;  %v7031_v52 = vld [vmem:[#allocation14 + $0x638] sm:$0xf0] }
 0x2df   : > { %v2075_v49 = vpop.f32.mrf.mxu3  ;;  %v7034_v54 = vor.u32 %v8587_v51, %v7031_v52 }
 0x2e0   : > { %3228 = vmatpush.bf16.msra.mxu0 %v6882_v5  ;;  %v2125_v28 = vpop.f32.mrf.mxu1  ;;  %v7095_v5 = vld [vmem:[#allocation14 + $0x6b8] sm:$0xf0] }
 0x2e1   : > { %3280 = vmatpush.bf16.msra.mxu3 %v7014_v61  ;;  %3267 = vmatpush.bf16.msra.mxu1 %v6886_v8  ;;  %v2086_v61 = vpop.f32.mrf.mxu0  ;;  %v8559_v8 = vld [vmem:[#allocation14 + $0x54c] sm:$0xf] }
 0x2e2   : > { %3240 = vmatpush.bf16.msra.mxu2 %v7026_v3  ;;  %v9934_v0 = vadd.f32 %v2086_v61, %v2074_v31  ;;  %v2036_v2 = vpop.f32.mrf.mxu2  ;;  %v6935_v3 = vld [vmem:[#allocation14 + $0x578] sm:$0xf0]  ;;  %v8551_v31 = vld [vmem:[#allocation14 + $0x50c] sm:$0xf] }
 0x2e3   : > { %3229 = vmatmul.bf16.vlgmr.msra.gmra.mxu0 %v9904_v24  ;;  %v6938_v6 = vor.u32 %v8563_v1, %v6935_v3 }
 0x2e4   : > { %3281 = vmatmul.bf16.vlgmr.msra.gmra.mxu3 %v9909_v13  ;;  %3290 = vmatpush.bf16.msrb.mxu0 %v7190_v11 }
 0x2e5   : > { %3329 = vmatpush.bf16.msrb.mxu1 %v7194_v16  ;;  %v7098_v16 = vor.u32 %v8603_v20, %v7095_v5 }
 0x2e6   : > { %3241 = vmatpush.bf16.msra.mxu2 %v7010_v19  ;;  %3268 = vmatmul.bf16.vlgmr.msra.gmra.mxu1 %v9904_v24  ;;  %v6922_v19 = vor.u32 %v8559_v8, %v6919_v10 }
 0x2e7   : > { %v2546_v7 = vpop.f32.mrf.mxu3 }
 0x2e8   : > { %3291 = vmatpush.bf16.msrb.mxu0 %v7174_v27  ;;  %v2547_v11 = vadd.f32 %v2546_v7, %v9922_v44  ;;  %v2127_v15 = vpop.f32.mrf.mxu1  ;;  %v8595_v27 = vld [vmem:[#allocation14 + $0x66c] sm:$0xf]  ;;  %v7063_v44 = vld [vmem:[#allocation14 + $0x678] sm:$0xf0] }
 0x2e9   : > { %3242 = vmatmul.bf16.vlgmr.msra.gmra.mxu2 %v9909_v13  ;;  %3330 = vmatpush.bf16.msrb.mxu1 %v7178_v36  ;;  %v2088_v14 = vpop.f32.mrf.mxu0  ;;  %v7066_v33 = vor.u32 %v8595_v27, %v7063_v44  ;;  %v3356_v27 = vld [vmem:[#allocation17] sm:$0xf] }
 0x2ea   : > { %3299 = vmatpush.bf16.msrb.mxu2 %v7002_v25 }
 0x2ec   : > { %3292 = vmatpush.bf16.msrb.mxu0 %v7158_v46 }
 0x2ed   : > { %3331 = vmatpush.bf16.msrb.mxu1 %v7162_v12 }
 0x2ee   : > { %3300 = vmatpush.bf16.msrb.mxu2 %v6986_v55  ;;  %v2099_v25 = vpop.f32.mrf.mxu2  ;;  %v6890_v55 = vor.u32 %v8551_v31, %v6887_v32  ;;  %v3358_v31 = vperm.slane %v3356_v27, 0 }
 0x2ef   : > { %v2548_v30 = vpop.f32.mrf.mxu3 }
 0x2f0   : > { %3293 = vmatpush.bf16.msrb.mxu0 %v7142_v59 }
 0x2f1   : > { %3332 = vmatpush.bf16.msrb.mxu1 %v7146_v63  ;;  %v2112_v36 = vpop.f32.mrf.mxu0  ;;  %v2559_v34 = vpop.f32.mrf.mxu1 }
 0x2f2   : > { %3301 = vmatpush.bf16.msrb.mxu2 %v6970_v42  ;;  %v2113_v39 = vadd.f32 %v2112_v36, %v2099_v25  ;;  %v2560_v47 = vadd.f32 %v2559_v34, %v2547_v11 }
 0x2f3   : > { %7197 = vmatmul.msk.bf16.vlgmr.msrb.gmra.mxu0 %vm566_vm8, %v9912_v53 }
 0x2f4   : > { %3312 = vmatpush.bf16.msra.mxu0 %v7130_v35  ;;  %v2126_v50 = vadd.f32 %v2125_v28, %v2113_v39 }
 0x2f6   : > { %3302 = vmatpush.bf16.msrb.mxu2 %v6954_v18  ;;  %7198 = vmatmul.msk.bf16.vlgmr.msrb.gmra.mxu1 %vm566_vm8, %v9912_v53  ;;  %v7047_v53 = vld [vmem:[#allocation14 + $0x658] sm:$0xf0]  ;;  %v2101_v45 = vpop.f32.mrf.mxu2 }
 0x2f7   : > { %v7050_v46 = vor.u32 %v8591_v38, %v7047_v53 }
 0x2f8   : > { %3313 = vmatpush.bf16.msra.mxu0 %v7114_v4 }
 0x2f9   : > { %v2611_v12 = vpop.f32.mrf.mxu3  ;;  %v2114_v56 = vpop.f32.mrf.mxu0 }
 0x2fa   : > { %3303 = vmatpush.bf16.msrb.mxu2 %v6938_v6  ;;  %v2561_v43 = vpop.f32.mrf.mxu1 }
 0x2fb   : > { %v3359_v43 = vperm.slane %v3356_v27, 1 }
 0x2fc   : > { %3314 = vmatpush.bf16.msra.mxu0 %v7098_v16 }
 0x2fe   : > { %3304 = vmatpush.bf16.msrb.mxu2 %v6922_v19  ;;  %v2572_v42 = vpop.f32.mrf.mxu2 }
 0x2ff   : > { %v2573_v49 = vadd.f32 %v2572_v42, %v2560_v47 }
 0x300   : > { %3315 = vmatpush.bf16.msra.mxu0 %v7082_v26 }
 0x301   : > { %v2613_v59 = vpop.f32.mrf.mxu3 }
 0x302   : > { %3305 = vmatpush.bf16.msrb.mxu2 %v6906_v29  ;;  %v3344_v29 = vperm.slane %v3342_v23, 0 }
 0x304   : > { %3316 = vmatpush.bf16.msra.mxu0 %v7066_v33 }
 0x306   : > { %3306 = vmatpush.bf16.msrb.mxu2 %v6890_v55  ;;  %v2574_v40 = vpop.f32.mrf.mxu2 }
 0x308   : > { %3317 = vmatpush.bf16.msra.mxu0 %v7050_v46 }
 0x309   : > { %3307 = vmatmul.bf16.vlgmr.msrb.gmra.mxu2 %v9904_v24 }
 0x30c   : > { %3318 = vmatpush.bf16.msra.mxu0 %v7034_v54  ;;  %v3345_v54 = vperm.slane %v3342_v23, 1 }
 0x310   : > { %3319 = vmatpush.bf16.msra.mxu0 %v7018_v58  ;;  %v2585_v60 = vpop.f32.mrf.mxu0 }
 0x311   : > { %v2586_v61 = vadd.f32 %v2585_v60, %v9932_v9 }
 0x313   : > { %3320 = vmatmul.bf16.vlgmr.msra.gmra.mxu0 %v9909_v13  ;;  %v2624_v28 = vpop.f32.mrf.mxu1 }
 0x314   : > { %v2625_v35 = vadd.f32 %v2624_v28, %v9934_v0  ;;  %v3360_v28 = vperm.slane %v3356_v27, 2 }
 0x317   : > { %v2637_v24 = vpop.f32.mrf.mxu3 }
 0x318   : > { %v2638_v63 = vadd.f32 %v2637_v24, %v2625_v35  ;;  %v2587_v21 = vpop.f32.mrf.mxu0 }
 0x31b   : > { %v2626_v37 = vpop.f32.mrf.mxu1 }
 0x31e   : > { %v2598_v18 = vpop.f32.mrf.mxu2 }
 0x31f   : > { %v2599_v2 = vadd.f32 %v2598_v18, %v2586_v61  ;;  %v2639_v3 = vpop.f32.mrf.mxu3 }
 0x320   : > { %v2650_v4 = vpop.f32.mrf.mxu0 }
 0x321   : > { %v2612_v1 = vadd.f32 %v2611_v12, %v2599_v2  ;;  %v2651_v5 = vadd.f32 %v2650_v4, %v2638_v63 }
 0x323   : > { %v2689_v20 = vpop.f32.mrf.mxu1 }
 0x326   : > { %v2600_v6 = vpop.f32.mrf.mxu2 }
 0x328   : > { %v2652_v13 = vpop.f32.mrf.mxu0 }
 0x329   : > { %v3347_v13 = vperm.slane %v3342_v23, 3 }
 0x32b   : > { %v2691_v7 = vpop.f32.mrf.mxu1 }
 0x337   : > { %v3191_v8 = vpop.f32.mrf.mxu3 }
 0x33e   : > { %v2663_v10 = vpop.f32.mrf.mxu2 }
 0x33f   : > { %v2664_v9 = vadd.f32 %v2663_v10, %v2126_v50  ;;  %v3193_v11 = vpop.f32.mrf.mxu3 }
 0x340   : > { %v2676_v14 = vpop.f32.mrf.mxu0 }
 0x341   : > { %v2677_v0 = vadd.f32 %v2676_v14, %v2664_v9  ;;  %v3204_v15 = vpop.f32.mrf.mxu1 }
 0x342   : > { %v3205_v25 = vadd.f32 %v3204_v15, %v3191_v8  ;;  %v3361_v8 = vperm.slane %v3356_v27, 3  ;;  %v3394_v15 = vld [vmem:[#allocation5] ss:$8 sm:$0xf] }
 0x343   : > { %v2690_v16 = vadd.f32 %v2689_v20, %v2677_v0 }
 0x346   : > { %v2665_v41 = vpop.f32.mrf.mxu2 }
 0x348   : > { %v2678_v19 = vpop.f32.mrf.mxu0 }
 0x349   : > { %v3256_v17 = vpop.f32.mrf.mxu3  ;;  %v3206_v22 = vpop.f32.mrf.mxu1 }
 0x34e   : > { %v3217_v26 = vpop.f32.mrf.mxu2 }
 0x34f   : > { %v3218_v44 = vadd.f32 %v3217_v26, %v3205_v25 }
 0x351   : > { %v3338_v30 = vadd.f32 %v3218_v44, %v2573_v49  ;;  %v3258_v32 = vpop.f32.mrf.mxu3  ;;  %v3346_v49 = vperm.slane %v3342_v23, 2 }
 0x353   : > { %v3352_v33 = vmul.f32 %v3344_v29, %v3338_v30 }
 0x355   : > { %v3366_v36 = vadd.f32 %v3358_v31, %v3352_v33 }
 0x356   : > { %v3219_v34 = vpop.f32.mrf.mxu2 }
 0x357   : > { %v3370_v38 = vmax.f32 %v3366_v36, 0.0 }
 0x359   : > { %v3378_v53 = vrot.slane %v3370_v38, 7 }
 0x35b   : > { %3386 = vst [vmem:[#allocation5] sm:$0xfe] %v3378_v53 }
 0x35c   : > { %3390 = vst [vmem:[#allocation5 + $0x20] sm:$0x1] %v3378_v53 }
 0x360   : > { %v3230_v39 = vpop.f32.mrf.mxu0 }
 0x363   : > { %v3269_v47 = vpop.f32.mrf.mxu1 }
 0x367   : > { %v3282_v55 = vpop.f32.mrf.mxu3 }
 0x368   : > { %v3232_v45 = vpop.f32.mrf.mxu0  ;;  %v3283_v57 = vadd.f32 %v3282_v55, %v3269_v47 }
 0x36b   : > { %v3271_v46 = vpop.f32.mrf.mxu1 }
 0x36c   : > { %v3243_v50 = vpop.f32.mrf.mxu2  ;;  %v7569_v46 = vld [vmem:[#allocation19 + $0x5e0] sm:$0xf] }
 0x36d   : > { %v3244_v51 = vadd.f32 %v3243_v50, %v3230_v39  ;;  %v8820_v50 = vld [vmem:[#allocation19 + $0x5ec] sm:$0xf0] }
 0x36f   : > { %v3284_v52 = vpop.f32.mrf.mxu3  ;;  %v3257_v12 = vadd.f32 %v3256_v17, %v3244_v51  ;;  %v7553_v51 = vld [vmem:[#allocation19 + $0x5c0] sm:$0xf] }
 0x370   : > { %v3295_v58 = vpop.f32.mrf.mxu0 }
 0x371   : > { %v3339_v56 = vadd.f32 %v3257_v12, %v2612_v1  ;;  %v3296_v42 = vadd.f32 %v3295_v58, %v3283_v57  ;;  %v7570_v12 = vor.u32 %v8820_v50, %v7569_v46  ;;  %v8812_v58 = vld [vmem:[#allocation19 + $0x5ac] sm:$0xf0] }
 0x373   : > { %v3353_v62 = vmul.f32 %v3345_v54, %v3339_v56  ;;  %v3334_v59 = vpop.f32.mrf.mxu1  ;;  %v3340_v61 = vadd.f32 %v3296_v42, %v2651_v5  ;;  %v8816_v54 = vld [vmem:[#allocation19 + $0x5cc] sm:$0xf0]  ;;  %4217 = vmatpush.bf16.msra.mxu2 %v7570_v12  ;;  %v7313_v42 = vld [vmem:[#allocation19 + $0x3e0] sm:$0xf]  ;;  %v7305_v12 = vld [vmem:[#allocation19 + $0x3c8] sm:$0xf] }
 0x374   : > { %v3245_v40 = vpop.f32.mrf.mxu2 }
 0x375   : > { %v3367_v60 = vadd.f32 %v3359_v43, %v3353_v62  ;;  %v3354_v24 = vmul.f32 %v3346_v49, %v3340_v61  ;;  %v7554_v43 = vor.u32 %v8816_v54, %v7553_v51  ;;  %v7537_v62 = vld [vmem:[#allocation19 + $0x5a0] sm:$0xf]  ;;  %v8756_v49 = vld [vmem:[#allocation19 + $0x3ec] sm:$0xf0]  ;;  %v8753_v54 = vld [vmem:[#allocation19 + $0x3d4] sm:$0xf0] }
 0x376   : > { %v8788_v40 = vld [vmem:[#allocation19 + $0x4ec] sm:$0xf0]  ;;  %v7314_v61 = vor.u32 %v8756_v49, %v7313_v42  ;;  %v8742_v49 = vld [vmem:[#allocation19 + $0x384] sm:$0xf] }
 0x377   : > { %v3371_v35 = vmax.f32 %v3367_v60, 0.0  ;;  %v3368_v21 = vadd.f32 %v3360_v28, %v3354_v24  ;;  %v7315_v24 = vld [vmem:[#allocation19 + $0x3f0] sm:$0xf0]  ;;  %4218 = vmatpush.bf16.msra.mxu2 %v7554_v43  ;;  %v7306_v43 = vor.u32 %v8753_v54, %v7305_v12  ;;  %v8776_v42 = vld [vmem:[#allocation19 + $0x48c] sm:$0xf0] }
 0x378   : > { %v3297_v37 = vpop.f32.mrf.mxu0  ;;  %4191 = vmatpush.bf16.msrb.mxu3 %v7314_v61  ;;  %v7289_v61 = vld [vmem:[#allocation19 + $0x3a8] sm:$0xf]  ;;  %v8733_v54 = vld [vmem:[#allocation19 + $0x334] sm:$0xf0] }
 0x379   : > { %v3379_v63 = vrot.slane %v3371_v35, 7  ;;  %v3372_v18 = vmax.f32 %v3368_v21, 0.0  ;;  %v8754_v35 = vld [vmem:[#allocation19 + $0x3e4] sm:$0xf]  ;;  %v7521_v21 = vld [vmem:[#allocation19 + $0x580] sm:$0xf] }
 0x37a   : > { %v8808_v37 = vld [vmem:[#allocation19 + $0x58c] sm:$0xf0] }
 0x37b   : > { %3387 = vst [vmem:[#allocation5 + $0x8] sm:$0xfe] %v3379_v63  ;;  %v3336_v2 = vpop.f32.mrf.mxu1  ;;  %v3380_v1 = vrot.slane %v3372_v18, 7  ;;  %v7318_v18 = vor.u32 %v8754_v35, %v7315_v24  ;;  %v7249_v24 = vld [vmem:[#allocation19 + $0x360] sm:$0xf] }
 0x37c   : > { %3391 = vst [vmem:[#allocation5 + $0x28] sm:$0x1] %v3379_v63  ;;  %v7538_v63 = vor.u32 %v8812_v58, %v7537_v62  ;;  %v7297_v2 = vld [vmem:[#allocation19 + $0x3c0] sm:$0xf]  ;;  %v8744_v62 = vld [vmem:[#allocation19 + $0x38c] sm:$0xf0] }
 0x37d   : > { %3388 = vst [vmem:[#allocation5 + $0x10] sm:$0xfe] %v3380_v1  ;;  %4230 = vmatpush.bf16.msrb.mxu0 %v7318_v18  ;;  %v8772_v18 = vld [vmem:[#allocation19 + $0x46c] sm:$0xf0] }
 0x37e   : > { %3392 = vst [vmem:[#allocation5 + $0x30] sm:$0x1] %v3380_v1  ;;  %v8752_v1 = vld [vmem:[#allocation19 + $0x3cc] sm:$0xf0]  ;;  %4219 = vmatpush.bf16.msra.mxu2 %v7538_v63 }
 0x37f   : > { %v8740_v63 = vld [vmem:[#allocation19 + $0x36c] sm:$0xf0] }
 0x38c   : > { %v3308_v3 = vpop.f32.mrf.mxu2 }
 0x390   : > { %v3321_v4 = vpop.f32.mrf.mxu0 }
 0x391   : > { %v3322_v20 = vadd.f32 %v3321_v4, %v3308_v3  ;;  %v7425_v3 = vld [vmem:[#allocation19 + $0x4c0] sm:$0xf]  ;;  %v8784_v4 = vld [vmem:[#allocation19 + $0x4cc] sm:$0xf0] }
 0x393   : > { %v3335_v6 = vadd.f32 %v3334_v59, %v3322_v20  ;;  %v7441_v59 = vld [vmem:[#allocation19 + $0x4e0] sm:$0xf]  ;;  %v7298_v20 = vor.u32 %v8752_v1, %v7297_v2  ;;  %v8738_v2 = vld [vmem:[#allocation19 + $0x364] sm:$0xf]  ;;  %v7251_v1 = vld [vmem:[#allocation19 + $0x370] sm:$0xf0] }
 0x394   : > { %v3310_v7 = vpop.f32.mrf.mxu2  ;;  %v7442_v28 = vor.u32 %v8788_v40, %v7441_v59  ;;  %v7267_v59 = vld [vmem:[#allocation19 + $0x390] sm:$0xf0] }
 0x395   : > { %v3341_v5 = vadd.f32 %v3335_v6, %v2690_v16  ;;  %v7426_v6 = vor.u32 %v8784_v4, %v7425_v3  ;;  %v7299_v7 = vld [vmem:[#allocation19 + $0x3d0] sm:$0xf0]  ;;  %4192 = vmatpush.bf16.msrb.mxu3 %v7298_v20  ;;  %v7254_v4 = vor.u32 %v8738_v2, %v7251_v1  ;;  %v7273_v20 = vld [vmem:[#allocation19 + $0x388] sm:$0xf]  ;;  %v8785_v2 = vld [vmem:[#allocation19 + $0x4d4] sm:$0xf0] }
 0x396   : > { %4204 = vmatpush.bf16.msra.mxu1 %v7442_v28  ;;  %v8749_v28 = vld [vmem:[#allocation19 + $0x3b4] sm:$0xf0] }
 0x397   : > { %v3355_v10 = vmul.f32 %v3347_v13, %v3341_v5  ;;  %v8750_v13 = vld [vmem:[#allocation19 + $0x3c4] sm:$0xf]  ;;  %v7290_v35 = vor.u32 %v8749_v28, %v7289_v61 }
 0x398   : > { %v3323_v9 = vpop.f32.mrf.mxu0  ;;  %v7302_v5 = vor.u32 %v8750_v13, %v7299_v7  ;;  %v7233_v7 = vld [vmem:[#allocation19 + $0x340] sm:$0xf]  ;;  %v8782_v28 = vld [vmem:[#allocation19 + $0x4c4] sm:$0xf] }
 0x399   : > { %v3369_v11 = vadd.f32 %v3361_v8, %v3355_v10  ;;  %v7281_v8 = vld [vmem:[#allocation19 + $0x3a0] sm:$0xf]  ;;  %v8748_v10 = vld [vmem:[#allocation19 + $0x3ac] sm:$0xf0]  ;;  %v7522_v9 = vor.u32 %v8808_v37, %v7521_v21  ;;  %v7250_v37 = vor.u32 %v8740_v63, %v7249_v24  ;;  %v8814_v24 = vld [vmem:[#allocation19 + $0x5c4] sm:$0xf] }
 0x39a   : > { %4205 = vmatpush.bf16.msra.mxu1 %v7426_v6  ;;  %4231 = vmatpush.bf16.msrb.mxu0 %v7302_v5  ;;  %v7377_v21 = vld [vmem:[#allocation19 + $0x460] sm:$0xf]  ;;  %v8745_v6 = vld [vmem:[#allocation19 + $0x394] sm:$0xf0]  ;;  %v8736_v5 = vld [vmem:[#allocation19 + $0x34c] sm:$0xf0] }
 0x39b   : > { %v3373_v14 = vmax.f32 %v3369_v11, 0.0  ;;  %v7409_v11 = vld [vmem:[#allocation19 + $0x4a0] sm:$0xf]  ;;  %4220 = vmatpush.bf16.msra.mxu2 %v7522_v9  ;;  %v7378_v3 = vor.u32 %v8772_v18, %v7377_v21  ;;  %v7274_v13 = vor.u32 %v8745_v6, %v7273_v20  ;;  %v8768_v9 = vld [vmem:[#allocation19 + $0x44c] sm:$0xf0] }
 0x39c   : > { %v7433_v18 = vld [vmem:[#allocation19 + $0x4c8] sm:$0xf]  ;;  %v8778_v20 = vld [vmem:[#allocation19 + $0x4a4] sm:$0xf]  ;;  %v7411_v6 = vld [vmem:[#allocation19 + $0x4b0] sm:$0xf0] }
 0x39d   : > { %v3381_v0 = vrot.slane %v3373_v14, 7  ;;  %v8780_v14 = vld [vmem:[#allocation19 + $0x4ac] sm:$0xf0] }
 0x39f   : > { %3389 = vst [vmem:[#allocation5 + $0x18] sm:$0xfe] %v3381_v0 }
 0x3a0   : > { %3393 = vst [vmem:[#allocation5 + $0x38] sm:$0x1] %v3381_v0  ;;  %v8746_v0 = vld [vmem:[#allocation19 + $0x3a4] sm:$0xf] }
 0x3a6   : > { %v3396_v41 = vld [vmem:[#allocation5 + $0x1] ss:$8 sm:$0xf]  ;;  %v3403_v19 = vld [vmem:[#allocation5 + $0x2] ss:$8 sm:$0xf] }
 0x3a7   : > { %v3397_v17 = vmax.f32 %v3394_v15, %v3396_v41  ;;  %v3405_v22 = vld [vmem:[#allocation5 + $0x3] ss:$8 sm:$0xf]  ;;  %v3399_v25 = vld [vmem:[#allocation5 + $0x2] ss:$8 sm:$0xf] }
 0x3a8   : > { %v3406_v26 = vmax.f32 %v3403_v19, %v3405_v22  ;;  %v3412_v44 = vld [vmem:[#allocation5 + $0x4] ss:$8 sm:$0xf]  ;;  %v3414_v30 = vld [vmem:[#allocation5 + $0x5] ss:$8 sm:$0xf]  ;;  %v7410_v22 = vor.u32 %v8780_v14, %v7409_v11 }
 0x3a9   : > { %v3400_v29 = vmax.f32 %v3397_v17, %v3399_v25  ;;  %v3408_v23 = vld [vmem:[#allocation5 + $0x4] ss:$8 sm:$0xf]  ;;  %v3415_v27 = vmax.f32 %v3412_v44, %v3414_v30  ;;  %v3421_v31 = vld [vmem:[#allocation5 + $0x6] ss:$8 sm:$0xf]  ;;  %v7282_v17 = vor.u32 %v8748_v10, %v7281_v8  ;;  %v7234_v10 = vor.u32 %v8736_v5, %v7233_v7 }
 0x3aa   : > { %v3409_v16 = vmax.f32 %v3406_v26, %v3408_v23  ;;  %v3423_v32 = vld [vmem:[#allocation5 + $0x7] ss:$8 sm:$0xf]  ;;  %v3417_v33 = vld [vmem:[#allocation5 + $0x6] ss:$8 sm:$0xf]  ;;  %4206 = vmatpush.bf16.msra.mxu1 %v7410_v22  ;;  %v7414_v7 = vor.u32 %v8778_v20, %v7411_v6 }
 0x3ab   : > { %v3424_v36 = vmax.f32 %v3421_v31, %v3423_v32  ;;  %3401 = vst.msk [vmem:[#allocation7] ss:$8 sm:$0xf] %vm9733_vm4, %v3400_v29  ;;  %v3418_v34 = vmax.f32 %v3415_v27, %v3417_v33  ;;  %v3426_v38 = vld [vmem:[#allocation5 + $0x20] ss:$8 sm:$0xf]  ;;  %4193 = vmatpush.bf16.msrb.mxu3 %v7282_v17 }
 0x3ac   : > { %3410 = vst.msk [vmem:[#allocation7 + $0x1] ss:$8 sm:$0xf] %vm9733_vm4, %v3409_v16  ;;  %v7505_v15 = vld [vmem:[#allocation19 + $0x560] sm:$0xf] }
 0x3ad   : > { %v3427_v53 = vmax.f32 %v3424_v36, %v3426_v38  ;;  %3419 = vst.msk [vmem:[#allocation7 + $0x2] ss:$8 sm:$0xf] %vm9733_vm4, %v3418_v34  ;;  %v8804_v41 = vld [vmem:[#allocation19 + $0x56c] sm:$0xf0] }
 0x3ae   : > { %v7283_v19 = vld [vmem:[#allocation19 + $0x3b0] sm:$0xf0]  ;;  %v7506_v26 = vor.u32 %v8804_v41, %v7505_v15  ;;  %v7489_v44 = vld [vmem:[#allocation19 + $0x540] sm:$0xf]  ;;  %v8800_v29 = vld [vmem:[#allocation19 + $0x54c] sm:$0xf0] }
 0x3af   : > { %3428 = vst.msk [vmem:[#allocation7 + $0x3] ss:$8 sm:$0xf] %vm9733_vm4, %v3427_v53  ;;  %v7286_v25 = vor.u32 %v8746_v0, %v7283_v19  ;;  %v7490_v23 = vor.u32 %v8800_v29, %v7489_v44  ;;  %v7473_v30 = vld [vmem:[#allocation19 + $0x520] sm:$0xf] }
 0x3b0   : > { %4221 = vmatpush.bf16.msra.mxu2 %v7506_v26  ;;  %v8796_v16 = vld [vmem:[#allocation19 + $0x52c] sm:$0xf0]  ;;  %v7457_v31 = vld [vmem:[#allocation19 + $0x500] sm:$0xf]  ;;  %v7321_v36 = vld [vmem:[#allocation19 + $0x3e8] sm:$0xf] }
 0x3b1   : > { %4232 = vmatpush.bf16.msrb.mxu0 %v7286_v25  ;;  %v7474_v27 = vor.u32 %v8796_v16, %v7473_v30  ;;  %v8792_v32 = vld [vmem:[#allocation19 + $0x50c] sm:$0xf0]  ;;  %v8757_v34 = vld [vmem:[#allocation19 + $0x3f4] sm:$0xf0]  ;;  %v7361_v8 = vld [vmem:[#allocation19 + $0x440] sm:$0xf] }
 0x3b2   : > { %v7458_v46 = vor.u32 %v8792_v32, %v7457_v31  ;;  %v7322_v51 = vor.u32 %v8757_v34, %v7321_v36  ;;  %v8734_v11 = vld [vmem:[#allocation19 + $0x344] sm:$0xf]  ;;  %v7235_v14 = vld [vmem:[#allocation19 + $0x350] sm:$0xf0]  ;;  %v7362_v0 = vor.u32 %v8768_v9, %v7361_v8  ;;  %v7257_v41 = vld [vmem:[#allocation19 + $0x368] sm:$0xf] }
 0x3b3   : > { %v7238_v15 = vor.u32 %v8734_v11, %v7235_v14  ;;  %v8741_v17 = vld [vmem:[#allocation19 + $0x374] sm:$0xf0]  ;;  %v7217_v22 = vld [vmem:[#allocation19 + $0x320] sm:$0xf]  ;;  %v8732_v25 = vld [vmem:[#allocation19 + $0x32c] sm:$0xf0] }
 0x3b4   : > { %4222 = vmatpush.bf16.msra.mxu2 %v7490_v23  ;;  %v7258_v19 = vor.u32 %v8741_v17, %v7257_v41  ;;  %v7345_v26 = vld [vmem:[#allocation19 + $0x420] sm:$0xf]  ;;  %v7218_v44 = vor.u32 %v8732_v25, %v7217_v22  ;;  %v8764_v29 = vld [vmem:[#allocation19 + $0x42c] sm:$0xf0]  ;;  %v8730_v23 = vld [vmem:[#allocation19 + $0x324] sm:$0xf] }
 0x3b5   : > { %v7219_v30 = vld [vmem:[#allocation19 + $0x330] sm:$0xf0]  ;;  %v7346_v16 = vor.u32 %v8764_v29, %v7345_v26  ;;  %v7241_v31 = vld [vmem:[#allocation19 + $0x348] sm:$0xf]  ;;  %v8737_v32 = vld [vmem:[#allocation19 + $0x354] sm:$0xf0] }
 0x3b6   : > { %v3433_v39 = vld [vmem:[#allocation7 + $0x18] sm:$0xf]  ;;  %v9953_v47 = vld [vmem:[#allocation7 + $0x8] sm:$0xf]  ;;  %v9955_v55 = vld [vmem:[#allocation7] sm:$0xf]  ;;  %v7242_v36 = vor.u32 %v8737_v32, %v7241_v31 }
 0x3b7   : > { %3470 = vrot.lane.b32.xlu2 %v3433_v39, %s9470_s21  ;;  %3447 = vrot.lane.b32.xlu0 %v9953_v47, %s9470_s21  ;;  %v9962_v45 = vld [vmem:[#allocation7 + $0x10] sm:$0xf]  ;;  %v7539_v5 = vld [vmem:[#allocation19 + $0x5b0] sm:$0xf0]  ;;  %v7417_v8 = vld [vmem:[#allocation19 + $0x4a8] sm:$0xf] }
 0x3b8   : > { %3435 = vrot.lane.b32.xlu1 %v9955_v55, %s9470_s21  ;;  %4223 = vmatpush.bf16.msra.mxu2 %v7474_v27  ;;  %v7222_v27 = vor.u32 %v8730_v23, %v7219_v30  ;;  %v8728_v34 = vld [vmem:[#allocation19 + $0x30c] sm:$0xf0]  ;;  %v8774_v14 = vld [vmem:[#allocation19 + $0x484] sm:$0xf]  ;;  %v7523_v41 = vld [vmem:[#allocation19 + $0x590] sm:$0xf0] }
 0x3b9   : > { %v8777_v22 = vld [vmem:[#allocation19 + $0x494] sm:$0xf0]  ;;  %v8770_v29 = vld [vmem:[#allocation19 + $0x464] sm:$0xf]  ;;  %v7379_v23 = vld [vmem:[#allocation19 + $0x470] sm:$0xf0] }
 0x3ba   : > { %v7385_v31 = vld [vmem:[#allocation19 + $0x468] sm:$0xf]  ;;  %v8773_v32 = vld [vmem:[#allocation19 + $0x474] sm:$0xf0]  ;;  %v7451_v20 = vld [vmem:[#allocation19 + $0x4f8] sm:$0xf0] }
 0x3bc   : > { %4224 = vmatpush.bf16.msra.mxu2 %v7458_v46 }
 0x3bf   : > { %3460 = vrot.lane.b32.xlu2 %v9962_v45, %s9470_s21 }
 0x3c0   : > { %4269 = vmatpush.bf16.msrb.mxu2 %v7322_v51  ;;  %v7203_v51 = vld [vmem:[#allocation19 + $0x310] sm:$0xf0] }
 0x3c4   : > { %4270 = vmatpush.bf16.msrb.mxu2 %v7306_v43  ;;  %v7443_v43 = vld [vmem:[#allocation19 + $0x4f0] sm:$0xf0] }
 0x3c8   : > { %4271 = vmatpush.bf16.msrb.mxu2 %v7290_v35  ;;  %v7427_v35 = vld [vmem:[#allocation19 + $0x4d0] sm:$0xf0] }
 0x3c9   : > { %v7430_v21 = vor.u32 %v8782_v28, %v7427_v35  ;;  %v8758_v28 = vld [vmem:[#allocation19 + $0x404] sm:$0xf]  ;;  %v7331_v35 = vld [vmem:[#allocation19 + $0x410] sm:$0xf0] }
 0x3cc   : > { %4272 = vmatpush.bf16.msrb.mxu2 %v7274_v13  ;;  %v8810_v13 = vld [vmem:[#allocation19 + $0x5a4] sm:$0xf] }
 0x3cd   : > { %v7542_v9 = vor.u32 %v8810_v13, %v7539_v5 }
 0x3d0   : > { %4273 = vmatpush.bf16.msrb.mxu2 %v7258_v19  ;;  %v7401_v19 = vld [vmem:[#allocation19 + $0x488] sm:$0xf] }
 0x3d4   : > { %4274 = vmatpush.bf16.msrb.mxu2 %v7242_v36 }
 0x411   : > { %v3471_v52 = vpop.permute.xlu2 %3470 }
 0x412   : > { %v3473_v56 = vmax.f32 %v9962_v45, %v3471_v52 }
 0x414   : > { %v3474_v57 = vmax.f32 %v3473_v56, %v3433_v39 }
 0x416   : > { %v3476_v60 = vrot.slane %v3474_v57, 7  ;;  %v7265_v57 = vld [vmem:[#allocation19 + $0x380] sm:$0xf] }
 0x417   : > { %v7266_v58 = vor.u32 %v8744_v62, %v7265_v57 }
 0x418   : > { %3477 = vrot.lane.b32.xlu0 %v3476_v60, %s9470_s21  ;;  %v7270_v60 = vor.u32 %v8742_v49, %v7267_v59  ;;  %v8789_v59 = vld [vmem:[#allocation19 + $0x4f4] sm:$0xf0] }
 0x419   : > { %4194 = vmatpush.bf16.msrb.mxu3 %v7266_v58  ;;  %v7571_v58 = vld [vmem:[#allocation19 + $0x5f0] sm:$0xf0]  ;;  %v9973_v1 = vpop.permute.xlu2 %3460 }
 0x41a   : > { %4233 = vmatpush.bf16.msrb.mxu0 %v7270_v60  ;;  %v8729_v60 = vld [vmem:[#allocation19 + $0x314] sm:$0xf0] }
 0x41d   : > { %4195 = vmatpush.bf16.msrb.mxu3 %v7250_v37  ;;  %v7555_v37 = vld [vmem:[#allocation19 + $0x5d0] sm:$0xf0] }
 0x41e   : > { %4234 = vmatpush.bf16.msrb.mxu0 %v7254_v4  ;;  %v7434_v4 = vor.u32 %v8785_v2, %v7433_v18  ;;  %v7334_v2 = vor.u32 %v8758_v28, %v7331_v35  ;;  %v7953_v28 = vld [vmem:[#allocation19 + $0x2e0] sm:$0xf]  ;;  %v8724_v35 = vld [vmem:[#allocation19 + $0x2ec] sm:$0xf0] }
 0x421   : > { %4196 = vmatpush.bf16.msrb.mxu3 %v7234_v10  ;;  %v8781_v10 = vld [vmem:[#allocation19 + $0x4b4] sm:$0xf0] }
 0x422   : > { %4235 = vmatpush.bf16.msrb.mxu0 %v7238_v15  ;;  %v7418_v11 = vor.u32 %v8781_v10, %v7417_v8  ;;  %v8806_v15 = vld [vmem:[#allocation19 + $0x584] sm:$0xf] }
 0x423   : > { %v7526_v26 = vor.u32 %v8806_v15, %v7523_v41  ;;  %v8779_v41 = vld [vmem:[#allocation19 + $0x4ac] sm:$0xf] }
 0x425   : > { %4197 = vmatpush.bf16.msrb.mxu3 %v7218_v44  ;;  %v7402_v44 = vor.u32 %v8777_v22, %v7401_v19  ;;  %v8775_v22 = vld [vmem:[#allocation19 + $0x48c] sm:$0xf] }
 0x426   : > { %4236 = vmatpush.bf16.msrb.mxu0 %v7222_v27  ;;  %v7507_v27 = vld [vmem:[#allocation19 + $0x570] sm:$0xf0] }
 0x429   : > { %v3448_v33 = vpop.permute.xlu0 %3447 }
 0x42a   : > { %v3450_v38 = vmax.f32 %v9955_v55, %v3448_v33  ;;  %v3436_v53 = vpop.permute.xlu1 %3435  ;;  %v7201_v33 = vld [vmem:[#allocation19 + $0x300] sm:$0xf] }
 0x42b   : > { %v3438_v39 = vmax.f32 %v9955_v55, %v3436_v53  ;;  %v7393_v55 = vld [vmem:[#allocation19 + $0x480] sm:$0xf]  ;;  %v8760_v53 = vld [vmem:[#allocation19 + $0x40c] sm:$0xf0] }
 0x42c   : > { %v3451_v50 = vmax.f32 %v3450_v38, %v9953_v47  ;;  %v7394_v40 = vor.u32 %v8776_v42, %v7393_v55  ;;  %v7329_v38 = vld [vmem:[#allocation19 + $0x400] sm:$0xf]  ;;  %v8818_v55 = vld [vmem:[#allocation19 + $0x5e4] sm:$0xf]  ;;  %v7449_v42 = vld [vmem:[#allocation19 + $0x4e8] sm:$0xf] }
 0x42d   : > { %v3440_v52 = vrot.slane %v3438_v39, 7  ;;  %v7202_v39 = vor.u32 %v8728_v34, %v7201_v33  ;;  %v7330_v46 = vor.u32 %v8760_v53, %v7329_v38  ;;  %v7574_v49 = vor.u32 %v8818_v55, %v7571_v58  ;;  %v8766_v38 = vld [vmem:[#allocation19 + $0x444] sm:$0xf]  ;;  %v7363_v53 = vld [vmem:[#allocation19 + $0x450] sm:$0xf0] }
 0x42e   : > { %v3453_v56 = vrot.slane %v3451_v50, 7  ;;  %4207 = vmatpush.bf16.msra.mxu1 %v7394_v40  ;;  %v8726_v50 = vld [vmem:[#allocation19 + $0x304] sm:$0xf]  ;;  %v7209_v40 = vld [vmem:[#allocation19 + $0x308] sm:$0xf]  ;;  %v7450_v61 = vor.u32 %v8789_v59, %v7449_v42  ;;  %v7382_v33 = vor.u32 %v8770_v29, %v7379_v23  ;;  %v7386_v34 = vor.u32 %v8773_v32, %v7385_v31 }
 0x42f   : > { %3441 = vrot.lane.b32.xlu2 %v3440_v52, %s9470_s21  ;;  %v7225_v52 = vld [vmem:[#allocation19 + $0x328] sm:$0xf]  ;;  %v7206_v12 = vor.u32 %v8726_v50, %v7203_v51  ;;  %4198 = vmatpush.bf16.msrb.mxu3 %v7202_v39  ;;  %v7210_v63 = vor.u32 %v8729_v60, %v7209_v40  ;;  %v8798_v39 = vld [vmem:[#allocation19 + $0x544] sm:$0xf]  ;;  %v8769_v51 = vld [vmem:[#allocation19 + $0x454] sm:$0xf0] }
 0x430   : > { %3454 = vrot.lane.b32.xlu1 %v3453_v56, %s9470_s21  ;;  %v8786_v56 = vld [vmem:[#allocation19 + $0x4e4] sm:$0xf]  ;;  %v7226_v57 = vor.u32 %v8733_v54, %v7225_v52  ;;  %v7369_v50 = vld [vmem:[#allocation19 + $0x448] sm:$0xf]  ;;  %v7366_v52 = vor.u32 %v8766_v38, %v7363_v53  ;;  %v8765_v42 = vld [vmem:[#allocation19 + $0x434] sm:$0xf0] }
 0x431   : > { %v7446_v62 = vor.u32 %v8786_v56, %v7443_v43  ;;  %4237 = vmatpush.bf16.msrb.mxu0 %v7206_v12  ;;  %v8762_v12 = vld [vmem:[#allocation19 + $0x424] sm:$0xf]  ;;  %v7370_v56 = vor.u32 %v8769_v51, %v7369_v50  ;;  %v7347_v43 = vld [vmem:[#allocation19 + $0x430] sm:$0xf0]  ;;  %v7353_v58 = vld [vmem:[#allocation19 + $0x428] sm:$0xf] }
 0x432   : > { %4208 = vmatpush.bf16.msra.mxu1 %v7378_v3  ;;  %4275 = vmatpush.bf16.msrb.mxu2 %v7226_v57  ;;  %v7558_v3 = vor.u32 %v8814_v24, %v7555_v37  ;;  %v8794_v57 = vld [vmem:[#allocation19 + $0x524] sm:$0xf]  ;;  %v7350_v59 = vor.u32 %v8762_v12, %v7347_v43  ;;  %v8761_v37 = vld [vmem:[#allocation19 + $0x414] sm:$0xf0]  ;;  %v7371_v31 = vld [vmem:[#allocation19 + $0x458] sm:$0xf0] }
 0x433   : > { %4243 = vmatpush.bf16.msra.mxu3 %v7446_v62  ;;  %v7475_v62 = vld [vmem:[#allocation19 + $0x530] sm:$0xf0]  ;;  %v8790_v24 = vld [vmem:[#allocation19 + $0x504] sm:$0xf]  ;;  %v7355_v38 = vld [vmem:[#allocation19 + $0x438] sm:$0xf0] }
 0x434   : > { %v7478_v60 = vor.u32 %v8794_v57, %v7475_v62  ;;  %v7577_v51 = vld [vmem:[#allocation19 + $0x5e8] sm:$0xf]  ;;  %v8819_v43 = vld [vmem:[#allocation19 + $0x5ec] sm:$0xf] }
 0x435   : > { %4282 = vmatpush.bf16.msra.mxu0 %v7450_v61  ;;  %v7354_v61 = vor.u32 %v8765_v42, %v7353_v58  ;;  %v7579_v42 = vld [vmem:[#allocation19 + $0x5f8] sm:$0xf0] }
 0x436   : > { %4209 = vmatpush.bf16.msra.mxu1 %v7362_v0  ;;  %4276 = vmatpush.bf16.msrb.mxu2 %v7210_v63  ;;  %v7395_v0 = vld [vmem:[#allocation19 + $0x490] sm:$0xf0] }
 0x437   : > { %4244 = vmatpush.bf16.msra.mxu3 %v7430_v21  ;;  %v7398_v17 = vor.u32 %v8774_v14, %v7395_v0  ;;  %v7459_v63 = vld [vmem:[#allocation19 + $0x510] sm:$0xf0]  ;;  %v7337_v21 = vld [vmem:[#allocation19 + $0x408] sm:$0xf]  ;;  %v7435_v14 = vld [vmem:[#allocation19 + $0x4d8] sm:$0xf0] }
 0x438   : > { %v7462_v6 = vor.u32 %v8790_v24, %v7459_v63  ;;  %v7338_v13 = vor.u32 %v8761_v37, %v7337_v21  ;;  %v7582_v63 = vor.u32 %v8819_v43, %v7579_v42  ;;  %v7561_v21 = vld [vmem:[#allocation19 + $0x5c8] sm:$0xf]  ;;  %v8817_v37 = vld [vmem:[#allocation19 + $0x5d4] sm:$0xf0] }
 0x439   : > { %4283 = vmatpush.bf16.msra.mxu0 %v7434_v4  ;;  %v8787_v4 = vld [vmem:[#allocation19 + $0x4ec] sm:$0xf] }
 0x43a   : > { %4210 = vmatpush.bf16.msra.mxu1 %v7346_v16  ;;  %v8802_v16 = vld [vmem:[#allocation19 + $0x564] sm:$0xf]  ;;  %v7454_v10 = vor.u32 %v8787_v4, %v7451_v20  ;;  %v7307_v4 = vld [vmem:[#allocation19 + $0x3d8] sm:$0xf0]  ;;  %v8815_v20 = vld [vmem:[#allocation19 + $0x5cc] sm:$0xf] }
 0x43b   : > { %4245 = vmatpush.bf16.msra.mxu3 %v7414_v7  ;;  %v7510_v36 = vor.u32 %v8802_v16, %v7507_v27  ;;  %v3463_v7 = vmax.f32 %v9953_v47, %v9973_v1  ;;  %v8767_v27 = vld [vmem:[#allocation19 + $0x44c] sm:$0xf] }
 0x43d   : > { %4284 = vmatpush.bf16.msra.mxu0 %v7418_v11  ;;  %v8783_v11 = vld [vmem:[#allocation19 + $0x4cc] sm:$0xf]  ;;  %v3464_v0 = vmax.f32 %v3463_v7, %v9962_v45  ;;  %v7387_v45 = vld [vmem:[#allocation19 + $0x478] sm:$0xf0]  ;;  %v7562_v7 = vor.u32 %v8817_v37, %v7561_v21  ;;  %v7481_v37 = vld [vmem:[#allocation19 + $0x528] sm:$0xf] }
 0x43e   : > { %4211 = vmatpush.bf16.msra.mxu1 %v7330_v46  ;;  %v7491_v46 = vld [vmem:[#allocation19 + $0x550] sm:$0xf0]  ;;  %v7438_v15 = vor.u32 %v8783_v11, %v7435_v14  ;;  %v7545_v14 = vld [vmem:[#allocation19 + $0x5a8] sm:$0xf] }
 0x43f   : > { %4246 = vmatpush.bf16.msra.mxu3 %v7398_v17  ;;  %v7494_v54 = vor.u32 %v8798_v39, %v7491_v46  ;;  %v7419_v17 = vld [vmem:[#allocation19 + $0x4b8] sm:$0xf0]  ;;  %v3466_v47 = vrot.slane %v3464_v0, 7  ;;  %v8813_v0 = vld [vmem:[#allocation19 + $0x5b4] sm:$0xf0] }
 0x440   : > { %v7422_v19 = vor.u32 %v8779_v41, %v7419_v17  ;;  %v7291_v41 = vld [vmem:[#allocation19 + $0x3b8] sm:$0xf0]  ;;  %v8811_v17 = vld [vmem:[#allocation19 + $0x5ac] sm:$0xf] }
 0x441   : > { %4285 = vmatpush.bf16.msra.mxu0 %v7402_v44  ;;  %v8771_v44 = vld [vmem:[#allocation19 + $0x46c] sm:$0xf] }
 0x442   : > { %4256 = vmatpush.bf16.msrb.mxu1 %v7574_v49 }
 0x443   : > { %4247 = vmatpush.bf16.msra.mxu3 %v7382_v33 }
 0x445   : > { %4286 = vmatpush.bf16.msra.mxu0 %v7386_v34  ;;  %v8763_v34 = vld [vmem:[#allocation19 + $0x42c] sm:$0xf] }
 0x446   : > { %4257 = vmatpush.bf16.msrb.mxu1 %v7558_v3  ;;  %v7358_v12 = vor.u32 %v8763_v34, %v7355_v38  ;;  %v7513_v34 = vld [vmem:[#allocation19 + $0x568] sm:$0xf]  ;;  %v8805_v38 = vld [vmem:[#allocation19 + $0x574] sm:$0xf0] }
 0x447   : > { %4248 = vmatpush.bf16.msra.mxu3 %v7366_v52  ;;  %v8821_v52 = vld [vmem:[#allocation19 + $0x5f4] sm:$0xf0] }
 0x449   : > { %4287 = vmatpush.bf16.msra.mxu0 %v7370_v56  ;;  %v7323_v56 = vld [vmem:[#allocation19 + $0x3f8] sm:$0xf0] }
 0x44a   : > { %4258 = vmatpush.bf16.msrb.mxu1 %v7542_v9 }
 0x44b   : > { %4249 = vmatpush.bf16.msra.mxu3 %v7350_v59  ;;  %v7339_v59 = vld [vmem:[#allocation19 + $0x418] sm:$0xf0] }
 0x44d   : > { %4288 = vmatpush.bf16.msra.mxu0 %v7354_v61  ;;  %v7578_v61 = vor.u32 %v8821_v52, %v7577_v51  ;;  %v8803_v51 = vld [vmem:[#allocation19 + $0x56c] sm:$0xf]  ;;  %v7515_v52 = vld [vmem:[#allocation19 + $0x578] sm:$0xf0] }
 0x44e   : > { %4259 = vmatpush.bf16.msrb.mxu1 %v7526_v26 }
 0x44f   : > { %4250 = vmatpush.bf16.msra.mxu3 %v7334_v2  ;;  %v8751_v2 = vld [vmem:[#allocation19 + $0x3cc] sm:$0xf] }
 0x451   : > { %4289 = vmatpush.bf16.msra.mxu0 %v7338_v13  ;;  %v7954_v13 = vor.u32 %v8724_v35, %v7953_v28  ;;  %v7889_v28 = vld [vmem:[#allocation19 + $0x260] sm:$0xf]  ;;  %v8708_v35 = vld [vmem:[#allocation19 + $0x26c] sm:$0xf0] }
 0x452   : > { %4260 = vmatpush.bf16.msrb.mxu1 %v7510_v36  ;;  %v7374_v36 = vor.u32 %v8767_v27, %v7371_v31  ;;  %v7531_v27 = vld [vmem:[#allocation19 + $0x598] sm:$0xf0] }
 0x456   : > { %4261 = vmatpush.bf16.msrb.mxu1 %v7494_v54  ;;  %v8755_v54 = vld [vmem:[#allocation19 + $0x3ec] sm:$0xf] }
 0x457   : > { %v7326_v24 = vor.u32 %v8755_v54, %v7323_v56  ;;  %v8712_v54 = vld [vmem:[#allocation19 + $0x28c] sm:$0xf0]  ;;  %v7514_v56 = vor.u32 %v8805_v38, %v7513_v34  ;;  %v7681_v38 = vld [vmem:[#allocation19 + $0xc0] sm:$0xf] }
 0x45a   : > { %4262 = vmatpush.bf16.msrb.mxu1 %v7478_v60 }
 0x45e   : > { %4263 = vmatpush.bf16.msrb.mxu1 %v7462_v6  ;;  %v7563_v6 = vld [vmem:[#allocation19 + $0x5d8] sm:$0xf0] }
 0x45f   : > { %v7566_v11 = vor.u32 %v8815_v20, %v7563_v6  ;;  %v7227_v20 = vld [vmem:[#allocation19 + $0x338] sm:$0xf0]  ;;  %v8795_v6 = vld [vmem:[#allocation19 + $0x52c] sm:$0xf] }
 0x489   : > { %v3442_v25 = vpop.permute.xlu2 %3441 }
 0x48a   : > { %3445 = vst.msk [vmem:[#allocation3] sm:$0x1e] %vm3444_vm0, %v3442_v25  ;;  %v3478_v30 = vpop.permute.xlu0 %3477  ;;  %v7403_v25 = vld [vmem:[#allocation19 + $0x498] sm:$0xf0] }
 0x48b   : > { %3480 = vst.msk [vmem:[#allocation3 + $0x10] sm:$0x1e] %vm3457_vm1, %v3478_v30  ;;  %v7406_v26 = vor.u32 %v8775_v22, %v7403_v25  ;;  %v7390_v30 = vor.u32 %v8771_v44, %v7387_v45  ;;  %v7921_v22 = vld [vmem:[#allocation19 + $0x2a0] sm:$0xf]  ;;  %v8716_v25 = vld [vmem:[#allocation19 + $0x2ac] sm:$0xf0] }
 0x48c   : > { %v7529_v45 = vld [vmem:[#allocation19 + $0x588] sm:$0xf]  ;;  %v7922_v31 = vor.u32 %v8716_v25, %v7921_v22  ;;  %v7697_v22 = vld [vmem:[#allocation19 + $0xe0] sm:$0xf]  ;;  %v8660_v25 = vld [vmem:[#allocation19 + $0xec] sm:$0xf0] }
 0x491   : > { %v3481_v29 = vld [vmem:[#allocation3] sm:$0x3f] }
 0x492   : > { %v3483_v55 = vld [vmem:[#allocation3 + $0x10] sm:$0x3f] }
 0x493   : > { %v3485_v49 = vpack.c.bf16 %v3483_v55, %v3483_v55 }
 0x495   : > { %v3683_v40 = vunpack.c.l.b16 %v3485_v49  ;;  %v8759_v49 = vld [vmem:[#allocation19 + $0x40c] sm:$0xf] }
 0x497   : > { %v9977_v18 = vpack.c.b16 %v3683_v40, %v3683_v40 }
 0x499   : > { %v3704_v3 = vshll.u32 %v9977_v18, 16  ;;  %v3702_v5 = vshrl.u32 %v9977_v18, 16 }
 0x49b   : > { %v3706_v8 = vrot.slane %v3704_v3, 1  ;;  %v7342_v3 = vor.u32 %v8759_v49, %v7339_v59  ;;  %v7243_v49 = vld [vmem:[#allocation19 + $0x358] sm:$0xf0]  ;;  %v8799_v59 = vld [vmem:[#allocation19 + $0x54c] sm:$0xf] }
 0x49d   : > { %v9983_v9 = vor.u32 %v3706_v8, %v3702_v5  ;;  %v7937_v5 = vld [vmem:[#allocation19 + $0x2c0] sm:$0xf]  ;;  %v8720_v8 = vld [vmem:[#allocation19 + $0x2cc] sm:$0xf0] }
 0x49f   : > { %4225 = vmatmul.bf16.vlgmr.msra.gmra.mxu2 %v9983_v9 }
 0x4a0   : > { %4321 = vmatpush.bf16.msra.mxu2 %v7454_v10  ;;  %v7310_v10 = vor.u32 %v8751_v2, %v7307_v4  ;;  %v8797_v2 = vld [vmem:[#allocation19 + $0x534] sm:$0xf0]  ;;  %v7890_v4 = vor.u32 %v8708_v35, %v7889_v28  ;;  %v8650_v28 = vld [vmem:[#allocation19 + $0xa4] sm:$0xf]  ;;  %v7667_v35 = vld [vmem:[#allocation19 + $0xb0] sm:$0xf0] }
 0x4a2   : > { %v3455_v1 = vpop.permute.xlu1 %3454 }
 0x4a3   : > { %3458 = vst.msk [vmem:[#allocation3 + $0x8] sm:$0x1e] %vm3457_vm1, %v3455_v1  ;;  %v7938_v1 = vor.u32 %v8720_v8, %v7937_v5  ;;  %v8704_v5 = vld [vmem:[#allocation19 + $0x24c] sm:$0xf0]  ;;  %v7482_v8 = vor.u32 %v8797_v2, %v7481_v37  ;;  %v7670_v2 = vor.u32 %v8650_v28, %v7667_v35  ;;  %v7587_v35 = vld [vmem:[#allocation19 + $0x10] sm:$0xf0] }
 0x4a4   : > { %3468 = vst.msk [vmem:[#allocation3 + $0x8] sm:$0x1e] %vm3444_vm0, %v3466_v47  ;;  %4322 = vmatpush.bf16.msra.mxu2 %v7438_v15  ;;  %v8747_v15 = vld [vmem:[#allocation19 + $0x3ac] sm:$0xf]  ;;  %v7547_v47 = vld [vmem:[#allocation19 + $0x5b8] sm:$0xf0] }
 0x4a5   : > { %v7550_v44 = vor.u32 %v8811_v17, %v7547_v47  ;;  %v7467_v47 = vld [vmem:[#allocation19 + $0x518] sm:$0xf0] }
 0x4a8   : > { %4323 = vmatpush.bf16.msra.mxu2 %v7422_v19  ;;  %v7546_v19 = vor.u32 %v8813_v0, %v7545_v14  ;;  %v8727_v0 = vld [vmem:[#allocation19 + $0x30c] sm:$0xf] }
 0x4ab   : > { %v3482_v23 = vld [vmem:[#allocation3 + $0x8] sm:$0x3f] }
 0x4ac   : > { %4324 = vmatpush.bf16.msra.mxu2 %v7406_v26  ;;  %v3484_v16 = vpack.c.bf16 %v3482_v23, %v3481_v29  ;;  %v7294_v26 = vor.u32 %v8747_v15, %v7291_v41  ;;  %v8809_v29 = vld [vmem:[#allocation19 + $0x594] sm:$0xf0]  ;;  %v8743_v23 = vld [vmem:[#allocation19 + $0x38c] sm:$0xf]  ;;  %v7211_v15 = vld [vmem:[#allocation19 + $0x318] sm:$0xf0] }
 0x4ad   : > { %v8791_v41 = vld [vmem:[#allocation19 + $0x50c] sm:$0xf] }
 0x4ae   : > { %v3681_v32 = vunpack.c.l.b16 %v3484_v16  ;;  %v3682_v33 = vunpack.c.h.b16 %v3484_v16  ;;  %v8807_v16 = vld [vmem:[#allocation19 + $0x58c] sm:$0xf] }
 0x4b0   : > { %4325 = vmatpush.bf16.msra.mxu2 %v7390_v30  ;;  %v9989_v53 = vpack.c.b16 %v3681_v32, %v3681_v32  ;;  %v9991_v39 = vpack.c.b16 %v3682_v33, %v3682_v33  ;;  %v7275_v30 = vld [vmem:[#allocation19 + $0x398] sm:$0xf0]  ;;  %v7530_v32 = vor.u32 %v8809_v29, %v7529_v45  ;;  %v8692_v45 = vld [vmem:[#allocation19 + $0x1ec] sm:$0xf0]  ;;  %v8658_v29 = vld [vmem:[#allocation19 + $0xe4] sm:$0xf] }
 0x4b1   : > { %v7278_v33 = vor.u32 %v8743_v23, %v7275_v30  ;;  %v7699_v23 = vld [vmem:[#allocation19 + $0xf0] sm:$0xf0]  ;;  %v7214_v30 = vor.u32 %v8727_v0, %v7211_v15  ;;  %v7761_v0 = vld [vmem:[#allocation19 + $0x160] sm:$0xf] }
 0x4b2   : > { %v3690_v46 = vshll.u32 %v9989_v53, 16  ;;  %v3697_v50 = vshll.u32 %v9991_v39, 16  ;;  %v3688_v57 = vshrl.u32 %v9989_v53, 16  ;;  %v3695_v55 = vshrl.u32 %v9991_v39, 16 }
 0x4b3   : > { %v7702_v34 = vor.u32 %v8658_v29, %v7699_v23  ;;  %v7745_v29 = vld [vmem:[#allocation19 + $0x140] sm:$0xf] }
 0x4b4   : > { %4326 = vmatpush.bf16.msra.mxu2 %v7374_v36  ;;  %v3692_v62 = vrot.slane %v3690_v46, 1  ;;  %v3699_v58 = vrot.slane %v3697_v50, 1  ;;  %v7534_v36 = vor.u32 %v8807_v16, %v7531_v27  ;;  %v8739_v46 = vld [vmem:[#allocation19 + $0x36c] sm:$0xf]  ;;  %v7259_v50 = vld [vmem:[#allocation19 + $0x378] sm:$0xf0]  ;;  %v7470_v16 = vor.u32 %v8791_v41, %v7467_v47 }
 0x4b5   : > { %v7262_v43 = vor.u32 %v8739_v46, %v7259_v50  ;;  %v8656_v46 = vld [vmem:[#allocation19 + $0xcc] sm:$0xf0]  ;;  %v7809_v50 = vld [vmem:[#allocation19 + $0x1c0] sm:$0xf]  ;;  %v7635_v47 = vld [vmem:[#allocation19 + $0x70] sm:$0xf0] }
 0x4b6   : > { %v9997_v40 = vor.u32 %v3692_v62, %v3688_v57  ;;  %v9999_v60 = vor.u32 %v3699_v58, %v3695_v55  ;;  %v7518_v57 = vor.u32 %v8803_v51, %v7515_v52  ;;  %v7497_v62 = vld [vmem:[#allocation19 + $0x548] sm:$0xf]  ;;  %v8801_v55 = vld [vmem:[#allocation19 + $0x554] sm:$0xf0]  ;;  %v8735_v58 = vld [vmem:[#allocation19 + $0x34c] sm:$0xf] }
 0x4b7   : > { %v8688_v51 = vld [vmem:[#allocation19 + $0x1cc] sm:$0xf0]  ;;  %v8654_v52 = vld [vmem:[#allocation19 + $0xc4] sm:$0xf] }
 0x4b8   : > { %4327 = vmatpush.bf16.msra.mxu2 %v7358_v12  ;;  %4199 = vmatmul.bf16.vlgmr.msrb.gmra.mxu3 %v9997_v40  ;;  %v7905_v12 = vld [vmem:[#allocation19 + $0x280] sm:$0xf]  ;;  %v8676_v41 = vld [vmem:[#allocation19 + $0x16c] sm:$0xf0] }
 0x4b9   : > { %4212 = vmatmul.bf16.vlgmr.msra.gmra.mxu1 %v9999_v60  ;;  %4238 = vmatmul.bf16.vlgmr.msrb.gmra.mxu0 %v9997_v40  ;;  %v7906_v42 = vor.u32 %v8712_v54, %v7905_v12  ;;  %v7683_v12 = vld [vmem:[#allocation19 + $0xd0] sm:$0xf0]  ;;  %v7705_v54 = vld [vmem:[#allocation19 + $0xe8] sm:$0xf] }
 0x4ba   : > { %4277 = vmatmul.bf16.vlgmr.msrb.gmra.mxu2 %v9997_v40  ;;  %4295 = vmatpush.bf16.msrb.mxu3 %v7578_v61  ;;  %v7499_v61 = vld [vmem:[#allocation19 + $0x558] sm:$0xf0] }
 0x4bb   : > { %4308 = vmatpush.bf16.msra.mxu1 %v7326_v24  ;;  %4334 = vmatpush.bf16.msrb.mxu0 %v7582_v63  ;;  %v7498_v24 = vor.u32 %v8801_v55, %v7497_v62  ;;  %v7246_v63 = vor.u32 %v8735_v58, %v7243_v49  ;;  %v7502_v21 = vor.u32 %v8799_v59, %v7499_v61  ;;  %v7665_v58 = vld [vmem:[#allocation19 + $0xa0] sm:$0xf]  ;;  %v8684_v61 = vld [vmem:[#allocation19 + $0x1ac] sm:$0xf0] }
 0x4bc   : > { %4328 = vmatpush.bf16.msra.mxu2 %v7342_v3  ;;  %v8731_v3 = vld [vmem:[#allocation19 + $0x32c] sm:$0xf]  ;;  %v7810_v62 = vor.u32 %v8688_v51, %v7809_v50  ;;  %v7686_v55 = vor.u32 %v8654_v52, %v7683_v12  ;;  %v7793_v49 = vld [vmem:[#allocation19 + $0x1a0] sm:$0xf]  ;;  %v8668_v52 = vld [vmem:[#allocation19 + $0x12c] sm:$0xf0] }
 0x4bd   : > { %v7794_v37 = vor.u32 %v8684_v61, %v7793_v49  ;;  %v7729_v50 = vld [vmem:[#allocation19 + $0x120] sm:$0xf]  ;;  %v8634_v12 = vld [vmem:[#allocation19 + $0x24] sm:$0xf] }
 0x4be   : > { %4296 = vmatpush.bf16.msrb.mxu3 %v7562_v7  ;;  %v7873_v7 = vld [vmem:[#allocation19 + $0x240] sm:$0xf]  ;;  %v8630_v61 = vld [vmem:[#allocation19 + $0x4] sm:$0xf] }
 0x4bf   : > { %4309 = vmatpush.bf16.msra.mxu1 %v7310_v10  ;;  %4335 = vmatpush.bf16.msrb.mxu0 %v7566_v11  ;;  %v7465_v10 = vld [vmem:[#allocation19 + $0x508] sm:$0xf]  ;;  %v8793_v11 = vld [vmem:[#allocation19 + $0x514] sm:$0xf0]  ;;  %v7874_v17 = vor.u32 %v8704_v5, %v7873_v7  ;;  %v7651_v7 = vld [vmem:[#allocation19 + $0x90] sm:$0xf0] }
 0x4c0   : > { %4856 = vmatpush.bf16.msrb.mxu2 %v7954_v13  ;;  %v7483_v13 = vld [vmem:[#allocation19 + $0x538] sm:$0xf0]  ;;  %v8653_v5 = vld [vmem:[#allocation19 + $0xb4] sm:$0xf0]  ;;  %v7713_v49 = vld [vmem:[#allocation19 + $0x100] sm:$0xf] }
 0x4c1   : > { %v7486_v14 = vor.u32 %v8795_v6, %v7483_v13  ;;  %v8680_v6 = vld [vmem:[#allocation19 + $0x18c] sm:$0xf0]  ;;  %v8646_v13 = vld [vmem:[#allocation19 + $0x84] sm:$0xf] }
 0x4c2   : > { %4297 = vmatpush.bf16.msrb.mxu3 %v7546_v19  ;;  %v8700_v19 = vld [vmem:[#allocation19 + $0x22c] sm:$0xf0] }
 0x4c3   : > { %4310 = vmatpush.bf16.msra.mxu1 %v7294_v26  ;;  %4336 = vmatpush.bf16.msrb.mxu0 %v7550_v44  ;;  %v7825_v26 = vld [vmem:[#allocation19 + $0x1e0] sm:$0xf]  ;;  %v7466_v44 = vor.u32 %v8793_v11, %v7465_v10  ;;  %v7654_v11 = vor.u32 %v8646_v13, %v7651_v7  ;;  %v7590_v13 = vor.u32 %v8630_v61, %v7587_v35  ;;  %v7891_v61 = vld [vmem:[#allocation19 + $0x270] sm:$0xf0]  ;;  %v8677_v35 = vld [vmem:[#allocation19 + $0x174] sm:$0xf0] }
 0x4c4   : > { %4857 = vmatpush.bf16.msrb.mxu2 %v7938_v1  ;;  %v7857_v1 = vld [vmem:[#allocation19 + $0x220] sm:$0xf] }
 0x4c5   : > { %v7858_v27 = vor.u32 %v8700_v19, %v7857_v1  ;;  %v7657_v1 = vld [vmem:[#allocation19 + $0x88] sm:$0xf]  ;;  %v8649_v19 = vld [vmem:[#allocation19 + $0x94] sm:$0xf0] }
 0x4c6   : > { %4298 = vmatpush.bf16.msrb.mxu3 %v7530_v32  ;;  %v7841_v32 = vld [vmem:[#allocation19 + $0x200] sm:$0xf]  ;;  %v7658_v23 = vor.u32 %v8649_v19, %v7657_v1  ;;  %v7835_v1 = vld [vmem:[#allocation19 + $0x1f8] sm:$0xf0] }
 0x4c7   : > { %4311 = vmatpush.bf16.msra.mxu1 %v7278_v33  ;;  %4337 = vmatpush.bf16.msrb.mxu0 %v7534_v36  ;;  %v8696_v33 = vld [vmem:[#allocation19 + $0x20c] sm:$0xf0]  ;;  %v7826_v36 = vor.u32 %v8692_v45, %v7825_v26 }
 0x4c8   : > { %4858 = vmatpush.bf16.msrb.mxu2 %v7922_v31  ;;  %4251 = vmatmul.bf16.vlgmr.msra.gmra.mxu3 %v9999_v60  ;;  %v7698_v31 = vor.u32 %v8660_v25, %v7697_v22  ;;  %v7762_v25 = vor.u32 %v8676_v41, %v7761_v0  ;;  %v8640_v45 = vld [vmem:[#allocation19 + $0x4c] sm:$0xf0]  ;;  %v8718_v0 = vld [vmem:[#allocation19 + $0x2c4] sm:$0xf]  ;;  %v7817_v41 = vld [vmem:[#allocation19 + $0x1c8] sm:$0xf] }
 0x4c9   : > { %4264 = vmatmul.bf16.vlgmr.msrb.gmra.mxu1 %v9983_v9  ;;  %4290 = vmatmul.bf16.vlgmr.msra.gmra.mxu0 %v9999_v60 }
 0x4ca   : > { %4299 = vmatpush.bf16.msrb.mxu3 %v7514_v56  ;;  %4329 = vmatmul.bf16.vlgmr.msra.gmra.mxu2 %v9999_v60  ;;  %v7230_v60 = vor.u32 %v8731_v3, %v7227_v20  ;;  %v8661_v56 = vld [vmem:[#allocation19 + $0xf4] sm:$0xf0]  ;;  %v7649_v3 = vld [vmem:[#allocation19 + $0x80] sm:$0xf] }
 0x4cb   : > { %4312 = vmatpush.bf16.msra.mxu1 %v7262_v43  ;;  %4338 = vmatpush.bf16.msrb.mxu0 %v7518_v57  ;;  %v7842_v43 = vor.u32 %v8696_v33, %v7841_v32  ;;  %v7682_v57 = vor.u32 %v8656_v46, %v7681_v38  ;;  %v7706_v59 = vor.u32 %v8661_v56, %v7705_v54  ;;  %v7777_v20 = vld [vmem:[#allocation19 + $0x180] sm:$0xf]  ;;  %v8645_v32 = vld [vmem:[#allocation19 + $0x74] sm:$0xf0]  ;;  %v8636_v46 = vld [vmem:[#allocation19 + $0x2c] sm:$0xf0] }
 0x4cc   : > { %4859 = vmatpush.bf16.msrb.mxu2 %v7906_v42  ;;  %v8652_v42 = vld [vmem:[#allocation19 + $0xac] sm:$0xf0]  ;;  %v7778_v10 = vor.u32 %v8680_v6, %v7777_v20  ;;  %v7601_v38 = vld [vmem:[#allocation19 + $0x20] sm:$0xf]  ;;  %v7603_v54 = vld [vmem:[#allocation19 + $0x30] sm:$0xf0] }
 0x4cd   : > { %v7625_v56 = vld [vmem:[#allocation19 + $0x48] sm:$0xf] }
 0x4ce   : > { %4300 = vmatpush.bf16.msrb.mxu3 %v7498_v24  ;;  %v7689_v24 = vld [vmem:[#allocation19 + $0xc8] sm:$0xf] }
 0x4cf   : > { %4313 = vmatpush.bf16.msra.mxu1 %v7246_v63  ;;  %4339 = vmatpush.bf16.msrb.mxu0 %v7502_v21  ;;  %v8657_v63 = vld [vmem:[#allocation19 + $0xd4] sm:$0xf0]  ;;  %v7666_v21 = vor.u32 %v8652_v42, %v7665_v58  ;;  %v7730_v58 = vor.u32 %v8668_v52, %v7729_v50  ;;  %v7606_v42 = vor.u32 %v8634_v12, %v7603_v54  ;;  %v7833_v20 = vld [vmem:[#allocation19 + $0x1e8] sm:$0xf]  ;;  %v8710_v50 = vld [vmem:[#allocation19 + $0x284] sm:$0xf] }
 0x4d0   : > { %4860 = vmatpush.bf16.msrb.mxu2 %v7890_v4  ;;  %v8648_v4 = vld [vmem:[#allocation19 + $0x8c] sm:$0xf0]  ;;  %v7907_v52 = vld [vmem:[#allocation19 + $0x290] sm:$0xf0]  ;;  %v7785_v12 = vld [vmem:[#allocation19 + $0x188] sm:$0xf] }
 0x4d1   : > { %v8681_v54 = vld [vmem:[#allocation19 + $0x194] sm:$0xf0] }
 0x4d2   : > { %4301 = vmatpush.bf16.msrb.mxu3 %v7482_v8  ;;  %v7650_v8 = vor.u32 %v8648_v4, %v7649_v3  ;;  %v7955_v4 = vld [vmem:[#allocation19 + $0x2f0] sm:$0xf0] }
 0x4d3   : > { %4314 = vmatpush.bf16.msra.mxu1 %v7230_v60  ;;  %4340 = vmatpush.bf16.msrb.mxu0 %v7486_v14  ;;  %v7633_v60 = vld [vmem:[#allocation19 + $0x60] sm:$0xf]  ;;  %v8644_v14 = vld [vmem:[#allocation19 + $0x6c] sm:$0xf0] }
 0x4d4   : > { %4861 = vmatpush.bf16.msrb.mxu2 %v7874_v17  ;;  %v8642_v17 = vld [vmem:[#allocation19 + $0x64] sm:$0xf]  ;;  %v7634_v22 = vor.u32 %v8644_v14, %v7633_v60  ;;  %v7811_v14 = vld [vmem:[#allocation19 + $0x1d0] sm:$0xf0] }
 0x4d5   : > { %v7638_v26 = vor.u32 %v8642_v17, %v7635_v47  ;;  %v8686_v60 = vld [vmem:[#allocation19 + $0x1c4] sm:$0xf]  ;;  %v8689_v17 = vld [vmem:[#allocation19 + $0x1d4] sm:$0xf0]  ;;  %v8691_v47 = vld [vmem:[#allocation19 + $0x1ec] sm:$0xf] }
 0x4d6   : > { %4302 = vmatpush.bf16.msrb.mxu3 %v7466_v44  ;;  %v7617_v44 = vld [vmem:[#allocation19 + $0x40] sm:$0xf] }
 0x4d7   : > { %4315 = vmatpush.bf16.msra.mxu1 %v7214_v30  ;;  %4341 = vmatpush.bf16.msrb.mxu0 %v7470_v16  ;;  %v8672_v30 = vld [vmem:[#allocation19 + $0x14c] sm:$0xf0]  ;;  %v8638_v16 = vld [vmem:[#allocation19 + $0x44] sm:$0xf]  ;;  %v7618_v33 = vor.u32 %v8640_v45, %v7617_v44  ;;  %v7795_v45 = vld [vmem:[#allocation19 + $0x1b0] sm:$0xf0] }
 0x4d8   : > { %4862 = vmatpush.bf16.msrb.mxu2 %v7858_v27  ;;  %v7619_v27 = vld [vmem:[#allocation19 + $0x50] sm:$0xf0]  ;;  %v8682_v44 = vld [vmem:[#allocation19 + $0x1a4] sm:$0xf] }
 0x4d9   : > { %4303 = vmatmul.bf16.vlgmr.msrb.gmra.mxu3 %v9983_v9 }
 0x4da   : > { %4830 = vmatpush.bf16.msra.mxu3 %v7698_v31  ;;  %4316 = vmatmul.bf16.vlgmr.msra.gmra.mxu1 %v9997_v40  ;;  %v7690_v40 = vor.u32 %v8657_v63, %v7689_v24  ;;  %v7641_v31 = vld [vmem:[#allocation19 + $0x68] sm:$0xf]  ;;  %v8637_v63 = vld [vmem:[#allocation19 + $0x34] sm:$0xf0] }
 0x4db   : > { %4843 = vmatpush.bf16.msrb.mxu1 %v7826_v36  ;;  %4869 = vmatpush.bf16.msra.mxu0 %v7702_v34  ;;  %v7746_v36 = vor.u32 %v8672_v30, %v7745_v29  ;;  %v7622_v34 = vor.u32 %v8638_v16, %v7619_v27  ;;  %v7642_v51 = vor.u32 %v8645_v32, %v7641_v31  ;;  %v7609_v24 = vld [vmem:[#allocation19 + $0x28] sm:$0xf]  ;;  %v8714_v29 = vld [vmem:[#allocation19 + $0x2a4] sm:$0xf]  ;;  %v7923_v30 = vld [vmem:[#allocation19 + $0x2b0] sm:$0xf0] }
 0x4dc   : > { %4342 = vmatmul.bf16.vlgmr.msrb.gmra.mxu0 %v9983_v9  ;;  %4863 = vmatpush.bf16.msrb.mxu2 %v7842_v43  ;;  %v7673_v9 = vld [vmem:[#allocation19 + $0xa8] sm:$0xf]  ;;  %v8641_v43 = vld [vmem:[#allocation19 + $0x54] sm:$0xf0]  ;;  %v7610_v7 = vor.u32 %v8637_v63, %v7609_v24  ;;  %v8687_v31 = vld [vmem:[#allocation19 + $0x1cc] sm:$0xf] }
 0x4dd   : > { %v7674_v15 = vor.u32 %v8653_v5, %v7673_v9  ;;  %v7626_v28 = vor.u32 %v8641_v43, %v7625_v56  ;;  %v7593_v5 = vld [vmem:[#allocation19 + $0x8] sm:$0xf]  ;;  %v8685_v27 = vld [vmem:[#allocation19 + $0x1b4] sm:$0xf0]  ;;  %v7819_v32 = vld [vmem:[#allocation19 + $0x1d8] sm:$0xf0] }
 0x4de   : > { %4831 = vmatpush.bf16.msra.mxu3 %v7682_v57  ;;  %v7602_v57 = vor.u32 %v8636_v46, %v7601_v38  ;;  %v7801_v16 = vld [vmem:[#allocation19 + $0x1a8] sm:$0xf]  ;;  %v8678_v38 = vld [vmem:[#allocation19 + $0x184] sm:$0xf]  ;;  %v7779_v46 = vld [vmem:[#allocation19 + $0x190] sm:$0xf0] }
 0x4df   : > { %4844 = vmatpush.bf16.msrb.mxu1 %v7810_v62  ;;  %4870 = vmatpush.bf16.msra.mxu0 %v7686_v55  ;;  %v7585_v62 = vld [vmem:[#allocation19] sm:$0xf]  ;;  %v8632_v55 = vld [vmem:[#allocation19 + $0xc] sm:$0xf0]  ;;  %v8683_v56 = vld [vmem:[#allocation19 + $0x1ac] sm:$0xf] }
 0x4e0   : > { %4908 = vmatpush.bf16.msra.mxu2 %v7706_v59  ;;  %v8664_v59 = vld [vmem:[#allocation19 + $0x10c] sm:$0xf0]  ;;  %v7586_v3 = vor.u32 %v8632_v55, %v7585_v62  ;;  %v7803_v43 = vld [vmem:[#allocation19 + $0x1b8] sm:$0xf0]  ;;  %v7910_v62 = vor.u32 %v8710_v50, %v7907_v52  ;;  %v7786_v55 = vor.u32 %v8681_v54, %v7785_v12  ;;  %v8679_v24 = vld [vmem:[#allocation19 + $0x18c] sm:$0xf] }
 0x4e1   : > { %4864 = vmatmul.bf16.vlgmr.msrb.gmra.mxu2 %v9977_v18  ;;  %v7714_v6 = vor.u32 %v8664_v59, %v7713_v49  ;;  %v8706_v49 = vld [vmem:[#allocation19 + $0x264] sm:$0xf]  ;;  %v7806_v59 = vor.u32 %v8683_v56, %v7803_v43  ;;  %v7787_v63 = vld [vmem:[#allocation19 + $0x198] sm:$0xf0]  ;;  %v8723_v50 = vld [vmem:[#allocation19 + $0x2ec] sm:$0xf] }
 0x4e2   : > { %4832 = vmatpush.bf16.msra.mxu3 %v7666_v21  ;;  %v8690_v21 = vld [vmem:[#allocation19 + $0x1e4] sm:$0xf]  ;;  %v8663_v43 = vld [vmem:[#allocation19 + $0x10c] sm:$0xf] }
 0x4e3   : > { %4845 = vmatpush.bf16.msrb.mxu1 %v7794_v37  ;;  %4871 = vmatpush.bf16.msra.mxu0 %v7670_v2  ;;  %v7827_v37 = vld [vmem:[#allocation19 + $0x1f0] sm:$0xf0]  ;;  %v8722_v2 = vld [vmem:[#allocation19 + $0x2e4] sm:$0xf] }
 0x4e4   : > { %4909 = vmatpush.bf16.msra.mxu2 %v7690_v40  ;;  %v8693_v40 = vld [vmem:[#allocation19 + $0x1f4] sm:$0xf0]  ;;  %v7830_v9 = vor.u32 %v8690_v21, %v7827_v37  ;;  %v7894_v37 = vor.u32 %v8706_v49, %v7891_v61  ;;  %v8655_v49 = vld [vmem:[#allocation19 + $0xcc] sm:$0xf] }
 0x4e5   : > { %v8719_v61 = vld [vmem:[#allocation19 + $0x2cc] sm:$0xf] }
 0x4e6   : > { %4833 = vmatpush.bf16.msra.mxu3 %v7650_v8  ;;  %v8633_v8 = vld [vmem:[#allocation19 + $0x14] sm:$0xf0] }
 0x4e7   : > { %4846 = vmatpush.bf16.msrb.mxu1 %v7778_v10  ;;  %4872 = vmatpush.bf16.msra.mxu0 %v7654_v11  ;;  %v7958_v10 = vor.u32 %v8722_v2, %v7955_v4  ;;  %v7834_v11 = vor.u32 %v8693_v40, %v7833_v20  ;;  %v7594_v19 = vor.u32 %v8633_v8, %v7593_v5  ;;  %v7747_v4 = vld [vmem:[#allocation19 + $0x150] sm:$0xf0]  ;;  %v8702_v20 = vld [vmem:[#allocation19 + $0x244] sm:$0xf]  ;;  %v7771_v5 = vld [vmem:[#allocation19 + $0x178] sm:$0xf0] }
 0x4e8   : > { %4910 = vmatpush.bf16.msra.mxu2 %v7674_v15  ;;  %v7939_v15 = vld [vmem:[#allocation19 + $0x2d0] sm:$0xf0]  ;;  %v7790_v40 = vor.u32 %v8679_v24, %v7787_v63  ;;  %v8916_v24 = vld [vmem:[#allocation19 + $0x8ec] sm:$0xf0] }
 0x4ea   : > { %4834 = vmatpush.bf16.msra.mxu3 %v7634_v22  ;;  %v7814_v22 = vor.u32 %v8686_v60, %v7811_v14  ;;  %v8666_v60 = vld [vmem:[#allocation19 + $0x124] sm:$0xf]  ;;  %v7731_v14 = vld [vmem:[#allocation19 + $0x130] sm:$0xf0] }
 0x4eb   : > { %4847 = vmatpush.bf16.msrb.mxu1 %v7762_v25  ;;  %4873 = vmatpush.bf16.msra.mxu0 %v7638_v26  ;;  %v7942_v25 = vor.u32 %v8718_v0, %v7939_v15  ;;  %v7818_v26 = vor.u32 %v8689_v17, %v7817_v41  ;;  %v8698_v0 = vld [vmem:[#allocation19 + $0x224] sm:$0xf]  ;;  %v7859_v41 = vld [vmem:[#allocation19 + $0x230] sm:$0xf0]  ;;  %v7737_v17 = vld [vmem:[#allocation19 + $0x128] sm:$0xf] }
 0x4ec   : > { %4911 = vmatpush.bf16.msra.mxu2 %v7658_v23  ;;  %v7838_v23 = vor.u32 %v8691_v47, %v7835_v1  ;;  %v8669_v47 = vld [vmem:[#allocation19 + $0x134] sm:$0xf0]  ;;  %v8671_v1 = vld [vmem:[#allocation19 + $0x14c] sm:$0xf] }
 0x4ee   : > { %4835 = vmatpush.bf16.msra.mxu3 %v7618_v33  ;;  %v7798_v33 = vor.u32 %v8682_v44, %v7795_v45  ;;  %v7862_v44 = vor.u32 %v8698_v0, %v7859_v41  ;;  %v7738_v45 = vor.u32 %v8669_v47, %v7737_v17  ;;  %v8647_v0 = vld [vmem:[#allocation19 + $0x8c] sm:$0xf]  ;;  %v7659_v41 = vld [vmem:[#allocation19 + $0x98] sm:$0xf0] }
 0x4ef   : > { %4848 = vmatpush.bf16.msrb.mxu1 %v7746_v36  ;;  %4874 = vmatpush.bf16.msra.mxu0 %v7622_v34  ;;  %v7926_v36 = vor.u32 %v8714_v29, %v7923_v30  ;;  %v7802_v34 = vor.u32 %v8685_v27, %v7801_v16  ;;  %v8694_v29 = vld [vmem:[#allocation19 + $0x204] sm:$0xf]  ;;  %v7721_v30 = vld [vmem:[#allocation19 + $0x108] sm:$0xf]  ;;  %v8665_v27 = vld [vmem:[#allocation19 + $0x114] sm:$0xf0] }
 0x4f0   : > { %4912 = vmatpush.bf16.msra.mxu2 %v7642_v51  ;;  %v7822_v51 = vor.u32 %v8687_v31, %v7819_v32  ;;  %v8667_v31 = vld [vmem:[#allocation19 + $0x12c] sm:$0xf]  ;;  %v7739_v32 = vld [vmem:[#allocation19 + $0x138] sm:$0xf0]  ;;  %v7722_v12 = vor.u32 %v8665_v27, %v7721_v30 }
 0x4f1   : > { %v7742_v54 = vor.u32 %v8667_v31, %v7739_v32  ;;  %v8711_v17 = vld [vmem:[#allocation19 + $0x28c] sm:$0xf]  ;;  %v7915_v47 = vld [vmem:[#allocation19 + $0x298] sm:$0xf0]  ;;  %v8289_v31 = vld [vmem:[#allocation19 + $0x880] sm:$0xf] }
 0x4f2   : > { %4836 = vmatpush.bf16.msra.mxu3 %v7602_v57  ;;  %v7782_v57 = vor.u32 %v8678_v38, %v7779_v46  ;;  %v7707_v46 = vld [vmem:[#allocation19 + $0xf8] sm:$0xf0]  ;;  %v8904_v32 = vld [vmem:[#allocation19 + $0x88c] sm:$0xf0] }
 0x4f3   : > { %4849 = vmatpush.bf16.msrb.mxu1 %v7730_v58  ;;  %4875 = vmatpush.bf16.msra.mxu0 %v7606_v42  ;;  %v8674_v58 = vld [vmem:[#allocation19 + $0x164] sm:$0xf]  ;;  %v7763_v42 = vld [vmem:[#allocation19 + $0x170] sm:$0xf0]  ;;  %v7643_v30 = vld [vmem:[#allocation19 + $0x78] sm:$0xf0] }
 0x4f4   : > { %4913 = vmatpush.bf16.msra.mxu2 %v7626_v28  ;;  %v7769_v28 = vld [vmem:[#allocation19 + $0x168] sm:$0xf]  ;;  %v7766_v21 = vor.u32 %v8674_v58, %v7763_v42  ;;  %v8721_v42 = vld [vmem:[#allocation19 + $0x2d4] sm:$0xf0]  ;;  %v7899_v27 = vld [vmem:[#allocation19 + $0x278] sm:$0xf0] }
 0x4f5   : > { %v7770_v2 = vor.u32 %v8677_v35, %v7769_v28  ;;  %v7945_v58 = vld [vmem:[#allocation19 + $0x2c8] sm:$0xf]  ;;  %v7947_v28 = vld [vmem:[#allocation19 + $0x2d8] sm:$0xf0]  ;;  %v8337_v35 = vld [vmem:[#allocation19 + $0x8e0] sm:$0xf] }
 0x4f6   : > { %4837 = vmatpush.bf16.msra.mxu3 %v7586_v3  ;;  %v8670_v3 = vld [vmem:[#allocation19 + $0x144] sm:$0xf] }
 0x4f7   : > { %4850 = vmatpush.bf16.msrb.mxu1 %v7714_v6  ;;  %4876 = vmatpush.bf16.msra.mxu0 %v7590_v13  ;;  %v7875_v6 = vld [vmem:[#allocation19 + $0x250] sm:$0xf0]  ;;  %v7753_v13 = vld [vmem:[#allocation19 + $0x148] sm:$0xf]  ;;  %v7750_v8 = vor.u32 %v8670_v3, %v7747_v4  ;;  %v8717_v4 = vld [vmem:[#allocation19 + $0x2b4] sm:$0xf0] }
 0x4f8   : > { %4914 = vmatpush.bf16.msra.mxu2 %v7610_v7  ;;  %v8673_v7 = vld [vmem:[#allocation19 + $0x154] sm:$0xf0]  ;;  %v7929_v3 = vld [vmem:[#allocation19 + $0x2a8] sm:$0xf] }
 0x4f9   : > { %4838 = vmatmul.bf16.vlgmr.msra.gmra.mxu3 %v9989_v53 }
 0x4fa   : > { %4882 = vmatpush.bf16.msrb.mxu3 %v7830_v9  ;;  %4851 = vmatmul.bf16.vlgmr.msrb.gmra.mxu1 %v9991_v39  ;;  %v8675_v9 = vld [vmem:[#allocation19 + $0x16c] sm:$0xf] }
 0x4fb   : > { %4895 = vmatpush.bf16.msra.mxu1 %v7958_v10  ;;  %4921 = vmatpush.bf16.msrb.mxu0 %v7834_v11  ;;  %v7878_v10 = vor.u32 %v8702_v20, %v7875_v6  ;;  %v7754_v11 = vor.u32 %v8673_v7, %v7753_v13  ;;  %v7774_v15 = vor.u32 %v8675_v9, %v7771_v5  ;;  %v8651_v20 = vld [vmem:[#allocation19 + $0xac] sm:$0xf]  ;;  %v7675_v6 = vld [vmem:[#allocation19 + $0xb8] sm:$0xf0]  ;;  %v8321_v9 = vld [vmem:[#allocation19 + $0x8c0] sm:$0xf] }
 0x4fc   : > { %4877 = vmatmul.bf16.vlgmr.msra.gmra.mxu0 %v9989_v53  ;;  %4915 = vmatpush.bf16.msra.mxu2 %v7594_v19  ;;  %v7755_v19 = vld [vmem:[#allocation19 + $0x158] sm:$0xf0]  ;;  %v8715_v13 = vld [vmem:[#allocation19 + $0x2ac] sm:$0xf]  ;;  %v8912_v5 = vld [vmem:[#allocation19 + $0x8cc] sm:$0xf0] }
 0x4fd   : > { %v7758_v16 = vor.u32 %v8671_v1, %v7755_v19  ;;  %v7931_v7 = vld [vmem:[#allocation19 + $0x2b8] sm:$0xf0]  ;;  %v8305_v1 = vld [vmem:[#allocation19 + $0x8a0] sm:$0xf]  ;;  %v8908_v19 = vld [vmem:[#allocation19 + $0x8ac] sm:$0xf0] }
 0x4fe   : > { %4883 = vmatpush.bf16.msrb.mxu3 %v7814_v22  ;;  %v7734_v22 = vor.u32 %v8666_v60, %v7731_v14  ;;  %v7913_v60 = vld [vmem:[#allocation19 + $0x288] sm:$0xf]  ;;  %v8713_v14 = vld [vmem:[#allocation19 + $0x294] sm:$0xf0] }
 0x4ff   : > { %4896 = vmatpush.bf16.msra.mxu1 %v7942_v25  ;;  %4922 = vmatpush.bf16.msrb.mxu0 %v7818_v26  ;;  %v8662_v25 = vld [vmem:[#allocation19 + $0x104] sm:$0xf]  ;;  %v7715_v26 = vld [vmem:[#allocation19 + $0x110] sm:$0xf0] }
 0x500   : > { %4960 = vmatpush.bf16.msrb.mxu2 %v7838_v23  ;;  %v7843_v23 = vld [vmem:[#allocation19 + $0x210] sm:$0xf0]  ;;  %v7718_v38 = vor.u32 %v8662_v25, %v7715_v26  ;;  %v7662_v25 = vor.u32 %v8647_v0, %v7659_v41  ;;  %v7918_v26 = vor.u32 %v8711_v17, %v7915_v47  ;;  %v8850_v41 = vld [vmem:[#allocation19 + $0x6e4] sm:$0xf] }
 0x501   : > { %4916 = vmatmul.bf16.vlgmr.msra.gmra.mxu2 %v9989_v53  ;;  %v7846_v52 = vor.u32 %v8694_v29, %v7843_v23  ;;  %v8643_v29 = vld [vmem:[#allocation19 + $0x6c] sm:$0xf]  ;;  %v8306_v23 = vor.u32 %v8908_v19, %v8305_v1  ;;  %v8083_v17 = vld [vmem:[#allocation19 + $0x6f0] sm:$0xf0] }
 0x502   : > { %4884 = vmatpush.bf16.msrb.mxu3 %v7798_v33  ;;  %v7961_v33 = vld [vmem:[#allocation19 + $0x2e8] sm:$0xf] }
 0x503   : > { %4897 = vmatpush.bf16.msra.mxu1 %v7926_v36  ;;  %4923 = vmatpush.bf16.msrb.mxu0 %v7802_v34  ;;  %v8725_v36 = vld [vmem:[#allocation19 + $0x2f4] sm:$0xf0]  ;;  %v8659_v34 = vld [vmem:[#allocation19 + $0xec] sm:$0xf] }
 0x504   : > { %4961 = vmatpush.bf16.msrb.mxu2 %v7822_v51  ;;  %v7963_v51 = vld [vmem:[#allocation19 + $0x2f8] sm:$0xf0]  ;;  %v7962_v56 = vor.u32 %v8725_v36, %v7961_v33  ;;  %v7646_v36 = vor.u32 %v8643_v29, %v7643_v30  ;;  %v8065_v29 = vld [vmem:[#allocation19 + $0x6c0] sm:$0xf] }
 0x505   : > { %v8193_v30 = vld [vmem:[#allocation19 + $0x7c0] sm:$0xf] }
 0x506   : > { %4885 = vmatpush.bf16.msrb.mxu3 %v7782_v57  ;;  %v7723_v57 = vld [vmem:[#allocation19 + $0x118] sm:$0xf0] }
 0x507   : > { %4898 = vmatpush.bf16.msra.mxu1 %v7910_v62  ;;  %4924 = vmatpush.bf16.msrb.mxu0 %v7786_v55  ;;  %v7710_v62 = vor.u32 %v8659_v34, %v7707_v46  ;;  %v7966_v55 = vor.u32 %v8723_v50, %v7963_v51  ;;  %v7726_v63 = vor.u32 %v8663_v43, %v7723_v57  ;;  %v8705_v46 = vld [vmem:[#allocation19 + $0x254] sm:$0xf0]  ;;  %v8639_v50 = vld [vmem:[#allocation19 + $0x4c] sm:$0xf]  ;;  %v8273_v43 = vld [vmem:[#allocation19 + $0x860] sm:$0xf] }
 0x508   : > { %4962 = vmatpush.bf16.msrb.mxu2 %v7806_v59  ;;  %v7691_v59 = vld [vmem:[#allocation19 + $0xd8] sm:$0xf0]  ;;  %v8290_v51 = vor.u32 %v8904_v32, %v8289_v31  ;;  %v8900_v57 = vld [vmem:[#allocation19 + $0x86c] sm:$0xf0]  ;;  %v8067_v31 = vld [vmem:[#allocation19 + $0x6d0] sm:$0xf0] }
 0x509   : > { %v8089_v32 = vld [vmem:[#allocation19 + $0x6e8] sm:$0xf] }
 0x50a   : > { %4886 = vmatpush.bf16.msrb.mxu3 %v7766_v21  ;;  %v7946_v21 = vor.u32 %v8721_v42, %v7945_v58  ;;  %v7865_v42 = vld [vmem:[#allocation19 + $0x228] sm:$0xf] }
 0x50b   : > { %4899 = vmatpush.bf16.msra.mxu1 %v7894_v37  ;;  %4925 = vmatpush.bf16.msrb.mxu0 %v7770_v2  ;;  %v7694_v37 = vor.u32 %v8655_v49, %v7691_v59  ;;  %v7950_v2 = vor.u32 %v8719_v61, %v7947_v28  ;;  %v8701_v49 = vld [vmem:[#allocation19 + $0x234] sm:$0xf0]  ;;  %v8635_v59 = vld [vmem:[#allocation19 + $0x2c] sm:$0xf]  ;;  %v8274_v61 = vor.u32 %v8900_v57, %v8273_v43  ;;  %v7611_v28 = vld [vmem:[#allocation19 + $0x38] sm:$0xf0] }
 0x50c   : > { %4963 = vmatpush.bf16.msrb.mxu2 %v7790_v40  ;;  %v8338_v40 = vor.u32 %v8916_v24, %v8337_v35  ;;  %v8699_v35 = vld [vmem:[#allocation19 + $0x22c] sm:$0xf]  ;;  %v7867_v24 = vld [vmem:[#allocation19 + $0x238] sm:$0xf0]  ;;  %v8842_v43 = vld [vmem:[#allocation19 + $0x6a4] sm:$0xf] }
 0x50d   : > { %v8051_v57 = vld [vmem:[#allocation19 + $0x6b0] sm:$0xf0] }
 0x50e   : > { %4887 = vmatpush.bf16.msrb.mxu3 %v7750_v8  ;;  %v7930_v8 = vor.u32 %v8717_v4, %v7929_v3  ;;  %v8697_v3 = vld [vmem:[#allocation19 + $0x214] sm:$0xf0]  ;;  %v7614_v4 = vor.u32 %v8635_v59, %v7611_v28  ;;  %v8054_v28 = vor.u32 %v8842_v43, %v8051_v57  ;;  %v8009_v43 = vld [vmem:[#allocation19 + $0x648] sm:$0xf] }
 0x50f   : > { %4900 = vmatpush.bf16.msra.mxu1 %v7878_v10  ;;  %4926 = vmatpush.bf16.msrb.mxu0 %v7754_v11  ;;  %v7678_v10 = vor.u32 %v8651_v20, %v7675_v6  ;;  %v7934_v11 = vor.u32 %v8715_v13, %v7931_v7  ;;  %v7870_v20 = vor.u32 %v8699_v35, %v7867_v24  ;;  %v7595_v6 = vld [vmem:[#allocation19 + $0x18] sm:$0xf0]  ;;  %v8695_v13 = vld [vmem:[#allocation19 + $0x20c] sm:$0xf]  ;;  %v8033_v35 = vld [vmem:[#allocation19 + $0x680] sm:$0xf] }
 0x510   : > { %4964 = vmatpush.bf16.msrb.mxu2 %v7774_v15  ;;  %v8322_v15 = vor.u32 %v8912_v5, %v8321_v9  ;;  %v7851_v5 = vld [vmem:[#allocation19 + $0x218] sm:$0xf0]  ;;  %v8840_v24 = vld [vmem:[#allocation19 + $0x68c] sm:$0xf0]  ;;  %v8833_v57 = vld [vmem:[#allocation19 + $0x654] sm:$0xf0] }
 0x511   : > { %v7854_v1 = vor.u32 %v8695_v13, %v7851_v5  ;;  %v8145_v5 = vld [vmem:[#allocation19 + $0x760] sm:$0xf] }
 0x512   : > { %4888 = vmatpush.bf16.msrb.mxu3 %v7734_v22  ;;  %v7914_v22 = vor.u32 %v8713_v14, %v7913_v60  ;;  %v8852_v60 = vld [vmem:[#allocation19 + $0x6ec] sm:$0xf0]  ;;  %v8209_v14 = vld [vmem:[#allocation19 + $0x7e0] sm:$0xf] }
 0x513   : > { %4901 = vmatpush.bf16.msra.mxu1 %v7862_v44  ;;  %4927 = vmatpush.bf16.msrb.mxu0 %v7738_v45  ;;  %v7897_v44 = vld [vmem:[#allocation19 + $0x268] sm:$0xf]  ;;  %v8709_v45 = vld [vmem:[#allocation19 + $0x274] sm:$0xf0] }
 0x514   : > { %4965 = vmatpush.bf16.msrb.mxu2 %v7758_v16  ;;  %v8707_v16 = vld [vmem:[#allocation19 + $0x26c] sm:$0xf]  ;;  %v7898_v33 = vor.u32 %v8709_v45, %v7897_v44  ;;  %v8086_v45 = vor.u32 %v8850_v41, %v8083_v17  ;;  %v8841_v41 = vld [vmem:[#allocation19 + $0x694] sm:$0xf0] }
 0x515   : > { %v7902_v34 = vor.u32 %v8707_v16, %v7899_v27  ;;  %v8880_v16 = vld [vmem:[#allocation19 + $0x7cc] sm:$0xf0]  ;;  %v8846_v27 = vld [vmem:[#allocation19 + $0x6c4] sm:$0xf] }
 0x516   : > { %4889 = vmatpush.bf16.msrb.mxu3 %v7718_v38  ;;  %v7881_v38 = vld [vmem:[#allocation19 + $0x248] sm:$0xf] }
 0x517   : > { %4902 = vmatpush.bf16.msra.mxu1 %v7846_v52  ;;  %4928 = vmatpush.bf16.msrb.mxu0 %v7722_v12  ;;  %v7627_v12 = vld [vmem:[#allocation19 + $0x58] sm:$0xf0] }
 0x518   : > { %4966 = vmatpush.bf16.msrb.mxu2 %v7742_v54  ;;  %v8703_v54 = vld [vmem:[#allocation19 + $0x24c] sm:$0xf] }
 0x519   : > { %4890 = vmatmul.bf16.vlgmr.msrb.gmra.mxu3 %v9991_v39 }
 0x51a   : > { %4934 = vmatpush.bf16.msra.mxu3 %v7962_v56  ;;  %4903 = vmatmul.bf16.vlgmr.msra.gmra.mxu1 %v9977_v18  ;;  %v7883_v56 = vld [vmem:[#allocation19 + $0x258] sm:$0xf0] }
 0x51b   : > { %4947 = vmatpush.bf16.msrb.mxu1 %v7710_v62  ;;  %4973 = vmatpush.bf16.msra.mxu0 %v7966_v55  ;;  %v7882_v62 = vor.u32 %v8705_v46, %v7881_v38  ;;  %v7630_v55 = vor.u32 %v8639_v50, %v7627_v12  ;;  %v7886_v58 = vor.u32 %v8703_v54, %v7883_v56  ;;  %v8049_v50 = vld [vmem:[#allocation19 + $0x6a0] sm:$0xf]  ;;  %v8876_v56 = vld [vmem:[#allocation19 + $0x7ac] sm:$0xf0] }
 0x51c   : > { %4929 = vmatmul.bf16.vlgmr.msrb.gmra.mxu0 %v9991_v39  ;;  %4967 = vmatpush.bf16.msrb.mxu2 %v7726_v63  ;;  %v8257_v63 = vld [vmem:[#allocation19 + $0x840] sm:$0xf]  ;;  %v8194_v38 = vor.u32 %v8880_v16, %v8193_v30  ;;  %v8070_v46 = vor.u32 %v8846_v27, %v8067_v31  ;;  %v8830_v30 = vld [vmem:[#allocation19 + $0x644] sm:$0xf]  ;;  %v8003_v16 = vld [vmem:[#allocation19 + $0x650] sm:$0xf0] }
 0x51d   : > { %v8177_v12 = vld [vmem:[#allocation19 + $0x7a0] sm:$0xf]  ;;  %v8025_v27 = vld [vmem:[#allocation19 + $0x668] sm:$0xf]  ;;  %v8837_v31 = vld [vmem:[#allocation19 + $0x674] sm:$0xf0] }
 0x51e   : > { %4935 = vmatpush.bf16.msra.mxu3 %v7946_v21  ;;  %v8896_v21 = vld [vmem:[#allocation19 + $0x84c] sm:$0xf0] }
 0x51f   : > { %4948 = vmatpush.bf16.msrb.mxu1 %v7694_v37  ;;  %4974 = vmatpush.bf16.msra.mxu0 %v7950_v2  ;;  %v7866_v37 = vor.u32 %v8701_v49, %v7865_v42  ;;  %v7849_v2 = vld [vmem:[#allocation19 + $0x208] sm:$0xf]  ;;  %v8258_v7 = vor.u32 %v8896_v21, %v8257_v63  ;;  %v8161_v63 = vld [vmem:[#allocation19 + $0x780] sm:$0xf] }
 0x520   : > { %5595 = vmatpush.bf16.msra.mxu2 %v8338_v40  ;;  %v8631_v40 = vld [vmem:[#allocation19 + $0xc] sm:$0xf]  ;;  %v7850_v0 = vor.u32 %v8697_v3, %v7849_v2  ;;  %v8838_v2 = vld [vmem:[#allocation19 + $0x684] sm:$0xf]  ;;  %v8035_v3 = vld [vmem:[#allocation19 + $0x690] sm:$0xf0] }
 0x521   : > { %4968 = vmatmul.bf16.vlgmr.msrb.gmra.mxu2 %v9991_v39  ;;  %v7598_v47 = vor.u32 %v8631_v40, %v7595_v6  ;;  %v8038_v6 = vor.u32 %v8838_v2, %v8035_v3  ;;  %v8010_v2 = vor.u32 %v8833_v57, %v8009_v43  ;;  %v7971_v3 = vld [vmem:[#allocation19 + $0x610] sm:$0xf0] }
 0x522   : > { %4936 = vmatpush.bf16.msra.mxu3 %v7930_v8  ;;  %v10021_v52 = vpop.f32.mrf.mxu2  ;;  %v8241_v8 = vld [vmem:[#allocation19 + $0x820] sm:$0xf] }
 0x523   : > { %4949 = vmatpush.bf16.msrb.mxu1 %v7678_v10  ;;  %4975 = vmatpush.bf16.msra.mxu0 %v7934_v11  ;;  %v8892_v10 = vld [vmem:[#allocation19 + $0x82c] sm:$0xf0]  ;;  %v8081_v11 = vld [vmem:[#allocation19 + $0x6e0] sm:$0xf] }
 0x524   : > { %5596 = vmatpush.bf16.msra.mxu2 %v8322_v15  ;;  %v8884_v15 = vld [vmem:[#allocation19 + $0x7ec] sm:$0xf0]  ;;  %v8242_v19 = vor.u32 %v8892_v10, %v8241_v8 }
 0x525   : > { %v8210_v44 = vor.u32 %v8884_v15, %v8209_v14  ;;  %v8019_v14 = vld [vmem:[#allocation19 + $0x670] sm:$0xf0]  ;;  %v8041_v15 = vld [vmem:[#allocation19 + $0x688] sm:$0xf] }
 0x526   : > { %4937 = vmatpush.bf16.msra.mxu3 %v7914_v22  ;;  %v8082_v22 = vor.u32 %v8852_v60, %v8081_v11  ;;  %v8868_v11 = vld [vmem:[#allocation19 + $0x76c] sm:$0xf0]  ;;  %v8834_v60 = vld [vmem:[#allocation19 + $0x664] sm:$0xf] }
 0x527   : > { %4950 = vmatpush.bf16.msrb.mxu1 %v7662_v25  ;;  %4976 = vmatpush.bf16.msra.mxu0 %v7918_v26  ;;  %v8225_v25 = vld [vmem:[#allocation19 + $0x800] sm:$0xf]  ;;  %v8888_v26 = vld [vmem:[#allocation19 + $0x80c] sm:$0xf0] }
 0x528   : > { %5597 = vmatpush.bf16.msra.mxu2 %v8306_v23  ;;  %v8848_v23 = vld [vmem:[#allocation19 + $0x6cc] sm:$0xf0] }
 0x52a   : > { %4938 = vmatpush.bf16.msra.mxu3 %v7898_v33  ;;  %v4228_v9 = vpop.f32.mrf.mxu2  ;;  %v8853_v33 = vld [vmem:[#allocation19 + $0x6f4] sm:$0xf0] }
 0x52b   : > { %4951 = vmatpush.bf16.msrb.mxu1 %v7646_v36  ;;  %4977 = vmatpush.bf16.msra.mxu0 %v7902_v34  ;;  %v8226_v36 = vor.u32 %v8888_v26, %v8225_v25  ;;  %v8066_v34 = vor.u32 %v8848_v23, %v8065_v29  ;;  %v8090_v54 = vor.u32 %v8853_v33, %v8089_v32  ;;  %v8836_v9 = vld [vmem:[#allocation19 + $0x66c] sm:$0xf0]  ;;  %v8001_v26 = vld [vmem:[#allocation19 + $0x640] sm:$0xf] }
 0x52c   : > { %5598 = vmatpush.bf16.msra.mxu2 %v8290_v51  ;;  %v8844_v51 = vld [vmem:[#allocation19 + $0x6ac] sm:$0xf0]  ;;  %v8022_v25 = vor.u32 %v8834_v60, %v8019_v14  ;;  %v8042_v29 = vor.u32 %v8841_v41, %v8041_v15  ;;  %v8006_v33 = vor.u32 %v8830_v30, %v8003_v16  ;;  %v7977_v15 = vld [vmem:[#allocation19 + $0x608] sm:$0xf]  ;;  %v8825_v41 = vld [vmem:[#allocation19 + $0x614] sm:$0xf0] }
 0x52d   : > { %v8050_v42 = vor.u32 %v8844_v51, %v8049_v50  ;;  %v8864_v23 = vld [vmem:[#allocation19 + $0x74c] sm:$0xf0]  ;;  %v8026_v50 = vor.u32 %v8837_v31, %v8025_v27  ;;  %v8881_v30 = vld [vmem:[#allocation19 + $0x7d4] sm:$0xf0]  ;;  %v8883_v27 = vld [vmem:[#allocation19 + $0x7ec] sm:$0xf] }
 0x52e   : > { %4939 = vmatpush.bf16.msra.mxu3 %v7882_v62  ;;  %v8073_v62 = vld [vmem:[#allocation19 + $0x6c8] sm:$0xf]  ;;  %v8860_v51 = vld [vmem:[#allocation19 + $0x72c] sm:$0xf0]  ;;  %v10041_v31 = vrot.slane %v9989_v53, 1 }
 0x52f   : > { %4952 = vmatpush.bf16.msrb.mxu1 %v7630_v55  ;;  %4978 = vmatpush.bf16.msra.mxu0 %v7886_v58  ;;  %v8849_v55 = vld [vmem:[#allocation19 + $0x6d4] sm:$0xf0]  ;;  %v10027_v58 = vrot.slane %v9977_v18, 1 }
 0x530   : > { %5599 = vmatpush.bf16.msra.mxu2 %v8274_v61  ;;  %v8178_v61 = vor.u32 %v8876_v56, %v8177_v12  ;;  %v8074_v21 = vor.u32 %v8849_v55, %v8073_v62  ;;  %v8826_v12 = vld [vmem:[#allocation19 + $0x624] sm:$0xf] }
 0x532   : > { %4940 = vmatpush.bf16.msra.mxu3 %v7866_v37  ;;  %v8872_v37 = vld [vmem:[#allocation19 + $0x78c] sm:$0xf0] }
 0x533   : > { %4953 = vmatpush.bf16.msrb.mxu1 %v7614_v4  ;;  %4979 = vmatpush.bf16.msra.mxu0 %v7870_v20  ;;  %v8845_v4 = vld [vmem:[#allocation19 + $0x6b4] sm:$0xf0]  ;;  %v8034_v20 = vor.u32 %v8840_v24, %v8033_v35  ;;  %v8162_v40 = vor.u32 %v8872_v37, %v8161_v63  ;;  %v8097_v63 = vld [vmem:[#allocation19 + $0x700] sm:$0xf]  ;;  %v8822_v37 = vld [vmem:[#allocation19 + $0x604] sm:$0xf] }
 0x534   : > { %5600 = vmatpush.bf16.msra.mxu2 %v8258_v7  ;;  %v8017_v7 = vld [vmem:[#allocation19 + $0x660] sm:$0xf] }
 0x535   : > { %v8018_v17 = vor.u32 %v8836_v9, %v8017_v7  ;;  %v8339_v7 = vld [vmem:[#allocation19 + $0x8f0] sm:$0xf0]  ;;  %v8217_v9 = vld [vmem:[#allocation19 + $0x7e8] sm:$0xf] }
 0x536   : > { %4941 = vmatpush.bf16.msra.mxu3 %v7850_v0  ;;  %v4213_v49 = vpop.f32.mrf.mxu1  ;;  %v10029_v59 = vpop.f32.mrf.mxu0 }
 0x537   : > { %4954 = vmatpush.bf16.msrb.mxu1 %v7598_v47  ;;  %4980 = vmatpush.bf16.msra.mxu0 %v7854_v1 }
 0x538   : > { %5601 = vmatpush.bf16.msra.mxu2 %v8242_v19 }
 0x539   : > { %4942 = vmatmul.bf16.vlgmr.msra.gmra.mxu3 %v9977_v18 }
 0x53a   : > { %5569 = vmatpush.bf16.msrb.mxu3 %v8082_v22  ;;  %4955 = vmatmul.bf16.vlgmr.msrb.gmra.mxu1 %v9989_v53  ;;  %v8146_v22 = vor.u32 %v8868_v11, %v8145_v5  ;;  %v8885_v5 = vld [vmem:[#allocation19 + $0x7f4] sm:$0xf0]  ;;  %v8185_v53 = vld [vmem:[#allocation19 + $0x7a8] sm:$0xf] }
 0x53b   : > { %5582 = vmatpush.bf16.msra.mxu1 %v8210_v44  ;;  %5608 = vmatpush.bf16.msrb.mxu0 %v8086_v45  ;;  %v4200_v13 = vpop.f32.mrf.mxu3  ;;  %v8832_v44 = vld [vmem:[#allocation19 + $0x64c] sm:$0xf0]  ;;  %v8129_v45 = vld [vmem:[#allocation19 + $0x740] sm:$0xf] }
 0x53c   : > { %4981 = vmatmul.bf16.vlgmr.msra.gmra.mxu0 %v9977_v18  ;;  %5602 = vmatpush.bf16.msra.mxu2 %v8226_v36  ;;  %v8057_v18 = vld [vmem:[#allocation19 + $0x6a8] sm:$0xf]  ;;  %v4214_v10 = vadd.f32 %v4213_v49, %v4200_v13  ;;  %v8002_v32 = vor.u32 %v8832_v44, %v8001_v26  ;;  %v7969_v49 = vld [vmem:[#allocation19 + $0x600] sm:$0xf]  ;;  %v8910_v26 = vld [vmem:[#allocation19 + $0x8c4] sm:$0xf] }
 0x53d   : > { %v8058_v8 = vor.u32 %v8845_v4, %v8057_v18  ;;  %v4278_v0 = vpop.f32.mrf.mxu2  ;;  %v7993_v18 = vld [vmem:[#allocation19 + $0x628] sm:$0xf]  ;;  %v8829_v4 = vld [vmem:[#allocation19 + $0x634] sm:$0xf0] }
 0x53e   : > { %5570 = vmatpush.bf16.msrb.mxu3 %v8066_v34  ;;  %v4215_v47 = vpop.f32.mrf.mxu1  ;;  %v4241_v1 = vpop.f32.mrf.mxu0  ;;  %v10033_v19 = vadd.f32 %v10021_v52, %v4214_v10  ;;  %v8130_v52 = vor.u32 %v8864_v23, %v8129_v45  ;;  %v7985_v34 = vld [vmem:[#allocation19 + $0x620] sm:$0xf]  ;;  %v7974_v10 = vor.u32 %v8822_v37, %v7971_v3  ;;  %v7994_v60 = vor.u32 %v8829_v4, %v7993_v18  ;;  %v8201_v23 = vld [vmem:[#allocation19 + $0x7c8] sm:$0xf]  ;;  %v8873_v37 = vld [vmem:[#allocation19 + $0x794] sm:$0xf0] }
 0x53f   : > { %5583 = vmatpush.bf16.msra.mxu1 %v8194_v38  ;;  %5609 = vmatpush.bf16.msrb.mxu0 %v8070_v46  ;;  %v8828_v38 = vld [vmem:[#allocation19 + $0x62c] sm:$0xf0]  ;;  %v8113_v46 = vld [vmem:[#allocation19 + $0x720] sm:$0xf]  ;;  %v8218_v47 = vor.u32 %v8885_v5, %v8217_v9  ;;  %v8875_v3 = vld [vmem:[#allocation19 + $0x7ac] sm:$0xf] }
 0x540   : > { %5647 = vmatpush.bf16.msrb.mxu2 %v8090_v54  ;;  %v7987_v54 = vld [vmem:[#allocation19 + $0x630] sm:$0xf0]  ;;  %v7986_v62 = vor.u32 %v8828_v38, %v7985_v34  ;;  %v8202_v34 = vor.u32 %v8881_v30, %v8201_v23  ;;  %v8874_v38 = vld [vmem:[#allocation19 + $0x7a4] sm:$0xf]  ;;  %v8187_v18 = vld [vmem:[#allocation19 + $0x7b8] sm:$0xf0] }
 0x541   : > { %5603 = vmatmul.bf16.vlgmr.msra.gmra.mxu2 %v10027_v58  ;;  %v7990_v35 = vor.u32 %v8826_v12, %v7987_v54  ;;  %v8307_v12 = vld [vmem:[#allocation19 + $0x8b0] sm:$0xf0]  ;;  %v8877_v54 = vld [vmem:[#allocation19 + $0x7b4] sm:$0xf0]  ;;  %v8898_v5 = vld [vmem:[#allocation19 + $0x864] sm:$0xf] }
 0x542   : > { %5571 = vmatpush.bf16.msrb.mxu3 %v8050_v42  ;;  %v8147_v9 = vld [vmem:[#allocation19 + $0x770] sm:$0xf0]  ;;  %v8137_v23 = vld [vmem:[#allocation19 + $0x748] sm:$0xf]  ;;  %v8865_v30 = vld [vmem:[#allocation19 + $0x754] sm:$0xf0] }
 0x543   : > { %5584 = vmatpush.bf16.msra.mxu1 %v8178_v61  ;;  %5610 = vmatpush.bf16.msrb.mxu0 %v8054_v28  ;;  %v4202_v36 = vpop.f32.mrf.mxu3  ;;  %v8824_v61 = vld [vmem:[#allocation19 + $0x60c] sm:$0xf0]  ;;  %v8114_v28 = vor.u32 %v8860_v51, %v8113_v46  ;;  %v8179_v46 = vld [vmem:[#allocation19 + $0x7b0] sm:$0xf0] }
 0x544   : > { %5648 = vmatpush.bf16.msrb.mxu2 %v8074_v21  ;;  %v8856_v21 = vld [vmem:[#allocation19 + $0x70c] sm:$0xf0]  ;;  %v7970_v13 = vor.u32 %v8824_v61, %v7969_v49  ;;  %v8182_v57 = vor.u32 %v8874_v38, %v8179_v46  ;;  %v8870_v49 = vld [vmem:[#allocation19 + $0x784] sm:$0xf]  ;;  %v8163_v61 = vld [vmem:[#allocation19 + $0x790] sm:$0xf0]  ;;  %v8138_v38 = vor.u32 %v8865_v30, %v8137_v23 }
 0x545   : > { %v4280_v56 = vpop.f32.mrf.mxu2  ;;  %v8858_v46 = vld [vmem:[#allocation19 + $0x724] sm:$0xf] }
 0x546   : > { %5572 = vmatpush.bf16.msrb.mxu3 %v8034_v20  ;;  %v4265_v55 = vpop.f32.mrf.mxu1  ;;  %v4291_v42 = vpop.f32.mrf.mxu0  ;;  %v8882_v20 = vld [vmem:[#allocation19 + $0x7e4] sm:$0xf]  ;;  %v8203_v56 = vld [vmem:[#allocation19 + $0x7d8] sm:$0xf0] }
 0x547   : > { %5585 = vmatpush.bf16.msra.mxu1 %v8162_v40  ;;  %5611 = vmatpush.bf16.msrb.mxu0 %v8038_v6  ;;  %v10035_v24 = vadd.f32 %v4291_v42, %v4278_v0  ;;  %v8211_v40 = vld [vmem:[#allocation19 + $0x7f0] sm:$0xf0]  ;;  %v8914_v6 = vld [vmem:[#allocation19 + $0x8e4] sm:$0xf] }
 0x548   : > { %5649 = vmatpush.bf16.msrb.mxu2 %v8058_v8  ;;  %v8098_v8 = vor.u32 %v8856_v21, %v8097_v63  ;;  %v8214_v14 = vor.u32 %v8882_v20, %v8211_v40  ;;  %v8291_v63 = vld [vmem:[#allocation19 + $0x890] sm:$0xf0]  ;;  %v8169_v21 = vld [vmem:[#allocation19 + $0x788] sm:$0xf]  ;;  %v8166_v40 = vor.u32 %v8870_v49, %v8163_v61 }
 0x54a   : > { %5573 = vmatpush.bf16.msrb.mxu3 %v8018_v17  ;;  %v8342_v17 = vor.u32 %v8914_v6, %v8339_v7  ;;  %v8866_v7 = vld [vmem:[#allocation19 + $0x764] sm:$0xf] }
 0x54b   : > { %5586 = vmatpush.bf16.msra.mxu1 %v8146_v22  ;;  %5612 = vmatpush.bf16.msrb.mxu0 %v8022_v25  ;;  %v4252_v11 = vpop.f32.mrf.mxu3  ;;  %v8878_v22 = vld [vmem:[#allocation19 + $0x7c4] sm:$0xf]  ;;  %v8195_v25 = vld [vmem:[#allocation19 + $0x7d0] sm:$0xf0] }
 0x54c   : > { %5650 = vmatpush.bf16.msrb.mxu2 %v8042_v29  ;;  %v4253_v0 = vadd.f32 %v4252_v11, %v10029_v59  ;;  %v8323_v29 = vld [vmem:[#allocation19 + $0x8d0] sm:$0xf0]  ;;  %v8219_v59 = vld [vmem:[#allocation19 + $0x7f8] sm:$0xf0] }
 0x54d   : > { %v4330_v1 = vpop.f32.mrf.mxu2  ;;  %v8326_v36 = vor.u32 %v8910_v26, %v8323_v29  ;;  %v8222_v51 = vor.u32 %v8883_v27, %v8219_v59  ;;  %v8275_v11 = vld [vmem:[#allocation19 + $0x870] sm:$0xf0]  ;;  %v8894_v26 = vld [vmem:[#allocation19 + $0x844] sm:$0xf]  ;;  %v8867_v59 = vld [vmem:[#allocation19 + $0x76c] sm:$0xf] }
 0x54e   : > { %5574 = vmatpush.bf16.msrb.mxu3 %v8002_v32  ;;  %v4267_v44 = vpop.f32.mrf.mxu1  ;;  %v4293_v45 = vpop.f32.mrf.mxu0  ;;  %v10038_v16 = vadd.f32 %v4265_v55, %v4253_v0  ;;  %v10044_v32 = vrot.slane %v9991_v39, 1  ;;  %v8879_v39 = vld [vmem:[#allocation19 + $0x7cc] sm:$0xf]  ;;  %v8186_v55 = vor.u32 %v8877_v54, %v8185_v53  ;;  %v8259_v29 = vld [vmem:[#allocation19 + $0x850] sm:$0xf0] }
 0x54f   : > { %5587 = vmatpush.bf16.msra.mxu1 %v8130_v52  ;;  %5613 = vmatpush.bf16.msrb.mxu0 %v8006_v33  ;;  %v7978_v52 = vor.u32 %v8825_v41, %v7977_v15  ;;  %v8198_v33 = vor.u32 %v8878_v22, %v8195_v25  ;;  %v8871_v0 = vld [vmem:[#allocation19 + $0x78c] sm:$0xf]  ;;  %v8171_v15 = vld [vmem:[#allocation19 + $0x798] sm:$0xf0]  ;;  %v8150_v41 = vor.u32 %v8866_v7, %v8147_v9  ;;  %v8862_v22 = vld [vmem:[#allocation19 + $0x744] sm:$0xf] }
 0x550   : > { %5651 = vmatpush.bf16.msrb.mxu2 %v8026_v50  ;;  %v8906_v50 = vld [vmem:[#allocation19 + $0x8a4] sm:$0xf]  ;;  %v8131_v25 = vld [vmem:[#allocation19 + $0x750] sm:$0xf0]  ;;  %v8174_v44 = vor.u32 %v8871_v0, %v8171_v15  ;;  %v8121_v54 = vld [vmem:[#allocation19 + $0x728] sm:$0xf] }
 0x551   : > { %v8243_v53 = vld [vmem:[#allocation19 + $0x830] sm:$0xf0]  ;;  %v8347_v7 = vld [vmem:[#allocation19 + $0x8f8] sm:$0xf0] }
 0x552   : > { %5575 = vmatpush.bf16.msrb.mxu3 %v7986_v62  ;;  %v8310_v62 = vor.u32 %v8906_v50, %v8307_v12  ;;  %v8115_v50 = vld [vmem:[#allocation19 + $0x730] sm:$0xf0]  ;;  %v8107_v0 = vld [vmem:[#allocation19 + $0x718] sm:$0xf0] }
 0x553   : > { %5588 = vmatpush.bf16.msra.mxu1 %v8114_v28  ;;  %5614 = vmatpush.bf16.msrb.mxu0 %v7990_v35  ;;  %v4254_v43 = vpop.f32.mrf.mxu3  ;;  %v8902_v28 = vld [vmem:[#allocation19 + $0x884] sm:$0xf]  ;;  %v8206_v35 = vor.u32 %v8879_v39, %v8203_v56  ;;  %v8861_v39 = vld [vmem:[#allocation19 + $0x734] sm:$0xf0]  ;;  %v8863_v56 = vld [vmem:[#allocation19 + $0x74c] sm:$0xf] }
 0x554   : > { %5652 = vmatpush.bf16.msrb.mxu2 %v8010_v2  ;;  %v8294_v6 = vor.u32 %v8902_v28, %v8291_v63  ;;  %v8139_v43 = vld [vmem:[#allocation19 + $0x758] sm:$0xf0]  ;;  %v8122_v49 = vor.u32 %v8861_v39, %v8121_v54  ;;  %v8886_v28 = vld [vmem:[#allocation19 + $0x804] sm:$0xf]  ;;  %v8105_v63 = vld [vmem:[#allocation19 + $0x708] sm:$0xf] }
 0x555   : > { %v4332_v42 = vpop.f32.mrf.mxu2  ;;  %v8043_v54 = vld [vmem:[#allocation19 + $0x698] sm:$0xf0]  ;;  %v8903_v39 = vld [vmem:[#allocation19 + $0x88c] sm:$0xf] }
 0x556   : > { %5576 = vmatpush.bf16.msrb.mxu3 %v7970_v13  ;;  %v8170_v13 = vor.u32 %v8873_v37, %v8169_v21  ;;  %v8142_v21 = vor.u32 %v8863_v56, %v8139_v43  ;;  %v8857_v37 = vld [vmem:[#allocation19 + $0x714] sm:$0xf0]  ;;  %v8299_v56 = vld [vmem:[#allocation19 + $0x898] sm:$0xf0] }
 0x557   : > { %5589 = vmatpush.bf16.msra.mxu1 %v8098_v8  ;;  %5615 = vmatpush.bf16.msrb.mxu0 %v7974_v10  ;;  %v4317_v2 = vpop.f32.mrf.mxu1  ;;  %v8190_v10 = vor.u32 %v8875_v3, %v8187_v18  ;;  %v8123_v3 = vld [vmem:[#allocation19 + $0x738] sm:$0xf0]  ;;  %v8345_v18 = vld [vmem:[#allocation19 + $0x8e8] sm:$0xf] }
 0x558   : > { %5653 = vmatpush.bf16.msrb.mxu2 %v7994_v60  ;;  %v4331_v4 = vadd.f32 %v4330_v1, %v4317_v2  ;;  %v8153_v60 = vld [vmem:[#allocation19 + $0x768] sm:$0xf]  ;;  %v8859_v2 = vld [vmem:[#allocation19 + $0x72c] sm:$0xf] }
 0x559   : > { %5577 = vmatmul.bf16.vlgmr.msrb.gmra.mxu3 %v10041_v31  ;;  %v4343_v20 = vpop.f32.mrf.mxu0 }
 0x55a   : > { %5621 = vmatpush.bf16.msra.mxu3 %v8214_v14  ;;  %5590 = vmatmul.bf16.vlgmr.msra.gmra.mxu1 %v10044_v32  ;;  %v10050_v8 = vadd.f32 %v4343_v20, %v4331_v4  ;;  %v8869_v14 = vld [vmem:[#allocation19 + $0x774] sm:$0xf0]  ;;  %v8851_v20 = vld [vmem:[#allocation19 + $0x6ec] sm:$0xf] }
 0x55b   : > { %5634 = vmatpush.bf16.msrb.mxu1 %v8342_v17  ;;  %5660 = vmatpush.bf16.msra.mxu0 %v8218_v47  ;;  %v8278_v17 = vor.u32 %v8898_v5, %v8275_v11  ;;  %v8154_v47 = vor.u32 %v8869_v14, %v8153_v60  ;;  %v8917_v4 = vld [vmem:[#allocation19 + $0x8f4] sm:$0xf0]  ;;  %v8106_v5 = vor.u32 %v8857_v37, %v8105_v63  ;;  %v8855_v14 = vld [vmem:[#allocation19 + $0x70c] sm:$0xf]  ;;  %v8027_v63 = vld [vmem:[#allocation19 + $0x678] sm:$0xf0] }
 0x55c   : > { %5616 = vmatmul.bf16.vlgmr.msrb.gmra.mxu0 %v10041_v31  ;;  %5654 = vmatpush.bf16.msrb.mxu2 %v7978_v52  ;;  %v4304_v1 = vpop.f32.mrf.mxu3  ;;  %v8155_v52 = vld [vmem:[#allocation19 + $0x778] sm:$0xf0]  ;;  %v8346_v60 = vor.u32 %v8917_v4, %v8345_v18  ;;  %v8265_v4 = vld [vmem:[#allocation19 + $0x848] sm:$0xf] }
 0x55d   : > { %v10053_v45 = vadd.f32 %v4304_v1, %v10035_v24  ;;  %v8158_v12 = vor.u32 %v8867_v59, %v8155_v52  ;;  %v8847_v1 = vld [vmem:[#allocation19 + $0x6cc] sm:$0xf]  ;;  %v8909_v59 = vld [vmem:[#allocation19 + $0x8b4] sm:$0xf0]  ;;  %v8283_v37 = vld [vmem:[#allocation19 + $0x878] sm:$0xf0] }
 0x55e   : > { %5622 = vmatpush.bf16.msra.mxu3 %v8198_v33  ;;  %v8843_v52 = vld [vmem:[#allocation19 + $0x6ac] sm:$0xf] }
 0x55f   : > { %5635 = vmatpush.bf16.msrb.mxu1 %v8326_v36  ;;  %5661 = vmatpush.bf16.msra.mxu0 %v8202_v34  ;;  %v4319_v27 = vpop.f32.mrf.mxu1  ;;  %v8134_v36 = vor.u32 %v8862_v22, %v8131_v25  ;;  %v8262_v34 = vor.u32 %v8894_v26, %v8259_v29  ;;  %v8075_v22 = vld [vmem:[#allocation19 + $0x6d8] sm:$0xf0]  ;;  %v8911_v25 = vld [vmem:[#allocation19 + $0x8cc] sm:$0xf] }
 0x560   : > { %5699 = vmatpush.bf16.msra.mxu2 %v8222_v51  ;;  %v8890_v51 = vld [vmem:[#allocation19 + $0x824] sm:$0xf]  ;;  %v8331_v26 = vld [vmem:[#allocation19 + $0x8d8] sm:$0xf0]  ;;  %v8078_v23 = vor.u32 %v8847_v1, %v8075_v22  ;;  %v8313_v27 = vld [vmem:[#allocation19 + $0x8a8] sm:$0xf] }
 0x561   : > { %5655 = vmatmul.bf16.vlgmr.msrb.gmra.mxu2 %v10041_v31  ;;  %v4345_v33 = vpop.f32.mrf.mxu0  ;;  %v8246_v42 = vor.u32 %v8890_v51, %v8243_v53  ;;  %v8334_v30 = vor.u32 %v8911_v25, %v8331_v26  ;;  %v8297_v51 = vld [vmem:[#allocation19 + $0x888] sm:$0xf]  ;;  %v8839_v53 = vld [vmem:[#allocation19 + $0x68c] sm:$0xf]  ;;  %v8251_v22 = vld [vmem:[#allocation19 + $0x838] sm:$0xf0] }
 0x562   : > { %5623 = vmatpush.bf16.msra.mxu3 %v8182_v57  ;;  %v8118_v57 = vor.u32 %v8858_v46, %v8115_v50  ;;  %v8059_v33 = vld [vmem:[#allocation19 + $0x6b8] sm:$0xf0]  ;;  %v8891_v1 = vld [vmem:[#allocation19 + $0x82c] sm:$0xf] }
 0x563   : > { %5636 = vmatpush.bf16.msrb.mxu1 %v8310_v62  ;;  %5662 = vmatpush.bf16.msra.mxu0 %v8186_v55  ;;  %v8854_v62 = vld [vmem:[#allocation19 + $0x704] sm:$0xf]  ;;  %v8099_v55 = vld [vmem:[#allocation19 + $0x710] sm:$0xf0]  ;;  %v8062_v46 = vor.u32 %v8843_v52, %v8059_v33  ;;  %v7979_v52 = vld [vmem:[#allocation19 + $0x618] sm:$0xf0] }
 0x564   : > { %5700 = vmatpush.bf16.msra.mxu2 %v8206_v35  ;;  %v10055_v24 = vpop.f32.mrf.mxu2  ;;  %v4306_v61 = vpop.f32.mrf.mxu3  ;;  %v8227_v35 = vld [vmem:[#allocation19 + $0x810] sm:$0xf0]  ;;  %v8887_v33 = vld [vmem:[#allocation19 + $0x80c] sm:$0xf] }
 0x565   : > { %v8230_v9 = vor.u32 %v8886_v28, %v8227_v35  ;;  %v8281_v61 = vld [vmem:[#allocation19 + $0x868] sm:$0xf]  ;;  %v8901_v28 = vld [vmem:[#allocation19 + $0x874] sm:$0xf0]  ;;  %v8835_v35 = vld [vmem:[#allocation19 + $0x66c] sm:$0xf] }
 0x566   : > { %5624 = vmatpush.bf16.msra.mxu3 %v8166_v40  ;;  %v8102_v40 = vor.u32 %v8854_v62, %v8099_v55 }
 0x567   : > { %5637 = vmatpush.bf16.msrb.mxu1 %v8294_v6  ;;  %5663 = vmatpush.bf16.msra.mxu0 %v8170_v13  ;;  %v8091_v6 = vld [vmem:[#allocation19 + $0x6f8] sm:$0xf0]  ;;  %v8915_v13 = vld [vmem:[#allocation19 + $0x8ec] sm:$0xf] }
 0x568   : > { %5701 = vmatpush.bf16.msra.mxu2 %v8190_v10  ;;  %v8126_v10 = vor.u32 %v8859_v2, %v8123_v3  ;;  %v8094_v15 = vor.u32 %v8851_v20, %v8091_v6  ;;  %v8282_v2 = vor.u32 %v8901_v28, %v8281_v61  ;;  %v8897_v20 = vld [vmem:[#allocation19 + $0x854] sm:$0xf0]  ;;  %v8011_v6 = vld [vmem:[#allocation19 + $0x658] sm:$0xf0] }
 0x56a   : > { %5625 = vmatpush.bf16.msra.mxu3 %v8150_v41  ;;  %v8350_v41 = vor.u32 %v8915_v13, %v8347_v7  ;;  %v8895_v13 = vld [vmem:[#allocation19 + $0x84c] sm:$0xf]  ;;  %v8267_v7 = vld [vmem:[#allocation19 + $0x858] sm:$0xf0] }
 0x56b   : > { %5638 = vmatpush.bf16.msrb.mxu1 %v8278_v17  ;;  %5664 = vmatpush.bf16.msra.mxu0 %v8154_v47  ;;  %v8329_v17 = vld [vmem:[#allocation19 + $0x8c8] sm:$0xf]  ;;  %v8913_v47 = vld [vmem:[#allocation19 + $0x8d4] sm:$0xf0] }
 0x56c   : > { %5702 = vmatpush.bf16.msra.mxu2 %v8174_v44  ;;  %v4867_v11 = vpop.f32.mrf.mxu2  ;;  %v8110_v44 = vor.u32 %v8855_v14, %v8107_v0  ;;  %v8330_v29 = vor.u32 %v8913_v47, %v8329_v17  ;;  %v8270_v14 = vor.u32 %v8895_v13, %v8267_v7  ;;  %v8249_v0 = vld [vmem:[#allocation19 + $0x828] sm:$0xf] }
 0x56d   : > { %v8266_v11 = vor.u32 %v8897_v20, %v8265_v4  ;;  %v10078_v4 = vld [vmem:[#allocation20] sm:$0xf] }
 0x56e   : > { %5626 = vmatpush.bf16.msra.mxu3 %v8134_v36  ;;  %v8907_v36 = vld [vmem:[#allocation19 + $0x8ac] sm:$0xf] }
 0x56f   : > { %5639 = vmatpush.bf16.msrb.mxu1 %v8262_v34  ;;  %5665 = vmatpush.bf16.msra.mxu0 %v8138_v38  ;;  %v8315_v34 = vld [vmem:[#allocation19 + $0x8b8] sm:$0xf0]  ;;  %v8314_v38 = vor.u32 %v8909_v59, %v8313_v27  ;;  %v8889_v27 = vld [vmem:[#allocation19 + $0x814] sm:$0xf0]  ;;  %v8823_v59 = vld [vmem:[#allocation19 + $0x60c] sm:$0xf] }
 0x570   : > { %5703 = vmatpush.bf16.msra.mxu2 %v8158_v12  ;;  %v8318_v50 = vor.u32 %v8907_v36, %v8315_v34  ;;  %v8905_v12 = vld [vmem:[#allocation19 + $0x894] sm:$0xf0]  ;;  %v7982_v34 = vor.u32 %v8823_v59, %v7979_v52 }
 0x571   : > { %v8298_v62 = vor.u32 %v8905_v12, %v8297_v51 }
 0x572   : > { %5627 = vmatpush.bf16.msra.mxu3 %v8118_v57 }
 0x573   : > { %5640 = vmatpush.bf16.msrb.mxu1 %v8246_v42  ;;  %5666 = vmatpush.bf16.msra.mxu0 %v8122_v49  ;;  %v8046_v42 = vor.u32 %v8839_v53, %v8043_v54  ;;  %v8302_v49 = vor.u32 %v8903_v39, %v8299_v56 }
 0x574   : > { %5704 = vmatpush.bf16.msra.mxu2 %v8142_v21  ;;  %v8899_v21 = vld [vmem:[#allocation19 + $0x86c] sm:$0xf] }
 0x575   : > { %v8286_v3 = vor.u32 %v8899_v21, %v8283_v37 }
 0x576   : > { %5628 = vmatpush.bf16.msra.mxu3 %v8102_v40  ;;  %v8831_v40 = vld [vmem:[#allocation19 + $0x64c] sm:$0xf] }
 0x577   : > { %5641 = vmatpush.bf16.msrb.mxu1 %v8230_v9  ;;  %5667 = vmatpush.bf16.msra.mxu0 %v8106_v5  ;;  %v4852_v43 = vpop.f32.mrf.mxu1 }
 0x578   : > { %5705 = vmatpush.bf16.msra.mxu2 %v8126_v10 }
 0x579   : > { %5629 = vmatmul.bf16.vlgmr.msra.gmra.mxu3 %v10044_v32  ;;  %v4878_v57 = vpop.f32.mrf.mxu0 }
 0x57a   : > { %5673 = vmatpush.bf16.msrb.mxu3 %v8346_v60  ;;  %5642 = vmatmul.bf16.vlgmr.msrb.gmra.mxu1 %v10027_v58  ;;  %v10062_v55 = vadd.f32 %v4878_v57, %v10038_v16  ;;  %v8014_v60 = vor.u32 %v8831_v40, %v8011_v6  ;;  %v10080_v40 = vld [vmem:[#allocation22] sm:$0xf]  ;;  %v5731_v6 = vperm.slane %v10078_v4, 0 }
 0x57b   : > { %5686 = vmatpush.bf16.msra.mxu1 %v8094_v15  ;;  %5712 = vmatpush.bf16.msrb.mxu0 %v8350_v41  ;;  %v8893_v15 = vld [vmem:[#allocation19 + $0x834] sm:$0xf0]  ;;  %v8827_v41 = vld [vmem:[#allocation19 + $0x62c] sm:$0xf] }
 0x57c   : > { %5668 = vmatmul.bf16.vlgmr.msra.gmra.mxu0 %v10044_v32  ;;  %5706 = vmatpush.bf16.msra.mxu2 %v8110_v44  ;;  %v4839_v18 = vpop.f32.mrf.mxu3  ;;  %v8250_v26 = vor.u32 %v8893_v15, %v8249_v0 }
 0x57d   : > { %v4840_v16 = vadd.f32 %v4839_v18, %v10033_v19  ;;  %v7995_v19 = vld [vmem:[#allocation19 + $0x638] sm:$0xf0] }
 0x57e   : > { %5674 = vmatpush.bf16.msrb.mxu3 %v8330_v29  ;;  %v7998_v44 = vor.u32 %v8827_v41, %v7995_v19  ;;  %v8254_v29 = vor.u32 %v8891_v1, %v8251_v22 }
 0x57f   : > { %5687 = vmatpush.bf16.msra.mxu1 %v8078_v23  ;;  %5713 = vmatpush.bf16.msrb.mxu0 %v8334_v30  ;;  %v4854_v9 = vpop.f32.mrf.mxu1  ;;  %v4853_v5 = vadd.f32 %v4852_v43, %v4840_v16  ;;  %v8233_v30 = vld [vmem:[#allocation19 + $0x808] sm:$0xf] }
 0x580   : > { %5707 = vmatmul.bf16.vlgmr.msra.gmra.mxu2 %v10044_v32  ;;  %v8030_v32 = vor.u32 %v8835_v35, %v8027_v63  ;;  %v8234_v36 = vor.u32 %v8889_v27, %v8233_v30  ;;  %v5745_v9 = vperm.slane %v10080_v40, 0 }
 0x581   : > { %v4880_v10 = vpop.f32.mrf.mxu0  ;;  %v10066_v17 = vadd.f32 %v10055_v24, %v4853_v5  ;;  %v8235_v24 = vld [vmem:[#allocation19 + $0x818] sm:$0xf0] }
 0x582   : > { %5675 = vmatpush.bf16.msrb.mxu3 %v8314_v38  ;;  %v8238_v38 = vor.u32 %v8887_v33, %v8235_v24  ;;  %v5828_v33 = vld [vmem:[%s10190_s10 + $0x78] sm:$0xff] }
 0x583   : > { %5688 = vmatpush.bf16.msra.mxu1 %v8062_v46  ;;  %5714 = vmatpush.bf16.msrb.mxu0 %v8318_v50 }
 0x584   : > { %v4917_v47 = vpop.f32.mrf.mxu2  ;;  %v4841_v23 = vpop.f32.mrf.mxu3 }
 0x585   : > { %v4918_v25 = vadd.f32 %v4917_v47, %v10053_v45 }
 0x586   : > { %5676 = vmatpush.bf16.msrb.mxu3 %v8298_v62 }
 0x587   : > { %5689 = vmatpush.bf16.msra.mxu1 %v8046_v42  ;;  %5715 = vmatpush.bf16.msrb.mxu0 %v8302_v49 }
 0x58a   : > { %5677 = vmatpush.bf16.msrb.mxu3 %v8282_v2 }
 0x58b   : > { %5690 = vmatpush.bf16.msra.mxu1 %v8030_v32  ;;  %5716 = vmatpush.bf16.msrb.mxu0 %v8286_v3 }
 0x58c   : > { %v4919_v45 = vpop.f32.mrf.mxu2 }
 0x58d   : > { %v5825_v45 = vld [vmem:[%s10190_s10 + $0x60] sm:$0xff] }
 0x58e   : > { %5678 = vmatpush.bf16.msrb.mxu3 %v8266_v11 }
 0x58f   : > { %5691 = vmatpush.bf16.msra.mxu1 %v8014_v60  ;;  %5717 = vmatpush.bf16.msrb.mxu0 %v8270_v14 }
 0x592   : > { %5679 = vmatpush.bf16.msrb.mxu3 %v8250_v26  ;;  %v5732_v26 = vperm.slane %v10078_v4, 1 }
 0x593   : > { %5692 = vmatpush.bf16.msra.mxu1 %v7998_v44  ;;  %5718 = vmatpush.bf16.msrb.mxu0 %v8254_v29  ;;  %v5746_v29 = vperm.slane %v10080_v40, 1 }
 0x596   : > { %5680 = vmatpush.bf16.msrb.mxu3 %v8234_v36 }
 0x597   : > { %5693 = vmatpush.bf16.msra.mxu1 %v7982_v34  ;;  %5719 = vmatpush.bf16.msrb.mxu0 %v8238_v38  ;;  %v4904_v46 = vpop.f32.mrf.mxu1  ;;  %v5827_v34 = vld [vmem:[%s10190_s10 + $0x70] sm:$0xff]  ;;  %v5826_v38 = vld [vmem:[%s10190_s10 + $0x68] sm:$0xff] }
 0x599   : > { %5681 = vmatmul.bf16.vlgmr.msrb.gmra.mxu3 %v10027_v58  ;;  %v4930_v50 = vpop.f32.mrf.mxu0 }
 0x59a   : > { %5694 = vmatmul.bf16.vlgmr.msra.gmra.mxu1 %v10041_v31  ;;  %5720 = vmatmul.bf16.vlgmr.msrb.gmra.mxu0 %v10027_v58  ;;  %v4931_v51 = vadd.f32 %v4930_v50, %v4918_v25  ;;  %v5823_v50 = vld [vmem:[%s10190_s10 + $0x50] sm:$0xff] }
 0x59b   : > { %5830 = vmatpush.msra.mxu3 %v5828_v33 }
 0x59c   : > { %v4891_v12 = vpop.f32.mrf.mxu3 }
 0x59d   : > { %v4892_v53 = vadd.f32 %v4891_v12, %v10062_v55  ;;  %5831 = vmatpush.msra.mxu3 %v5827_v34 }
 0x59f   : > { %v4906_v54 = vpop.f32.mrf.mxu1  ;;  %v4905_v39 = vadd.f32 %v4904_v46, %v4892_v53  ;;  %5832 = vmatpush.msra.mxu3 %v5826_v38  ;;  %v5824_v46 = vld [vmem:[%s10190_s10 + $0x58] sm:$0xff] }
 0x5a0   : > { %v5821_v54 = vld [vmem:[%s10190_s10 + $0x40] sm:$0xff] }
 0x5a1   : > { %v4932_v56 = vpop.f32.mrf.mxu0  ;;  %5833 = vmatpush.msra.mxu3 %v5825_v45 }
 0x5a2   : > { %v5820_v56 = vld [vmem:[%s10190_s10 + $0x38] sm:$0xff] }
 0x5a3   : > { %5834 = vmatpush.msra.mxu3 %v5824_v46 }
 0x5a4   : > { %v4969_v43 = vpop.f32.mrf.mxu2  ;;  %v4893_v57 = vpop.f32.mrf.mxu3 }
 0x5a5   : > { %5835 = vmatpush.msra.mxu3 %v5823_v50  ;;  %v5734_v57 = vperm.slane %v10078_v4, 3 }
 0x5ac   : > { %v4971_v62 = vpop.f32.mrf.mxu2 }
 0x5b7   : > { %v4956_v42 = vpop.f32.mrf.mxu1 }
 0x5b8   : > { %v4957_v49 = vadd.f32 %v4956_v42, %v10050_v8  ;;  %v5819_v42 = vld [vmem:[%s10190_s10 + $0x30] sm:$0xff] }
 0x5b9   : > { %v4982_v61 = vpop.f32.mrf.mxu0 }
 0x5ba   : > { %v4970_v28 = vadd.f32 %v4969_v43, %v4957_v49 }
 0x5bc   : > { %v10074_v31 = vadd.f32 %v4982_v61, %v4970_v28  ;;  %v4943_v58 = vpop.f32.mrf.mxu3  ;;  %v5748_v61 = vperm.slane %v10080_v40, 3 }
 0x5bd   : > { %v10076_v35 = vadd.f32 %v4943_v58, %v4931_v51  ;;  %v5822_v51 = vld [vmem:[%s10190_s10 + $0x48] sm:$0xff] }
 0x5be   : > { %5836 = vmatpush.msra.mxu3 %v5822_v51 }
 0x5bf   : > { %v4958_v63 = vpop.f32.mrf.mxu1 }
 0x5c0   : > { %5837 = vmatpush.msra.mxu3 %v5821_v54  ;;  %v5733_v63 = vperm.slane %v10078_v4, 2  ;;  %v5816_v4 = vld [vmem:[%s10190_s10 + $0x18] sm:$0xff] }
 0x5c1   : > { %v4984_v21 = vpop.f32.mrf.mxu0 }
 0x5c2   : > { %5838 = vmatpush.msra.mxu3 %v5820_v56  ;;  %v5818_v21 = vld [vmem:[%s10190_s10 + $0x28] sm:$0xff] }
 0x5c4   : > { %v5604_v37 = vpop.f32.mrf.mxu2  ;;  %v4945_v55 = vpop.f32.mrf.mxu3  ;;  %5839 = vmatpush.msra.mxu3 %v5819_v42 }
 0x5c6   : > { %5840 = vmatpush.msra.mxu3 %v5818_v21 }
 0x5cc   : > { %v5606_v2 = vpop.f32.mrf.mxu2 }
 0x5cd   : > { %v5747_v2 = vperm.slane %v10080_v40, 2 }
 0x5d7   : > { %v5591_v32 = vpop.f32.mrf.mxu1 }
 0x5d9   : > { %v5617_v3 = vpop.f32.mrf.mxu0 }
 0x5dc   : > { %v5578_v18 = vpop.f32.mrf.mxu3 }
 0x5dd   : > { %v5592_v20 = vadd.f32 %v5591_v32, %v5578_v18 }
 0x5df   : > { %v5593_v8 = vpop.f32.mrf.mxu1  ;;  %v5605_v16 = vadd.f32 %v5604_v37, %v5592_v20 }
 0x5e1   : > { %v5619_v13 = vpop.f32.mrf.mxu0  ;;  %v5725_v7 = vadd.f32 %v5605_v16, %v10066_v17 }
 0x5e3   : > { %v5739_v10 = vmul.f32 %v5731_v6, %v5725_v7  ;;  %v5814_v7 = vld [vmem:[%s10190_s10 + $0x8] sm:$0xff] }
 0x5e4   : > { %v5656_v5 = vpop.f32.mrf.mxu2  ;;  %v5580_v11 = vpop.f32.mrf.mxu3 }
 0x5e5   : > { %v5753_v60 = vadd.f32 %v5745_v9, %v5739_v10  ;;  %v5777_v10 = vld [vmem:[#allocation6] ss:$8 sm:$0xf] }
 0x5e7   : > { %v5757_v14 = vmax.f32 %v5753_v60, 0.0 }
 0x5e9   : > { %v5765_v0 = vrot.slane %v5757_v14, 7 }
 0x5eb   : > { %5773 = vst [vmem:[#allocation6] sm:$0x1e] %v5765_v0 }
 0x5ec   : > { %v5658_v15 = vpop.f32.mrf.mxu2 }
 0x5f7   : > { %v5643_v41 = vpop.f32.mrf.mxu1 }
 0x5f9   : > { %v5669_v47 = vpop.f32.mrf.mxu0 }
 0x5fa   : > { %v5670_v62 = vadd.f32 %v5669_v47, %v5656_v5  ;;  %v5813_v5 = vld [vmem:[%s10190_s10] sm:$0xff] }
 0x5fc   : > { %v5630_v19 = vpop.f32.mrf.mxu3 }
 0x5fd   : > { %v5631_v1 = vadd.f32 %v5630_v19, %v5617_v3 }
 0x5ff   : > { %v5645_v22 = vpop.f32.mrf.mxu1  ;;  %v5644_v25 = vadd.f32 %v5643_v41, %v5631_v1 }
 0x601   : > { %v5671_v44 = vpop.f32.mrf.mxu0  ;;  %v5726_v17 = vadd.f32 %v5644_v25, %v4905_v39 }
 0x603   : > { %v5708_v23 = vpop.f32.mrf.mxu2  ;;  %v5740_v30 = vmul.f32 %v5732_v26, %v5726_v17 }
 0x604   : > { %v5632_v27 = vpop.f32.mrf.mxu3 }
 0x605   : > { %v5754_v59 = vadd.f32 %v5746_v29, %v5740_v30 }
 0x607   : > { %v5758_v52 = vmax.f32 %v5754_v59, 0.0 }
 0x609   : > { %v5766_v24 = vrot.slane %v5758_v52, 7 }
 0x60b   : > { %v5710_v36 = vpop.f32.mrf.mxu2  ;;  %5774 = vst [vmem:[#allocation6 + $0x8] sm:$0x1e] %v5766_v24 }
 0x60c   : > { %v5829_v36 = vld [vmem:[#allocation23] sm:$0x1] }
 0x617   : > { %v5695_v12 = vpop.f32.mrf.mxu1  ;;  %v5721_v53 = vpop.f32.mrf.mxu0 }
 0x618   : > { %v5709_v39 = vadd.f32 %v5708_v23, %v5695_v12 }
 0x61a   : > { %v5722_v43 = vadd.f32 %v5721_v53, %v5709_v39 }
 0x61c   : > { %v5728_v49 = vadd.f32 %v5722_v43, %v10074_v31  ;;  %v5682_v28 = vpop.f32.mrf.mxu3  ;;  %v5817_v31 = vld [vmem:[%s10190_s10 + $0x20] sm:$0xff] }
 0x61d   : > { %v5683_v58 = vadd.f32 %v5682_v28, %v5670_v62  ;;  %5841 = vmatpush.msra.mxu3 %v5817_v31 }
 0x61e   : > { %v5742_v37 = vmul.f32 %v5734_v57, %v5728_v49 }
 0x61f   : > { %v5727_v55 = vadd.f32 %v5683_v58, %v10076_v35  ;;  %v5697_v32 = vpop.f32.mrf.mxu1  ;;  %v5723_v3 = vpop.f32.mrf.mxu0  ;;  %v5815_v35 = vld [vmem:[%s10190_s10 + $0x10] sm:$0xff]  ;;  %5842 = vmatpush.msra.mxu3 %v5816_v4 }
 0x620   : > { %v5756_v18 = vadd.f32 %v5748_v61, %v5742_v37 }
 0x621   : > { %v5741_v20 = vmul.f32 %v5733_v63, %v5727_v55  ;;  %5843 = vmatpush.msra.mxu3 %v5815_v35 }
 0x622   : > { %v5760_v8 = vmax.f32 %v5756_v18, 0.0 }
 0x623   : > { %v5755_v16 = vadd.f32 %v5747_v2, %v5741_v20  ;;  %5844 = vmatpush.msra.mxu3 %v5814_v7 }
 0x624   : > { %v5768_v40 = vrot.slane %v5760_v8, 7  ;;  %v5684_v6 = vpop.f32.mrf.mxu3 }
 0x625   : > { %v5759_v13 = vmax.f32 %v5755_v16, 0.0  ;;  %5845 = vmatpush.msra.mxu3 %v5813_v5 }
 0x626   : > { %5776 = vst [vmem:[#allocation6 + $0x18] sm:$0x1e] %v5768_v40 }
 0x627   : > { %v5767_v9 = vrot.slane %v5759_v13, 7 }
 0x629   : > { %5775 = vst [vmem:[#allocation6 + $0x10] sm:$0x1e] %v5767_v9 }
 0x630   : > { %v5779_v11 = vld [vmem:[#allocation6 + $0x1] ss:$8 sm:$0xf]  ;;  %v5786_v14 = vld [vmem:[#allocation6 + $0x2] ss:$8 sm:$0xf] }
 0x631   : > { %v5780_v60 = vmax.f32 %v5777_v10, %v5779_v11  ;;  %v5788_v0 = vld [vmem:[#allocation6 + $0x3] ss:$8 sm:$0xf]  ;;  %v5782_v15 = vld [vmem:[#allocation6 + $0x2] ss:$8 sm:$0xf] }
 0x632   : > { %v5789_v41 = vmax.f32 %v5786_v14, %v5788_v0  ;;  %v5791_v19 = vld [vmem:[#allocation6 + $0x4] ss:$8 sm:$0xf] }
 0x633   : > { %v5783_v47 = vmax.f32 %v5780_v60, %v5782_v15 }
 0x634   : > { %v5792_v1 = vmax.f32 %v5789_v41, %v5791_v19 }
 0x635   : > { %5784 = vst.msk [vmem:[#allocation7] ss:$8 sm:$0xf] %vm9733_vm4, %v5783_v47 }
 0x636   : > { %5793 = vst.msk [vmem:[#allocation7 + $0x1] ss:$8 sm:$0xf] %vm9733_vm4, %v5792_v1 }
 0x63d   : > { %v5795_v22 = vld [vmem:[#allocation7] sm:$0x3]  ;;  %v5796_v25 = vld [vmem:[#allocation7 + $0x8] sm:$0x3]  ;;  %v5797_v26 = vld [vmem:[#allocation7 + $0x10] sm:$0x3] }
 0x63e   : > { %v5799_v44 = vmax.f32 %v5795_v22, %v5796_v25  ;;  %v5805_v17 = vmax.f32 %v5796_v25, %v5797_v26  ;;  %v5798_v29 = vld [vmem:[#allocation7 + $0x18] sm:$0x3] }
 0x640   : > { %v5801_v23 = vrot.slane %v5799_v44, 1  ;;  %v5806_v30 = vmax.f32 %v5805_v17, %v5798_v29 }
 0x642   : > { %v5808_v27 = vrot.slane %v5806_v30, 1  ;;  %v5803_v59 = vadd.f32 %v5801_v23, %v5799_v44 }
 0x644   : > { %v5810_v52 = vadd.f32 %v5808_v27, %v5806_v30 }
 0x646   : > { %v5811_v33 = vadd.f32 %v5810_v52, %v5803_v59 }
 0x648   : > { %v5812_v24 = vmul.f32 0.25, %v5811_v33 }
 0x64a   : > { %5846 = vmatmul.f32.vlgmr.msra.gmra.mxu3 %v5812_v24 }
 0x6cd   : > { %v5847_v34 = vpop.f32.mrf.mxu3 }
 0x6ce   : > { %v5848_v48 = vadd.f32 %v5847_v34, %v5829_v36 }
 0x6d0   : > { %v5851_v38 = vsel %vm5850_vm2, %v5848_v48, -inf }
 0x6d1   : > { %5852 = vmax.xlane.f32.xlu0 %v5851_v38 }
 0x744   : > { %v5853_v45 = vpop.xlane.xlu0 %5852 }
 0x745   : > { %v5854_v46 = vsub.f32 %v5848_v48, %v5853_v45 }
 0x747   : > { %v5855_v50 = vmul.f32 1.442695, %v5854_v46 }
 0x749   : > { %9065 = vpow2.f32 %v5855_v50 }
 0x74f   : > { %v9066_v51 = vpop.eup %9065 }
 0x750   : > { %v5857_v12 = vsel %vm5850_vm2, %v9066_v51, 0.0 }
 0x751   : > { %5858 = vadd.xlane.f32.xlu1 %v5857_v12 }
 0x7c4   : > { %v5859_v53 = vpop.xlane.xlu1 %5858 }
 0x7c5   : > { %9067 = vrcp.f32 %v5859_v53  ;;  %v5871_v43 = vand.u32 2147483648, %v5859_v53  ;;  %v5869_v62 = vand.u32 2147483647, %v5859_v53  ;;  %vm5865_vm4 = vweird.f32 %v5859_v53 }
 0x7c7   : > { %v5872_v49 = vor.u32 1.1754944e-38, %v5871_v43  ;;  %vm5870_vm6 = vcmp.eq.f32.partialorder %v5869_v62, 8.507059e+37 }
 0x7cb   : > { %v9068_v54 = vpop.eup %9067 }
 0x7cc   : > { %v5861_v39 = vmul.f32 %v9068_v54, %v5859_v53  ;;  %vm5866_vm3 = vweird.f32 %v9068_v54 }
 0x7cd   : > { %vm5867_vm5 = vmor %vm5865_vm4, %vm5866_vm3 }
 0x7ce   : > { %v5862_v56 = vsub.f32 1.0, %v5861_v39 }
 0x7d0   : > { %v5863_v57 = vmul.f32 %v9068_v54, %v5862_v56 }
 0x7d2   : > { %v5864_v42 = vadd.f32 %v9068_v54, %v5863_v57 }
 0x7d4   : > { %v5868_v61 = vsel %vm5867_vm5, %v9068_v54, %v5864_v42 }
 0x7d5   : > { %v5873_v28 = vsel %vm5870_vm6, %v5872_v49, %v5868_v61 }
 0x7d6   : > { %v5874_v58 = vmul.f32 %v9066_v51, %v5873_v28 }
 0x7d8   : > { %5875 = vst.msk [vmem:[%s557_s28] sm:$0x1] %vm5850_vm2, %v5874_v58 }
 0x7d9   : > { %9396 = shalt.err (!%p9393_p8)
}
 0x7da   : > { %8959 = dma.vmem_to_hbm [thread:$0]  (%p9576_p5), %s5888_s6, 16, %s5890_s2, %s5877_s19  }
 0x7db PF: > { %s10215_s26 = sld [smem:[#allocation33_spill]]  ;;  %p9016_p9 = scmp.ge.s32.totalorder %s9455_s24, 2 }
 0x7dd   : > { %p8993_p10 = pnand %p9016_p9, %p9580_p6 }
 0x7df   : > { %p8994_p11 = pneg %p8993_p10 }
 0x7e1   : > { %s5901_s21 = sand.u32 1, %s10215_s26  }
 0x7e2   : > { %s5902_s20 = scalar_lea.sflag [#allocation10], %s5901_s21 }
 0x7e3   : > { %9438 = dma.done.wait (%p8994_p11), %s5902_s20, 16  }
 0x7e4   : > { %9440 = vsyncadd (%p8994_p11), %s5902_s20, 4294967280  ;;  %s10217_s24 = sld [smem:[#allocation35_spill]]  ;;  %s10220_s21 = smov %s9447_s22 }
 0x7e5   : > { %s10218_s4 = sld [smem:[#allocation34_spill]] }
 0x7e6   : > { %s10219_s23 = sld [smem:[#allocation36_spill]] }
 0x7ea   : > { %p28_p12 = scmp.ge.s32.totalorder %s10217_s24, 4  }
 0x7eb   : > { %s10221_s22 = smov %s10218_s4 }
 0x7ec   :  { %30 = sbr.rel (!%p28_p12) target bundleno = 13 (0xd), region = 185 }
 0x7f1   :  { %5907 = vsyncpa [#allocation9], 1 }
 0x7f2   :  { %5909 = vsyncpa [#allocation9 + $0x1], 1 }
 0x7f3   :  { %5910 = vsyncpa [#allocation12], 1 }
 0x7f4   :  { %5911 = vsyncpa [#allocation15], 1 }
 0x7f5   :  { %5912 = vsyncpa [#allocation18], 1 }
 0x7f6   :  { %5913 = vsyncpa [#allocation21], 1 }
 0x7f7   :  { %5914 = vsyncpa [#allocation24], 1 }
 0x7f8   :  { %5915 = vsyncpa [#allocation10], 1 }
 0x7f9   :  { %5917 = vsyncpa [#allocation10 + $0x1], 1 }

</bundles_post_ra>
